<compile_context>
chip_gen: v7x
topology: tpu7x:2x2x1
jax: 0.10.0
libtpu: 0.0.40
codegen_flags: <defaults>
</compile_context>

<pallas_src>
import jax
import jax.numpy as jnp
from jax import lax
from jax.experimental import pallas as pl
from jax.experimental.pallas import tpu as pltpu

_NEG_SLOPE = 0.2
_EPS = 1e-5
_K = 4          # conv kernel size (all layers)
_S = 2          # conv stride (all layers)


def _full_spec(shape):
    # Whole-array block, single grid point (full-extent blocks are exempt from
    # the (8,128) divisibility rule).
    return pl.BlockSpec(shape, lambda: (0,) * len(shape))


def _conv_out(sz):
    return (sz - _K) // _S + 1


def _vmem_capacity_bytes():
    try:
        return int(pltpu.get_tpu_info().vmem_capacity_bytes)
    except Exception:
        return 64 * 1024 * 1024          # conservative floor: v7x physical VMEM


# ----------------------------------------------------------------------------
# Fused Pallas kernel: conv1+BN+LReLU -> conv2+BN+LReLU -> conv3
# ----------------------------------------------------------------------------
def _make_disc_kernel(n, oh1, ow1, oh2, ow2, oh3, ow3, c1, c2):
    k, s = _K, _S

    def kernel(p1_ref, w1_ref, aux1_ref, w2_ref, aux2_ref, w3_ref, b3_ref,
               o_ref, a1_ref, p2_ref, a2_ref, p3_ref):
        # p1_ref  : (M1, Cin*16) bf16   layer-1 im2col patches
        # w1_ref  : (Cin*16, C1) bf16   conv1 weight
        # aux1_ref: (2, C1)      f32    BN1 gamma / beta
        # w2_ref  : (16*C1, C2)  bf16   conv2 weight, taps folded into K
        # aux2_ref: (2, C2)      f32    BN2 gamma / beta
        # w3_ref  : (1, 16*C2)   f32    conv3 weight (Cout == 1), folded
        # b3_ref  : (1, 1)       f32    conv3 bias
        # o_ref   : (M3, 1)      f32    final prediction
        # scratch : a1 (M1,C1), p2 (M2,16*C1), a2 (M2,C2), p3 (M3,16*C2) (f32)

        def bn_lrelu(y, aux):
            # One-pass batch statistics (sum & sum-of-squares), f32 throughout.
            # Conv bias omitted: per-batch-stat BN cancels it exactly.
            inv_m = 1.0 / y.shape[0]
            mean = jnp.sum(y, axis=0, keepdims=True) * inv_m
            ex2 = jnp.sum(y * y, axis=0, keepdims=True) * inv_m
            var = ex2 - mean * mean                      # biased, as torch BN
            z = (y - mean) * lax.rsqrt(var + _EPS) * aux[0:1, :] + aux[1:2, :]
            return jnp.where(z > 0, z, _NEG_SLOPE * z)   # LeakyReLU(0.2)

        def gather_patches(src_ref, dst_ref, oh_in, ow_in, oh_out, ow_out, c):
            # In-kernel im2col: dst row (b, y, x) gets, at lane group
            # q = i*k + j, the channels of src[b, s*y+i, s*x+j].  All index
            # arithmetic is static; each transfer is one strided sublane load
            # plus one contiguous masked store (no MXU, no lane relayouts).
            for b in range(n):
                for y in range(oh_out):
                    dst = (b * oh_out + y) * ow_out
                    for i in range(k):
                        src = (b * oh_in + s * y + i) * ow_in
                        for j in range(k):
                            dst_ref[pl.ds(dst, ow_out),
                                    pl.ds((i * k + j) * c, c)] = \
                                src_ref[pl.ds(src + j, ow_out, stride=s), :]

        # ---- block 1: conv1 (patches precomputed in wrapper) + BN + LeakyReLU
        y1 = jnp.dot(p1_ref[...], w1_ref[...],
                     preferred_element_type=jnp.float32)
        a1_ref[...] = bn_lrelu(y1, aux1_ref[...])

        # ---- block 2: in-kernel im2col + ONE folded matmul (K = 16*C1 = 256)
        gather_patches(a1_ref, p2_ref, oh1, ow1, oh2, ow2, c1)
        y2 = jnp.dot(p2_ref[...].astype(jnp.bfloat16), w2_ref[...],
                     preferred_element_type=jnp.float32)
        a2_ref[...] = bn_lrelu(y2, aux2_ref[...])

        # ---- block 3: final conv, Cout == 1 -> VPU multiply + lane reduction
        gather_patches(a2_ref, p3_ref, oh2, ow2, oh3, ow3, c2)
        y3 = jnp.sum(p3_ref[...] * w3_ref[...], axis=-1, keepdims=True)
        o_ref[...] = y3 + b3_ref[...]

    return kernel


# ----------------------------------------------------------------------------
# Wrapper glue
# ----------------------------------------------------------------------------
def init_params(key, n_channels, hidden_dim=16):
    ks = jax.random.split(key, 6)
    k = _K

    def conv_init(kw, kb, cin, cout):
        fan_in = cin * k * k
        bound = 1.0 / (fan_in ** 0.5)
        w = jax.random.uniform(kw, (cout, cin, k, k), jnp.float32, -bound, bound)
        b = jax.random.uniform(kb, (cout,), jnp.float32, -bound, bound)
        return w, b

    w1, b1 = conv_init(ks[0], ks[1], n_channels, hidden_dim)
    w2, b2 = conv_init(ks[2], ks[3], hidden_dim, hidden_dim * 2)
    w3, b3 = conv_init(ks[4], ks[5], hidden_dim * 2, 1)
    return {
        "w1": w1, "b1": b1, "g1": jnp.ones((hidden_dim,)), "be1": jnp.zeros((hidden_dim,)),
        "w2": w2, "b2": b2, "g2": jnp.ones((hidden_dim * 2,)), "be2": jnp.zeros((hidden_dim * 2,)),
        "w3": w3, "b3": b3,
    }


def discriminator_forward(params, x):
    """x: (N, n_channels, H, W) float32 (NCHW, same as PyTorch). Returns (N, -1)."""
    n, cin, h, w = x.shape
    k, s = _K, _S
    oh1, ow1 = _conv_out(h), _conv_out(w)
    oh2, ow2 = _conv_out(oh1), _conv_out(ow1)
    oh3, ow3 = _conv_out(oh2), _conv_out(ow2)
    m1, m2, m3 = n * oh1 * ow1, n * oh2 * ow2, n * oh3 * ow3
    c1, c2 = params["w1"].shape[0], params["w2"].shape[0]

    # Layer-1 im2col as one XLA op (negligible at this scale); patch features
    # are ordered (cin, kh, kw), matching torch_weight.reshape(Cout, -1).
    # TODO(synk): for large H*W move layer-1 im2col in-kernel too (DMA the raw
    # image and reuse gather_patches) to avoid the k*k patch expansion in HBM.
    p1 = lax.conv_general_dilated_patches(
        x, filter_shape=(k, k), window_strides=(s, s), padding="VALID",
        dimension_numbers=("NCHW", "OIHW", "NHWC")).reshape(m1, cin * k * k)

    # MXU operands in bf16 (bf16-native on v5e/v6e/v7x); BN math stays f32.
    p1 = p1.astype(jnp.bfloat16)
    w1 = params["w1"].reshape(c1, -1).T.astype(jnp.bfloat16)               # (cin*16, C1)
    # Folded-tap weights: row order (kh, kw, cin) matches the in-kernel slabs.
    w2 = params["w2"].transpose(2, 3, 1, 0).reshape(k * k * c1, c2).astype(jnp.bfloat16)
    # Final conv has Cout == 1: ship a single f32 row (2 KB) instead of a
    # 128-lane-padded weight, and reduce on the VPU inside the kernel.
    w3 = params["w3"].transpose(2, 3, 1, 0).reshape(1, k * k * c2).astype(jnp.float32)
    b3 = params["b3"].reshape(1, 1).astype(jnp.float32)
    aux1 = jnp.stack([params["g1"], params["be1"]]).astype(jnp.float32)    # (2, C1)
    aux2 = jnp.stack([params["g2"], params["be2"]]).astype(jnp.float32)    # (2, C2)

    operands = (p1, w1, aux1, w2, aux2, w3, b3)
    scratch_shapes = [
        pltpu.VMEM((m1, c1), jnp.float32),           # a1 (post-BN activation)
        pltpu.VMEM((m2, k * k * c1), jnp.float32),   # layer-2 im2col slab
        pltpu.VMEM((m2, c2), jnp.float32),           # a2
        pltpu.VMEM((m3, k * k * c2), jnp.float32),   # layer-3 im2col slab
    ]

    # Generation-aware VMEM budget: operands + output + scratch + f32 live
    # intermediates (y1/y2 + BN temporaries), kept under half the physical
    # capacity (64 MiB per TC on v7x, 128 MiB on v5e/v6e).
    operand_bytes = sum(o.size * o.dtype.itemsize for o in operands) + m3 * 4
    scratch_bytes = 4 * (m1 * c1 + m2 * k * k * c1 + m2 * c2 + m3 * k * k * c2)
    live_bytes = 4 * 4 * (m1 * c1 + m2 * k * k * c1 + m2 * c2)
    vmem_need = operand_bytes + scratch_bytes + live_bytes
    vmem_cap = _vmem_capacity_bytes()
    if vmem_need > vmem_cap // 2:
        # TODO(synk): M-tiled "parallel" grid (to use v7x's 2nd TensorCore) with
        # a two-pass BatchNorm (cross-tile sum / sum-of-squares accumulation).
        raise NotImplementedError("input too large for the fused single-block kernel")

    flops = 2 * (m1 * (cin * k * k) * c1 + m2 * (k * k * c1) * c2 + m3 * (k * k * c2))
    flops += 10 * (m1 * c1 + m2 * c2)          # BN + LeakyReLU elementwise
    cost = pl.CostEstimate(flops=flops, transcendentals=c1 + c2,
                           bytes_accessed=operand_bytes)

    out = pl.pallas_call(
        _make_disc_kernel(n, oh1, ow1, oh2, ow2, oh3, ow3, c1, c2),
        out_shape=jax.ShapeDtypeStruct((m3, 1), jnp.float32),
        in_specs=[_full_spec(o.shape) for o in operands],
        out_specs=_full_spec((m3, 1)),
        scratch_shapes=scratch_shapes,
        compiler_params=pltpu.CompilerParams(
            vmem_limit_bytes=min(32 * 1024 * 1024, vmem_cap // 2)),
        cost_estimate=cost,
    )(*operands)

    # flatten == disc_prediction.view(len(disc_prediction), -1)   (Cout3 == 1)
    return out.reshape(n, -1)


# ----------------------------------------------------------------------------
# Pure-JAX (f32) reference of the PyTorch module, for a correctness self-check
# ----------------------------------------------------------------------------
def _reference_forward(params, x):
    def conv(h, w, b):
        y = lax.conv_general_dilated(h, w, window_strides=(_S, _S), padding="VALID",
                                     dimension_numbers=("NCHW", "OIHW", "NCHW"),
                                     precision=lax.Precision.HIGHEST)
        return y + b[None, :, None, None]

    def bn_lrelu(y, g, be):
        mean = y.mean(axis=(0, 2, 3), keepdims=True)
        var = ((y - mean) ** 2).mean(axis=(0, 2, 3), keepdims=True)    # biased
        z = (y - mean) / jnp.sqrt(var + _EPS) * g[None, :, None, None] \
            + be[None, :, None, None]
        return jnp.where(z > 0, z, _NEG_SLOPE * z)

    h1 = bn_lrelu(conv(x, params["w1"], params["b1"]), params["g1"], params["be1"])
    h2 = bn_lrelu(conv(h1, params["w2"], params["b2"]), params["g2"], params["be2"])
    y3 = conv(h2, params["w3"], params["b3"])
    return y3.reshape(y3.shape[0], -1)


# ----------------------------------------------------------------------------
# Main
# ----------------------------------------------------------------------------
if __name__ == "__main__":
    key = jax.random.PRNGKey(0)
    k_param, k_img = jax.random.split(key)

    n_channels, hidden_dim = 3, 16           # cin > 1 exercises patch ordering
    batch, h, w = 2, 28, 28                  # MNIST-like: 28 -> 13 -> 5 -> 1

    params = init_params(k_param, n_channels, hidden_dim)
    image = jax.random.normal(k_img, (batch, n_channels, h, w), jnp.float32)

    fwd = jax.jit(discriminator_forward)
    out = jax.block_until_ready(fwd(params, image))          # (2, 1)
    assert out.shape == (batch, 1), out.shape

    ref = _reference_forward(params, image)
    err = float(jnp.max(jnp.abs(out - ref)))
    assert err < 0.15, f"kernel/reference mismatch: max |diff| = {err}"
    print("KERNEL_OK")
</pallas_src>

<mosaic_0001>
module attributes {stable_mosaic.version = 11 : i64} {
  func.func @kernel(%arg0: memref<338x48xbf16, #tpu.memory_space<vmem>>, %arg1: memref<48x16xbf16, #tpu.memory_space<vmem>>, %arg2: memref<2x16xf32, #tpu.memory_space<vmem>>, %arg3: memref<256x32xbf16, #tpu.memory_space<vmem>>, %arg4: memref<2x32xf32, #tpu.memory_space<vmem>>, %arg5: memref<1x512xf32, #tpu.memory_space<vmem>>, %arg6: memref<1x1xf32, #tpu.memory_space<vmem>>, %arg7: memref<2x1xf32, #tpu.memory_space<vmem>>, %arg8: memref<338x16xf32, #tpu.memory_space<vmem>>, %arg9: memref<50x256xf32, #tpu.memory_space<vmem>>, %arg10: memref<50x32xf32, #tpu.memory_space<vmem>>, %arg11: memref<2x512xf32, #tpu.memory_space<vmem>>) attributes {dimension_semantics = [], scalar_prefetch = 0 : i64, scratch_operands = 4 : i64, tpu.core_type = #tpu.core_type<tc>} {
    %c0 = arith.constant 0 : index
    %c0_0 = arith.constant 0 : index
    %0 = vector.load %arg0[%c0, %c0_0] : memref<338x48xbf16, #tpu.memory_space<vmem>>, vector<338x48xbf16>
    %c0_1 = arith.constant 0 : index
    %c0_2 = arith.constant 0 : index
    %1 = vector.load %arg1[%c0_1, %c0_2] : memref<48x16xbf16, #tpu.memory_space<vmem>>, vector<48x16xbf16>
    %cst = arith.constant dense<0.000000e+00> : vector<338x16xf32>
    %2 = tpu.matmul %0, %1, %cst {dimension_numbers = #tpu.dot_dimension_numbers<[1], [0], [0], [1], [0, 0, 1, 1], [], []>} : vector<338x48xbf16>, vector<48x16xbf16>, vector<338x16xf32> -> vector<338x16xf32>
    %c0_3 = arith.constant 0 : index
    %c0_4 = arith.constant 0 : index
    %3 = vector.load %arg2[%c0_3, %c0_4] : memref<2x16xf32, #tpu.memory_space<vmem>>, vector<2x16xf32>
    %cst_5 = arith.constant dense<0.000000e+00> : vector<16xf32>
    %4 = vector.multi_reduction <add>, %2, %cst_5 [0] : vector<338x16xf32> to vector<16xf32>
    %5 = vector.shape_cast %4 : vector<16xf32> to vector<1x16xf32>
    %cst_6 = arith.constant 2.958580e-03 : f32
    %6 = vector.broadcast %cst_6 : f32 to vector<1x16xf32>
    %7 = arith.mulf %5, %6 : vector<1x16xf32>
    %8 = arith.mulf %2, %2 : vector<338x16xf32>
    %cst_7 = arith.constant dense<0.000000e+00> : vector<16xf32>
    %9 = vector.multi_reduction <add>, %8, %cst_7 [0] : vector<338x16xf32> to vector<16xf32>
    %10 = vector.shape_cast %9 : vector<16xf32> to vector<1x16xf32>
    %cst_8 = arith.constant 2.958580e-03 : f32
    %11 = vector.broadcast %cst_8 : f32 to vector<1x16xf32>
    %12 = arith.mulf %10, %11 : vector<1x16xf32>
    %13 = arith.mulf %7, %7 : vector<1x16xf32>
    %14 = arith.subf %12, %13 : vector<1x16xf32>
    %15 = vector.broadcast %7 : vector<1x16xf32> to vector<338x16xf32>
    %16 = arith.subf %2, %15 : vector<338x16xf32>
    %cst_9 = arith.constant 9.99999974E-6 : f32
    %17 = vector.broadcast %cst_9 : f32 to vector<1x16xf32>
    %18 = arith.addf %14, %17 : vector<1x16xf32>
    %19 = math.rsqrt %18 : vector<1x16xf32>
    %20 = vector.broadcast %19 : vector<1x16xf32> to vector<338x16xf32>
    %21 = arith.mulf %16, %20 : vector<338x16xf32>
    %22 = vector.extract_strided_slice %3 {offsets = [0, 0], sizes = [1, 16], strides = [1, 1]} : vector<2x16xf32> to vector<1x16xf32>
    %23 = vector.broadcast %22 : vector<1x16xf32> to vector<338x16xf32>
    %24 = arith.mulf %21, %23 : vector<338x16xf32>
    %25 = vector.extract_strided_slice %3 {offsets = [1, 0], sizes = [1, 16], strides = [1, 1]} : vector<2x16xf32> to vector<1x16xf32>
    %26 = vector.broadcast %25 : vector<1x16xf32> to vector<338x16xf32>
    %27 = arith.addf %24, %26 : vector<338x16xf32>
    %cst_10 = arith.constant 0.000000e+00 : f32
    %28 = vector.broadcast %cst_10 : f32 to vector<338x16xf32>
    %29 = arith.cmpf ogt, %27, %28 : vector<338x16xf32>
    %cst_11 = arith.constant 2.000000e-01 : f32
    %30 = vector.broadcast %cst_11 : f32 to vector<338x16xf32>
    %31 = arith.mulf %30, %27 : vector<338x16xf32>
    %32 = arith.select %29, %27, %31 : vector<338x16xi1>, vector<338x16xf32>
    %c0_12 = arith.constant 0 : index
    %c0_13 = arith.constant 0 : index
    %33 = vector.load %arg8[%c0_12, %c0_13] : memref<338x16xf32, #tpu.memory_space<vmem>>, vector<338x16xf32>
    tpu.vector_store %arg8[%c0_12, %c0_13], %32 {strides = array<i32>} : memref<338x16xf32, #tpu.memory_space<vmem>>, vector<338x16xf32>,
    %c0_14 = arith.constant 0 : index
    %c0_15 = arith.constant 0 : index
    %34 = tpu.strided_load %arg8[%c0_14, %c0_15] {strides = array<i32: 2, 1>} : memref<338x16xf32, #tpu.memory_space<vmem>>, vector<5x16xf32>
    %c0_16 = arith.constant 0 : index
    %c0_17 = arith.constant 0 : index
    %35 = vector.load %arg9[%c0_16, %c0_17] : memref<50x256xf32, #tpu.memory_space<vmem>>, vector<5x16xf32>
    tpu.vector_store %arg9[%c0_16, %c0_17], %34 {strides = array<i32>} : memref<50x256xf32, #tpu.memory_space<vmem>>, vector<5x16xf32>,
    %c1 = arith.constant 1 : index
    %c0_18 = arith.constant 0 : index
    %36 = tpu.strided_load %arg8[%c1, %c0_18] {strides = array<i32: 2, 1>} : memref<338x16xf32, #tpu.memory_space<vmem>>, vector<5x16xf32>
    %c0_19 = arith.constant 0 : index
    %c16 = arith.constant 16 : index
    %37 = vector.load %arg9[%c0_19, %c16] : memref<50x256xf32, #tpu.memory_space<vmem>>, vector<5x16xf32>
    tpu.vector_store %arg9[%c0_19, %c16], %36 {strides = array<i32>} : memref<50x256xf32, #tpu.memory_space<vmem>>, vector<5x16xf32>,
    %c2 = arith.constant 2 : index
    %c0_20 = arith.constant 0 : index
    %38 = tpu.strided_load %arg8[%c2, %c0_20] {strides = array<i32: 2, 1>} : memref<338x16xf32, #tpu.memory_space<vmem>>, vector<5x16xf32>
    %c0_21 = arith.constant 0 : index
    %c32 = arith.constant 32 : index
    %39 = vector.load %arg9[%c0_21, %c32] : memref<50x256xf32, #tpu.memory_space<vmem>>, vector<5x16xf32>
    tpu.vector_store %arg9[%c0_21, %c32], %38 {strides = array<i32>} : memref<50x256xf32, #tpu.memory_space<vmem>>, vector<5x16xf32>,
    %c3 = arith.constant 3 : index
    %c0_22 = arith.constant 0 : index
    %40 = tpu.strided_load %arg8[%c3, %c0_22] {strides = array<i32: 2, 1>} : memref<338x16xf32, #tpu.memory_space<vmem>>, vector<5x16xf32>
    %c0_23 = arith.constant 0 : index
    %c48 = arith.constant 48 : index
    %41 = vector.load %arg9[%c0_23, %c48] : memref<50x256xf32, #tpu.memory_space<vmem>>, vector<5x16xf32>
    tpu.vector_store %arg9[%c0_23, %c48], %40 {strides = array<i32>} : memref<50x256xf32, #tpu.memory_space<vmem>>, vector<5x16xf32>,
    %c13 = arith.constant 13 : index
    %c0_24 = arith.constant 0 : index
    %42 = tpu.strided_load %arg8[%c13, %c0_24] {strides = array<i32: 2, 1>} : memref<338x16xf32, #tpu.memory_space<vmem>>, vector<5x16xf32>
    %c0_25 = arith.constant 0 : index
    %c64 = arith.constant 64 : index
    %43 = vector.load %arg9[%c0_25, %c64] : memref<50x256xf32, #tpu.memory_space<vmem>>, vector<5x16xf32>
    tpu.vector_store %arg9[%c0_25, %c64], %42 {strides = array<i32>} : memref<50x256xf32, #tpu.memory_space<vmem>>, vector<5x16xf32>,
    %c14 = arith.constant 14 : index
    %c0_26 = arith.constant 0 : index
    %44 = tpu.strided_load %arg8[%c14, %c0_26] {strides = array<i32: 2, 1>} : memref<338x16xf32, #tpu.memory_space<vmem>>, vector<5x16xf32>
    %c0_27 = arith.constant 0 : index
    %c80 = arith.constant 80 : index
    %45 = vector.load %arg9[%c0_27, %c80] : memref<50x256xf32, #tpu.memory_space<vmem>>, vector<5x16xf32>
    tpu.vector_store %arg9[%c0_27, %c80], %44 {strides = array<i32>} : memref<50x256xf32, #tpu.memory_space<vmem>>, vector<5x16xf32>,
    %c15 = arith.constant 15 : index
    %c0_28 = arith.constant 0 : index
    %46 = tpu.strided_load %arg8[%c15, %c0_28] {strides = array<i32: 2, 1>} : memref<338x16xf32, #tpu.memory_space<vmem>>, vector<5x16xf32>
    %c0_29 = arith.constant 0 : index
    %c96 = arith.constant 96 : index
    %47 = vector.load %arg9[%c0_29, %c96] : memref<50x256xf32, #tpu.memory_space<vmem>>, vector<5x16xf32>
    tpu.vector_store %arg9[%c0_29, %c96], %46 {strides = array<i32>} : memref<50x256xf32, #tpu.memory_space<vmem>>, vector<5x16xf32>,
    %c16_30 = arith.constant 16 : index
    %c0_31 = arith.constant 0 : index
    %48 = tpu.strided_load %arg8[%c16_30, %c0_31] {strides = array<i32: 2, 1>} : memref<338x16xf32, #tpu.memory_space<vmem>>, vector<5x16xf32>
    %c0_32 = arith.constant 0 : index
    %c112 = arith.constant 112 : index
    %49 = vector.load %arg9[%c0_32, %c112] : memref<50x256xf32, #tpu.memory_space<vmem>>, vector<5x16xf32>
    tpu.vector_store %arg9[%c0_32, %c112], %48 {strides = array<i32>} : memref<50x256xf32, #tpu.memory_space<vmem>>, vector<5x16xf32>,
    %c26 = arith.constant 26 : index
    %c0_33 = arith.constant 0 : index
    %50 = tpu.strided_load %arg8[%c26, %c0_33] {strides = array<i32: 2, 1>} : memref<338x16xf32, #tpu.memory_space<vmem>>, vector<5x16xf32>
    %c0_34 = arith.constant 0 : index
    %c128 = arith.constant 128 : index
    %51 = vector.load %arg9[%c0_34, %c128] : memref<50x256xf32, #tpu.memory_space<vmem>>, vector<5x16xf32>
    tpu.vector_store %arg9[%c0_34, %c128], %50 {strides = array<i32>} : memref<50x256xf32, #tpu.memory_space<vmem>>, vector<5x16xf32>,
    %c27 = arith.constant 27 : index
    %c0_35 = arith.constant 0 : index
    %52 = tpu.strided_load %arg8[%c27, %c0_35] {strides = array<i32: 2, 1>} : memref<338x16xf32, #tpu.memory_space<vmem>>, vector<5x16xf32>
    %c0_36 = arith.constant 0 : index
    %c144 = arith.constant 144 : index
    %53 = vector.load %arg9[%c0_36, %c144] : memref<50x256xf32, #tpu.memory_space<vmem>>, vector<5x16xf32>
    tpu.vector_store %arg9[%c0_36, %c144], %52 {strides = array<i32>} : memref<50x256xf32, #tpu.memory_space<vmem>>, vector<5x16xf32>,
    %c28 = arith.constant 28 : index
    %c0_37 = arith.constant 0 : index
    %54 = tpu.strided_load %arg8[%c28, %c0_37] {strides = array<i32: 2, 1>} : memref<338x16xf32, #tpu.memory_space<vmem>>, vector<5x16xf32>
    %c0_38 = arith.constant 0 : index
    %c160 = arith.constant 160 : index
    %55 = vector.load %arg9[%c0_38, %c160] : memref<50x256xf32, #tpu.memory_space<vmem>>, vector<5x16xf32>
    tpu.vector_store %arg9[%c0_38, %c160], %54 {strides = array<i32>} : memref<50x256xf32, #tpu.memory_space<vmem>>, vector<5x16xf32>,
    %c29 = arith.constant 29 : index
    %c0_39 = arith.constant 0 : index
    %56 = tpu.strided_load %arg8[%c29, %c0_39] {strides = array<i32: 2, 1>} : memref<338x16xf32, #tpu.memory_space<vmem>>, vector<5x16xf32>
    %c0_40 = arith.constant 0 : index
    %c176 = arith.constant 176 : index
    %57 = vector.load %arg9[%c0_40, %c176] : memref<50x256xf32, #tpu.memory_space<vmem>>, vector<5x16xf32>
    tpu.vector_store %arg9[%c0_40, %c176], %56 {strides = array<i32>} : memref<50x256xf32, #tpu.memory_space<vmem>>, vector<5x16xf32>,
    %c39 = arith.constant 39 : index
    %c0_41 = arith.constant 0 : index
    %58 = tpu.strided_load %arg8[%c39, %c0_41] {strides = array<i32: 2, 1>} : memref<338x16xf32, #tpu.memory_space<vmem>>, vector<5x16xf32>
    %c0_42 = arith.constant 0 : index
    %c192 = arith.constant 192 : index
    %59 = vector.load %arg9[%c0_42, %c192] : memref<50x256xf32, #tpu.memory_space<vmem>>, vector<5x16xf32>
    tpu.vector_store %arg9[%c0_42, %c192], %58 {strides = array<i32>} : memref<50x256xf32, #tpu.memory_space<vmem>>, vector<5x16xf32>,
    %c40 = arith.constant 40 : index
    %c0_43 = arith.constant 0 : index
    %60 = tpu.strided_load %arg8[%c40, %c0_43] {strides = array<i32: 2, 1>} : memref<338x16xf32, #tpu.memory_space<vmem>>, vector<5x16xf32>
    %c0_44 = arith.constant 0 : index
    %c208 = arith.constant 208 : index
    %61 = vector.load %arg9[%c0_44, %c208] : memref<50x256xf32, #tpu.memory_space<vmem>>, vector<5x16xf32>
    tpu.vector_store %arg9[%c0_44, %c208], %60 {strides = array<i32>} : memref<50x256xf32, #tpu.memory_space<vmem>>, vector<5x16xf32>,
    %c41 = arith.constant 41 : index
    %c0_45 = arith.constant 0 : index
    %62 = tpu.strided_load %arg8[%c41, %c0_45] {strides = array<i32: 2, 1>} : memref<338x16xf32, #tpu.memory_space<vmem>>, vector<5x16xf32>
    %c0_46 = arith.constant 0 : index
    %c224 = arith.constant 224 : index
    %63 = vector.load %arg9[%c0_46, %c224] : memref<50x256xf32, #tpu.memory_space<vmem>>, vector<5x16xf32>
    tpu.vector_store %arg9[%c0_46, %c224], %62 {strides = array<i32>} : memref<50x256xf32, #tpu.memory_space<vmem>>, vector<5x16xf32>,
    %c42 = arith.constant 42 : index
    %c0_47 = arith.constant 0 : index
    %64 = tpu.strided_load %arg8[%c42, %c0_47] {strides = array<i32: 2, 1>} : memref<338x16xf32, #tpu.memory_space<vmem>>, vector<5x16xf32>
    %c0_48 = arith.constant 0 : index
    %c240 = arith.constant 240 : index
    %65 = vector.load %arg9[%c0_48, %c240] : memref<50x256xf32, #tpu.memory_space<vmem>>, vector<5x16xf32>
    tpu.vector_store %arg9[%c0_48, %c240], %64 {strides = array<i32>} : memref<50x256xf32, #tpu.memory_space<vmem>>, vector<5x16xf32>,
    %c26_49 = arith.constant 26 : index
    %c0_50 = arith.constant 0 : index
    %66 = tpu.strided_load %arg8[%c26_49, %c0_50] {strides = array<i32: 2, 1>} : memref<338x16xf32, #tpu.memory_space<vmem>>, vector<5x16xf32>
    %c5 = arith.constant 5 : index
    %c0_51 = arith.constant 0 : index
    %67 = vector.load %arg9[%c5, %c0_51] : memref<50x256xf32, #tpu.memory_space<vmem>>, vector<5x16xf32>
    tpu.vector_store %arg9[%c5, %c0_51], %66 {strides = array<i32>} : memref<50x256xf32, #tpu.memory_space<vmem>>, vector<5x16xf32>,
    %c27_52 = arith.constant 27 : index
    %c0_53 = arith.constant 0 : index
    %68 = tpu.strided_load %arg8[%c27_52, %c0_53] {strides = array<i32: 2, 1>} : memref<338x16xf32, #tpu.memory_space<vmem>>, vector<5x16xf32>
    %c5_54 = arith.constant 5 : index
    %c16_55 = arith.constant 16 : index
    %69 = vector.load %arg9[%c5_54, %c16_55] : memref<50x256xf32, #tpu.memory_space<vmem>>, vector<5x16xf32>
    tpu.vector_store %arg9[%c5_54, %c16_55], %68 {strides = array<i32>} : memref<50x256xf32, #tpu.memory_space<vmem>>, vector<5x16xf32>,
    %c28_56 = arith.constant 28 : index
    %c0_57 = arith.constant 0 : index
    %70 = tpu.strided_load %arg8[%c28_56, %c0_57] {strides = array<i32: 2, 1>} : memref<338x16xf32, #tpu.memory_space<vmem>>, vector<5x16xf32>
    %c5_58 = arith.constant 5 : index
    %c32_59 = arith.constant 32 : index
    %71 = vector.load %arg9[%c5_58, %c32_59] : memref<50x256xf32, #tpu.memory_space<vmem>>, vector<5x16xf32>
    tpu.vector_store %arg9[%c5_58, %c32_59], %70 {strides = array<i32>} : memref<50x256xf32, #tpu.memory_space<vmem>>, vector<5x16xf32>,
    %c29_60 = arith.constant 29 : index
    %c0_61 = arith.constant 0 : index
    %72 = tpu.strided_load %arg8[%c29_60, %c0_61] {strides = array<i32: 2, 1>} : memref<338x16xf32, #tpu.memory_space<vmem>>, vector<5x16xf32>
    %c5_62 = arith.constant 5 : index
    %c48_63 = arith.constant 48 : index
    %73 = vector.load %arg9[%c5_62, %c48_63] : memref<50x256xf32, #tpu.memory_space<vmem>>, vector<5x16xf32>
    tpu.vector_store %arg9[%c5_62, %c48_63], %72 {strides = array<i32>} : memref<50x256xf32, #tpu.memory_space<vmem>>, vector<5x16xf32>,
    %c39_64 = arith.constant 39 : index
    %c0_65 = arith.constant 0 : index
    %74 = tpu.strided_load %arg8[%c39_64, %c0_65] {strides = array<i32: 2, 1>} : memref<338x16xf32, #tpu.memory_space<vmem>>, vector<5x16xf32>
    %c5_66 = arith.constant 5 : index
    %c64_67 = arith.constant 64 : index
    %75 = vector.load %arg9[%c5_66, %c64_67] : memref<50x256xf32, #tpu.memory_space<vmem>>, vector<5x16xf32>
    tpu.vector_store %arg9[%c5_66, %c64_67], %74 {strides = array<i32>} : memref<50x256xf32, #tpu.memory_space<vmem>>, vector<5x16xf32>,
    %c40_68 = arith.constant 40 : index
    %c0_69 = arith.constant 0 : index
    %76 = tpu.strided_load %arg8[%c40_68, %c0_69] {strides = array<i32: 2, 1>} : memref<338x16xf32, #tpu.memory_space<vmem>>, vector<5x16xf32>
    %c5_70 = arith.constant 5 : index
    %c80_71 = arith.constant 80 : index
    %77 = vector.load %arg9[%c5_70, %c80_71] : memref<50x256xf32, #tpu.memory_space<vmem>>, vector<5x16xf32>
    tpu.vector_store %arg9[%c5_70, %c80_71], %76 {strides = array<i32>} : memref<50x256xf32, #tpu.memory_space<vmem>>, vector<5x16xf32>,
    %c41_72 = arith.constant 41 : index
    %c0_73 = arith.constant 0 : index
    %78 = tpu.strided_load %arg8[%c41_72, %c0_73] {strides = array<i32: 2, 1>} : memref<338x16xf32, #tpu.memory_space<vmem>>, vector<5x16xf32>
    %c5_74 = arith.constant 5 : index
    %c96_75 = arith.constant 96 : index
    %79 = vector.load %arg9[%c5_74, %c96_75] : memref<50x256xf32, #tpu.memory_space<vmem>>, vector<5x16xf32>
    tpu.vector_store %arg9[%c5_74, %c96_75], %78 {strides = array<i32>} : memref<50x256xf32, #tpu.memory_space<vmem>>, vector<5x16xf32>,
    %c42_76 = arith.constant 42 : index
    %c0_77 = arith.constant 0 : index
    %80 = tpu.strided_load %arg8[%c42_76, %c0_77] {strides = array<i32: 2, 1>} : memref<338x16xf32, #tpu.memory_space<vmem>>, vector<5x16xf32>
    %c5_78 = arith.constant 5 : index
    %c112_79 = arith.constant 112 : index
    %81 = vector.load %arg9[%c5_78, %c112_79] : memref<50x256xf32, #tpu.memory_space<vmem>>, vector<5x16xf32>
    tpu.vector_store %arg9[%c5_78, %c112_79], %80 {strides = array<i32>} : memref<50x256xf32, #tpu.memory_space<vmem>>, vector<5x16xf32>,
    %c52 = arith.constant 52 : index
    %c0_80 = arith.constant 0 : index
    %82 = tpu.strided_load %arg8[%c52, %c0_80] {strides = array<i32: 2, 1>} : memref<338x16xf32, #tpu.memory_space<vmem>>, vector<5x16xf32>
    %c5_81 = arith.constant 5 : index
    %c128_82 = arith.constant 128 : index
    %83 = vector.load %arg9[%c5_81, %c128_82] : memref<50x256xf32, #tpu.memory_space<vmem>>, vector<5x16xf32>
    tpu.vector_store %arg9[%c5_81, %c128_82], %82 {strides = array<i32>} : memref<50x256xf32, #tpu.memory_space<vmem>>, vector<5x16xf32>,
    %c53 = arith.constant 53 : index
    %c0_83 = arith.constant 0 : index
    %84 = tpu.strided_load %arg8[%c53, %c0_83] {strides = array<i32: 2, 1>} : memref<338x16xf32, #tpu.memory_space<vmem>>, vector<5x16xf32>
    %c5_84 = arith.constant 5 : index
    %c144_85 = arith.constant 144 : index
    %85 = vector.load %arg9[%c5_84, %c144_85] : memref<50x256xf32, #tpu.memory_space<vmem>>, vector<5x16xf32>
    tpu.vector_store %arg9[%c5_84, %c144_85], %84 {strides = array<i32>} : memref<50x256xf32, #tpu.memory_space<vmem>>, vector<5x16xf32>,
    %c54 = arith.constant 54 : index
    %c0_86 = arith.constant 0 : index
    %86 = tpu.strided_load %arg8[%c54, %c0_86] {strides = array<i32: 2, 1>} : memref<338x16xf32, #tpu.memory_space<vmem>>, vector<5x16xf32>
    %c5_87 = arith.constant 5 : index
    %c160_88 = arith.constant 160 : index
    %87 = vector.load %arg9[%c5_87, %c160_88] : memref<50x256xf32, #tpu.memory_space<vmem>>, vector<5x16xf32>
    tpu.vector_store %arg9[%c5_87, %c160_88], %86 {strides = array<i32>} : memref<50x256xf32, #tpu.memory_space<vmem>>, vector<5x16xf32>,
    %c55 = arith.constant 55 : index
    %c0_89 = arith.constant 0 : index
    %88 = tpu.strided_load %arg8[%c55, %c0_89] {strides = array<i32: 2, 1>} : memref<338x16xf32, #tpu.memory_space<vmem>>, vector<5x16xf32>
    %c5_90 = arith.constant 5 : index
    %c176_91 = arith.constant 176 : index
    %89 = vector.load %arg9[%c5_90, %c176_91] : memref<50x256xf32, #tpu.memory_space<vmem>>, vector<5x16xf32>
    tpu.vector_store %arg9[%c5_90, %c176_91], %88 {strides = array<i32>} : memref<50x256xf32, #tpu.memory_space<vmem>>, vector<5x16xf32>,
    %c65 = arith.constant 65 : index
    %c0_92 = arith.constant 0 : index
    %90 = tpu.strided_load %arg8[%c65, %c0_92] {strides = array<i32: 2, 1>} : memref<338x16xf32, #tpu.memory_space<vmem>>, vector<5x16xf32>
    %c5_93 = arith.constant 5 : index
    %c192_94 = arith.constant 192 : index
    %91 = vector.load %arg9[%c5_93, %c192_94] : memref<50x256xf32, #tpu.memory_space<vmem>>, vector<5x16xf32>
    tpu.vector_store %arg9[%c5_93, %c192_94], %90 {strides = array<i32>} : memref<50x256xf32, #tpu.memory_space<vmem>>, vector<5x16xf32>,
    %c66 = arith.constant 66 : index
    %c0_95 = arith.constant 0 : index
    %92 = tpu.strided_load %arg8[%c66, %c0_95] {strides = array<i32: 2, 1>} : memref<338x16xf32, #tpu.memory_space<vmem>>, vector<5x16xf32>
    %c5_96 = arith.constant 5 : index
    %c208_97 = arith.constant 208 : index
    %93 = vector.load %arg9[%c5_96, %c208_97] : memref<50x256xf32, #tpu.memory_space<vmem>>, vector<5x16xf32>
    tpu.vector_store %arg9[%c5_96, %c208_97], %92 {strides = array<i32>} : memref<50x256xf32, #tpu.memory_space<vmem>>, vector<5x16xf32>,
    %c67 = arith.constant 67 : index
    %c0_98 = arith.constant 0 : index
    %94 = tpu.strided_load %arg8[%c67, %c0_98] {strides = array<i32: 2, 1>} : memref<338x16xf32, #tpu.memory_space<vmem>>, vector<5x16xf32>
    %c5_99 = arith.constant 5 : index
    %c224_100 = arith.constant 224 : index
    %95 = vector.load %arg9[%c5_99, %c224_100] : memref<50x256xf32, #tpu.memory_space<vmem>>, vector<5x16xf32>
    tpu.vector_store %arg9[%c5_99, %c224_100], %94 {strides = array<i32>} : memref<50x256xf32, #tpu.memory_space<vmem>>, vector<5x16xf32>,
    %c68 = arith.constant 68 : index
    %c0_101 = arith.constant 0 : index
    %96 = tpu.strided_load %arg8[%c68, %c0_101] {strides = array<i32: 2, 1>} : memref<338x16xf32, #tpu.memory_space<vmem>>, vector<5x16xf32>
    %c5_102 = arith.constant 5 : index
    %c240_103 = arith.constant 240 : index
    %97 = vector.load %arg9[%c5_102, %c240_103] : memref<50x256xf32, #tpu.memory_space<vmem>>, vector<5x16xf32>
    tpu.vector_store %arg9[%c5_102, %c240_103], %96 {strides = array<i32>} : memref<50x256xf32, #tpu.memory_space<vmem>>, vector<5x16xf32>,
    %c52_104 = arith.constant 52 : index
    %c0_105 = arith.constant 0 : index
    %98 = tpu.strided_load %arg8[%c52_104, %c0_105] {strides = array<i32: 2, 1>} : memref<338x16xf32, #tpu.memory_space<vmem>>, vector<5x16xf32>
    %c10 = arith.constant 10 : index
    %c0_106 = arith.constant 0 : index
    %99 = vector.load %arg9[%c10, %c0_106] : memref<50x256xf32, #tpu.memory_space<vmem>>, vector<5x16xf32>
    tpu.vector_store %arg9[%c10, %c0_106], %98 {strides = array<i32>} : memref<50x256xf32, #tpu.memory_space<vmem>>, vector<5x16xf32>,
    %c53_107 = arith.constant 53 : index
    %c0_108 = arith.constant 0 : index
    %100 = tpu.strided_load %arg8[%c53_107, %c0_108] {strides = array<i32: 2, 1>} : memref<338x16xf32, #tpu.memory_space<vmem>>, vector<5x16xf32>
    %c10_109 = arith.constant 10 : index
    %c16_110 = arith.constant 16 : index
    %101 = vector.load %arg9[%c10_109, %c16_110] : memref<50x256xf32, #tpu.memory_space<vmem>>, vector<5x16xf32>
    tpu.vector_store %arg9[%c10_109, %c16_110], %100 {strides = array<i32>} : memref<50x256xf32, #tpu.memory_space<vmem>>, vector<5x16xf32>,
    %c54_111 = arith.constant 54 : index
    %c0_112 = arith.constant 0 : index
    %102 = tpu.strided_load %arg8[%c54_111, %c0_112] {strides = array<i32: 2, 1>} : memref<338x16xf32, #tpu.memory_space<vmem>>, vector<5x16xf32>
    %c10_113 = arith.constant 10 : index
    %c32_114 = arith.constant 32 : index
    %103 = vector.load %arg9[%c10_113, %c32_114] : memref<50x256xf32, #tpu.memory_space<vmem>>, vector<5x16xf32>
    tpu.vector_store %arg9[%c10_113, %c32_114], %102 {strides = array<i32>} : memref<50x256xf32, #tpu.memory_space<vmem>>, vector<5x16xf32>,
    %c55_115 = arith.constant 55 : index
    %c0_116 = arith.constant 0 : index
    %104 = tpu.strided_load %arg8[%c55_115, %c0_116] {strides = array<i32: 2, 1>} : memref<338x16xf32, #tpu.memory_space<vmem>>, vector<5x16xf32>
    %c10_117 = arith.constant 10 : index
    %c48_118 = arith.constant 48 : index
    %105 = vector.load %arg9[%c10_117, %c48_118] : memref<50x256xf32, #tpu.memory_space<vmem>>, vector<5x16xf32>
    tpu.vector_store %arg9[%c10_117, %c48_118], %104 {strides = array<i32>} : memref<50x256xf32, #tpu.memory_space<vmem>>, vector<5x16xf32>,
    %c65_119 = arith.constant 65 : index
    %c0_120 = arith.constant 0 : index
    %106 = tpu.strided_load %arg8[%c65_119, %c0_120] {strides = array<i32: 2, 1>} : memref<338x16xf32, #tpu.memory_space<vmem>>, vector<5x16xf32>
    %c10_121 = arith.constant 10 : index
    %c64_122 = arith.constant 64 : index
    %107 = vector.load %arg9[%c10_121, %c64_122] : memref<50x256xf32, #tpu.memory_space<vmem>>, vector<5x16xf32>
    tpu.vector_store %arg9[%c10_121, %c64_122], %106 {strides = array<i32>} : memref<50x256xf32, #tpu.memory_space<vmem>>, vector<5x16xf32>,
    %c66_123 = arith.constant 66 : index
    %c0_124 = arith.constant 0 : index
    %108 = tpu.strided_load %arg8[%c66_123, %c0_124] {strides = array<i32: 2, 1>} : memref<338x16xf32, #tpu.memory_space<vmem>>, vector<5x16xf32>
    %c10_125 = arith.constant 10 : index
    %c80_126 = arith.constant 80 : index
    %109 = vector.load %arg9[%c10_125, %c80_126] : memref<50x256xf32, #tpu.memory_space<vmem>>, vector<5x16xf32>
    tpu.vector_store %arg9[%c10_125, %c80_126], %108 {strides = array<i32>} : memref<50x256xf32, #tpu.memory_space<vmem>>, vector<5x16xf32>,
    %c67_127 = arith.constant 67 : index
    %c0_128 = arith.constant 0 : index
    %110 = tpu.strided_load %arg8[%c67_127, %c0_128] {strides = array<i32: 2, 1>} : memref<338x16xf32, #tpu.memory_space<vmem>>, vector<5x16xf32>
    %c10_129 = arith.constant 10 : index
    %c96_130 = arith.constant 96 : index
    %111 = vector.load %arg9[%c10_129, %c96_130] : memref<50x256xf32, #tpu.memory_space<vmem>>, vector<5x16xf32>
    tpu.vector_store %arg9[%c10_129, %c96_130], %110 {strides = array<i32>} : memref<50x256xf32, #tpu.memory_space<vmem>>, vector<5x16xf32>,
    %c68_131 = arith.constant 68 : index
    %c0_132 = arith.constant 0 : index
    %112 = tpu.strided_load %arg8[%c68_131, %c0_132] {strides = array<i32: 2, 1>} : memref<338x16xf32, #tpu.memory_space<vmem>>, vector<5x16xf32>
    %c10_133 = arith.constant 10 : index
    %c112_134 = arith.constant 112 : index
    %113 = vector.load %arg9[%c10_133, %c112_134] : memref<50x256xf32, #tpu.memory_space<vmem>>, vector<5x16xf32>
    tpu.vector_store %arg9[%c10_133, %c112_134], %112 {strides = array<i32>} : memref<50x256xf32, #tpu.memory_space<vmem>>, vector<5x16xf32>,
    %c78 = arith.constant 78 : index
    %c0_135 = arith.constant 0 : index
    %114 = tpu.strided_load %arg8[%c78, %c0_135] {strides = array<i32: 2, 1>} : memref<338x16xf32, #tpu.memory_space<vmem>>, vector<5x16xf32>
    %c10_136 = arith.constant 10 : index
    %c128_137 = arith.constant 128 : index
    %115 = vector.load %arg9[%c10_136, %c128_137] : memref<50x256xf32, #tpu.memory_space<vmem>>, vector<5x16xf32>
    tpu.vector_store %arg9[%c10_136, %c128_137], %114 {strides = array<i32>} : memref<50x256xf32, #tpu.memory_space<vmem>>, vector<5x16xf32>,
    %c79 = arith.constant 79 : index
    %c0_138 = arith.constant 0 : index
    %116 = tpu.strided_load %arg8[%c79, %c0_138] {strides = array<i32: 2, 1>} : memref<338x16xf32, #tpu.memory_space<vmem>>, vector<5x16xf32>
    %c10_139 = arith.constant 10 : index
    %c144_140 = arith.constant 144 : index
    %117 = vector.load %arg9[%c10_139, %c144_140] : memref<50x256xf32, #tpu.memory_space<vmem>>, vector<5x16xf32>
    tpu.vector_store %arg9[%c10_139, %c144_140], %116 {strides = array<i32>} : memref<50x256xf32, #tpu.memory_space<vmem>>, vector<5x16xf32>,
    %c80_141 = arith.constant 80 : index
    %c0_142 = arith.constant 0 : index
    %118 = tpu.strided_load %arg8[%c80_141, %c0_142] {strides = array<i32: 2, 1>} : memref<338x16xf32, #tpu.memory_space<vmem>>, vector<5x16xf32>
    %c10_143 = arith.constant 10 : index
    %c160_144 = arith.constant 160 : index
    %119 = vector.load %arg9[%c10_143, %c160_144] : memref<50x256xf32, #tpu.memory_space<vmem>>, vector<5x16xf32>
    tpu.vector_store %arg9[%c10_143, %c160_144], %118 {strides = array<i32>} : memref<50x256xf32, #tpu.memory_space<vmem>>, vector<5x16xf32>,
    %c81 = arith.constant 81 : index
    %c0_145 = arith.constant 0 : index
    %120 = tpu.strided_load %arg8[%c81, %c0_145] {strides = array<i32: 2, 1>} : memref<338x16xf32, #tpu.memory_space<vmem>>, vector<5x16xf32>
    %c10_146 = arith.constant 10 : index
    %c176_147 = arith.constant 176 : index
    %121 = vector.load %arg9[%c10_146, %c176_147] : memref<50x256xf32, #tpu.memory_space<vmem>>, vector<5x16xf32>
    tpu.vector_store %arg9[%c10_146, %c176_147], %120 {strides = array<i32>} : memref<50x256xf32, #tpu.memory_space<vmem>>, vector<5x16xf32>,
    %c91 = arith.constant 91 : index
    %c0_148 = arith.constant 0 : index
    %122 = tpu.strided_load %arg8[%c91, %c0_148] {strides = array<i32: 2, 1>} : memref<338x16xf32, #tpu.memory_space<vmem>>, vector<5x16xf32>
    %c10_149 = arith.constant 10 : index
    %c192_150 = arith.constant 192 : index
    %123 = vector.load %arg9[%c10_149, %c192_150] : memref<50x256xf32, #tpu.memory_space<vmem>>, vector<5x16xf32>
    tpu.vector_store %arg9[%c10_149, %c192_150], %122 {strides = array<i32>} : memref<50x256xf32, #tpu.memory_space<vmem>>, vector<5x16xf32>,
    %c92 = arith.constant 92 : index
    %c0_151 = arith.constant 0 : index
    %124 = tpu.strided_load %arg8[%c92, %c0_151] {strides = array<i32: 2, 1>} : memref<338x16xf32, #tpu.memory_space<vmem>>, vector<5x16xf32>
    %c10_152 = arith.constant 10 : index
    %c208_153 = arith.constant 208 : index
    %125 = vector.load %arg9[%c10_152, %c208_153] : memref<50x256xf32, #tpu.memory_space<vmem>>, vector<5x16xf32>
    tpu.vector_store %arg9[%c10_152, %c208_153], %124 {strides = array<i32>} : memref<50x256xf32, #tpu.memory_space<vmem>>, vector<5x16xf32>,
    %c93 = arith.constant 93 : index
    %c0_154 = arith.constant 0 : index
    %126 = tpu.strided_load %arg8[%c93, %c0_154] {strides = array<i32: 2, 1>} : memref<338x16xf32, #tpu.memory_space<vmem>>, vector<5x16xf32>
    %c10_155 = arith.constant 10 : index
    %c224_156 = arith.constant 224 : index
    %127 = vector.load %arg9[%c10_155, %c224_156] : memref<50x256xf32, #tpu.memory_space<vmem>>, vector<5x16xf32>
    tpu.vector_store %arg9[%c10_155, %c224_156], %126 {strides = array<i32>} : memref<50x256xf32, #tpu.memory_space<vmem>>, vector<5x16xf32>,
    %c94 = arith.constant 94 : index
    %c0_157 = arith.constant 0 : index
    %128 = tpu.strided_load %arg8[%c94, %c0_157] {strides = array<i32: 2, 1>} : memref<338x16xf32, #tpu.memory_space<vmem>>, vector<5x16xf32>
    %c10_158 = arith.constant 10 : index
    %c240_159 = arith.constant 240 : index
    %129 = vector.load %arg9[%c10_158, %c240_159] : memref<50x256xf32, #tpu.memory_space<vmem>>, vector<5x16xf32>
    tpu.vector_store %arg9[%c10_158, %c240_159], %128 {strides = array<i32>} : memref<50x256xf32, #tpu.memory_space<vmem>>, vector<5x16xf32>,
    %c78_160 = arith.constant 78 : index
    %c0_161 = arith.constant 0 : index
    %130 = tpu.strided_load %arg8[%c78_160, %c0_161] {strides = array<i32: 2, 1>} : memref<338x16xf32, #tpu.memory_space<vmem>>, vector<5x16xf32>
    %c15_162 = arith.constant 15 : index
    %c0_163 = arith.constant 0 : index
    %131 = vector.load %arg9[%c15_162, %c0_163] : memref<50x256xf32, #tpu.memory_space<vmem>>, vector<5x16xf32>
    tpu.vector_store %arg9[%c15_162, %c0_163], %130 {strides = array<i32>} : memref<50x256xf32, #tpu.memory_space<vmem>>, vector<5x16xf32>,
    %c79_164 = arith.constant 79 : index
    %c0_165 = arith.constant 0 : index
    %132 = tpu.strided_load %arg8[%c79_164, %c0_165] {strides = array<i32: 2, 1>} : memref<338x16xf32, #tpu.memory_space<vmem>>, vector<5x16xf32>
    %c15_166 = arith.constant 15 : index
    %c16_167 = arith.constant 16 : index
    %133 = vector.load %arg9[%c15_166, %c16_167] : memref<50x256xf32, #tpu.memory_space<vmem>>, vector<5x16xf32>
    tpu.vector_store %arg9[%c15_166, %c16_167], %132 {strides = array<i32>} : memref<50x256xf32, #tpu.memory_space<vmem>>, vector<5x16xf32>,
    %c80_168 = arith.constant 80 : index
    %c0_169 = arith.constant 0 : index
    %134 = tpu.strided_load %arg8[%c80_168, %c0_169] {strides = array<i32: 2, 1>} : memref<338x16xf32, #tpu.memory_space<vmem>>, vector<5x16xf32>
    %c15_170 = arith.constant 15 : index
    %c32_171 = arith.constant 32 : index
    %135 = vector.load %arg9[%c15_170, %c32_171] : memref<50x256xf32, #tpu.memory_space<vmem>>, vector<5x16xf32>
    tpu.vector_store %arg9[%c15_170, %c32_171], %134 {strides = array<i32>} : memref<50x256xf32, #tpu.memory_space<vmem>>, vector<5x16xf32>,
    %c81_172 = arith.constant 81 : index
    %c0_173 = arith.constant 0 : index
    %136 = tpu.strided_load %arg8[%c81_172, %c0_173] {strides = array<i32: 2, 1>} : memref<338x16xf32, #tpu.memory_space<vmem>>, vector<5x16xf32>
    %c15_174 = arith.constant 15 : index
    %c48_175 = arith.constant 48 : index
    %137 = vector.load %arg9[%c15_174, %c48_175] : memref<50x256xf32, #tpu.memory_space<vmem>>, vector<5x16xf32>
    tpu.vector_store %arg9[%c15_174, %c48_175], %136 {strides = array<i32>} : memref<50x256xf32, #tpu.memory_space<vmem>>, vector<5x16xf32>,
    %c91_176 = arith.constant 91 : index
    %c0_177 = arith.constant 0 : index
    %138 = tpu.strided_load %arg8[%c91_176, %c0_177] {strides = array<i32: 2, 1>} : memref<338x16xf32, #tpu.memory_space<vmem>>, vector<5x16xf32>
    %c15_178 = arith.constant 15 : index
    %c64_179 = arith.constant 64 : index
    %139 = vector.load %arg9[%c15_178, %c64_179] : memref<50x256xf32, #tpu.memory_space<vmem>>, vector<5x16xf32>
    tpu.vector_store %arg9[%c15_178, %c64_179], %138 {strides = array<i32>} : memref<50x256xf32, #tpu.memory_space<vmem>>, vector<5x16xf32>,
    %c92_180 = arith.constant 92 : index
    %c0_181 = arith.constant 0 : index
    %140 = tpu.strided_load %arg8[%c92_180, %c0_181] {strides = array<i32: 2, 1>} : memref<338x16xf32, #tpu.memory_space<vmem>>, vector<5x16xf32>
    %c15_182 = arith.constant 15 : index
    %c80_183 = arith.constant 80 : index
    %141 = vector.load %arg9[%c15_182, %c80_183] : memref<50x256xf32, #tpu.memory_space<vmem>>, vector<5x16xf32>
    tpu.vector_store %arg9[%c15_182, %c80_183], %140 {strides = array<i32>} : memref<50x256xf32, #tpu.memory_space<vmem>>, vector<5x16xf32>,
    %c93_184 = arith.constant 93 : index
    %c0_185 = arith.constant 0 : index
    %142 = tpu.strided_load %arg8[%c93_184, %c0_185] {strides = array<i32: 2, 1>} : memref<338x16xf32, #tpu.memory_space<vmem>>, vector<5x16xf32>
    %c15_186 = arith.constant 15 : index
    %c96_187 = arith.constant 96 : index
    %143 = vector.load %arg9[%c15_186, %c96_187] : memref<50x256xf32, #tpu.memory_space<vmem>>, vector<5x16xf32>
    tpu.vector_store %arg9[%c15_186, %c96_187], %142 {strides = array<i32>} : memref<50x256xf32, #tpu.memory_space<vmem>>, vector<5x16xf32>,
    %c94_188 = arith.constant 94 : index
    %c0_189 = arith.constant 0 : index
    %144 = tpu.strided_load %arg8[%c94_188, %c0_189] {strides = array<i32: 2, 1>} : memref<338x16xf32, #tpu.memory_space<vmem>>, vector<5x16xf32>
    %c15_190 = arith.constant 15 : index
    %c112_191 = arith.constant 112 : index
    %145 = vector.load %arg9[%c15_190, %c112_191] : memref<50x256xf32, #tpu.memory_space<vmem>>, vector<5x16xf32>
    tpu.vector_store %arg9[%c15_190, %c112_191], %144 {strides = array<i32>} : memref<50x256xf32, #tpu.memory_space<vmem>>, vector<5x16xf32>,
    %c104 = arith.constant 104 : index
    %c0_192 = arith.constant 0 : index
    %146 = tpu.strided_load %arg8[%c104, %c0_192] {strides = array<i32: 2, 1>} : memref<338x16xf32, #tpu.memory_space<vmem>>, vector<5x16xf32>
    %c15_193 = arith.constant 15 : index
    %c128_194 = arith.constant 128 : index
    %147 = vector.load %arg9[%c15_193, %c128_194] : memref<50x256xf32, #tpu.memory_space<vmem>>, vector<5x16xf32>
    tpu.vector_store %arg9[%c15_193, %c128_194], %146 {strides = array<i32>} : memref<50x256xf32, #tpu.memory_space<vmem>>, vector<5x16xf32>,
    %c105 = arith.constant 105 : index
    %c0_195 = arith.constant 0 : index
    %148 = tpu.strided_load %arg8[%c105, %c0_195] {strides = array<i32: 2, 1>} : memref<338x16xf32, #tpu.memory_space<vmem>>, vector<5x16xf32>
    %c15_196 = arith.constant 15 : index
    %c144_197 = arith.constant 144 : index
    %149 = vector.load %arg9[%c15_196, %c144_197] : memref<50x256xf32, #tpu.memory_space<vmem>>, vector<5x16xf32>
    tpu.vector_store %arg9[%c15_196, %c144_197], %148 {strides = array<i32>} : memref<50x256xf32, #tpu.memory_space<vmem>>, vector<5x16xf32>,
    %c106 = arith.constant 106 : index
    %c0_198 = arith.constant 0 : index
    %150 = tpu.strided_load %arg8[%c106, %c0_198] {strides = array<i32: 2, 1>} : memref<338x16xf32, #tpu.memory_space<vmem>>, vector<5x16xf32>
    %c15_199 = arith.constant 15 : index
    %c160_200 = arith.constant 160 : index
    %151 = vector.load %arg9[%c15_199, %c160_200] : memref<50x256xf32, #tpu.memory_space<vmem>>, vector<5x16xf32>
    tpu.vector_store %arg9[%c15_199, %c160_200], %150 {strides = array<i32>} : memref<50x256xf32, #tpu.memory_space<vmem>>, vector<5x16xf32>,
    %c107 = arith.constant 107 : index
    %c0_201 = arith.constant 0 : index
    %152 = tpu.strided_load %arg8[%c107, %c0_201] {strides = array<i32: 2, 1>} : memref<338x16xf32, #tpu.memory_space<vmem>>, vector<5x16xf32>
    %c15_202 = arith.constant 15 : index
    %c176_203 = arith.constant 176 : index
    %153 = vector.load %arg9[%c15_202, %c176_203] : memref<50x256xf32, #tpu.memory_space<vmem>>, vector<5x16xf32>
    tpu.vector_store %arg9[%c15_202, %c176_203], %152 {strides = array<i32>} : memref<50x256xf32, #tpu.memory_space<vmem>>, vector<5x16xf32>,
    %c117 = arith.constant 117 : index
    %c0_204 = arith.constant 0 : index
    %154 = tpu.strided_load %arg8[%c117, %c0_204] {strides = array<i32: 2, 1>} : memref<338x16xf32, #tpu.memory_space<vmem>>, vector<5x16xf32>
    %c15_205 = arith.constant 15 : index
    %c192_206 = arith.constant 192 : index
    %155 = vector.load %arg9[%c15_205, %c192_206] : memref<50x256xf32, #tpu.memory_space<vmem>>, vector<5x16xf32>
    tpu.vector_store %arg9[%c15_205, %c192_206], %154 {strides = array<i32>} : memref<50x256xf32, #tpu.memory_space<vmem>>, vector<5x16xf32>,
    %c118 = arith.constant 118 : index
    %c0_207 = arith.constant 0 : index
    %156 = tpu.strided_load %arg8[%c118, %c0_207] {strides = array<i32: 2, 1>} : memref<338x16xf32, #tpu.memory_space<vmem>>, vector<5x16xf32>
    %c15_208 = arith.constant 15 : index
    %c208_209 = arith.constant 208 : index
    %157 = vector.load %arg9[%c15_208, %c208_209] : memref<50x256xf32, #tpu.memory_space<vmem>>, vector<5x16xf32>
    tpu.vector_store %arg9[%c15_208, %c208_209], %156 {strides = array<i32>} : memref<50x256xf32, #tpu.memory_space<vmem>>, vector<5x16xf32>,
    %c119 = arith.constant 119 : index
    %c0_210 = arith.constant 0 : index
    %158 = tpu.strided_load %arg8[%c119, %c0_210] {strides = array<i32: 2, 1>} : memref<338x16xf32, #tpu.memory_space<vmem>>, vector<5x16xf32>
    %c15_211 = arith.constant 15 : index
    %c224_212 = arith.constant 224 : index
    %159 = vector.load %arg9[%c15_211, %c224_212] : memref<50x256xf32, #tpu.memory_space<vmem>>, vector<5x16xf32>
    tpu.vector_store %arg9[%c15_211, %c224_212], %158 {strides = array<i32>} : memref<50x256xf32, #tpu.memory_space<vmem>>, vector<5x16xf32>,
    %c120 = arith.constant 120 : index
    %c0_213 = arith.constant 0 : index
    %160 = tpu.strided_load %arg8[%c120, %c0_213] {strides = array<i32: 2, 1>} : memref<338x16xf32, #tpu.memory_space<vmem>>, vector<5x16xf32>
    %c15_214 = arith.constant 15 : index
    %c240_215 = arith.constant 240 : index
    %161 = vector.load %arg9[%c15_214, %c240_215] : memref<50x256xf32, #tpu.memory_space<vmem>>, vector<5x16xf32>
    tpu.vector_store %arg9[%c15_214, %c240_215], %160 {strides = array<i32>} : memref<50x256xf32, #tpu.memory_space<vmem>>, vector<5x16xf32>,
    %c104_216 = arith.constant 104 : index
    %c0_217 = arith.constant 0 : index
    %162 = tpu.strided_load %arg8[%c104_216, %c0_217] {strides = array<i32: 2, 1>} : memref<338x16xf32, #tpu.memory_space<vmem>>, vector<5x16xf32>
    %c20 = arith.constant 20 : index
    %c0_218 = arith.constant 0 : index
    %163 = vector.load %arg9[%c20, %c0_218] : memref<50x256xf32, #tpu.memory_space<vmem>>, vector<5x16xf32>
    tpu.vector_store %arg9[%c20, %c0_218], %162 {strides = array<i32>} : memref<50x256xf32, #tpu.memory_space<vmem>>, vector<5x16xf32>,
    %c105_219 = arith.constant 105 : index
    %c0_220 = arith.constant 0 : index
    %164 = tpu.strided_load %arg8[%c105_219, %c0_220] {strides = array<i32: 2, 1>} : memref<338x16xf32, #tpu.memory_space<vmem>>, vector<5x16xf32>
    %c20_221 = arith.constant 20 : index
    %c16_222 = arith.constant 16 : index
    %165 = vector.load %arg9[%c20_221, %c16_222] : memref<50x256xf32, #tpu.memory_space<vmem>>, vector<5x16xf32>
    tpu.vector_store %arg9[%c20_221, %c16_222], %164 {strides = array<i32>} : memref<50x256xf32, #tpu.memory_space<vmem>>, vector<5x16xf32>,
    %c106_223 = arith.constant 106 : index
    %c0_224 = arith.constant 0 : index
    %166 = tpu.strided_load %arg8[%c106_223, %c0_224] {strides = array<i32: 2, 1>} : memref<338x16xf32, #tpu.memory_space<vmem>>, vector<5x16xf32>
    %c20_225 = arith.constant 20 : index
    %c32_226 = arith.constant 32 : index
    %167 = vector.load %arg9[%c20_225, %c32_226] : memref<50x256xf32, #tpu.memory_space<vmem>>, vector<5x16xf32>
    tpu.vector_store %arg9[%c20_225, %c32_226], %166 {strides = array<i32>} : memref<50x256xf32, #tpu.memory_space<vmem>>, vector<5x16xf32>,
    %c107_227 = arith.constant 107 : index
    %c0_228 = arith.constant 0 : index
    %168 = tpu.strided_load %arg8[%c107_227, %c0_228] {strides = array<i32: 2, 1>} : memref<338x16xf32, #tpu.memory_space<vmem>>, vector<5x16xf32>
    %c20_229 = arith.constant 20 : index
    %c48_230 = arith.constant 48 : index
    %169 = vector.load %arg9[%c20_229, %c48_230] : memref<50x256xf32, #tpu.memory_space<vmem>>, vector<5x16xf32>
    tpu.vector_store %arg9[%c20_229, %c48_230], %168 {strides = array<i32>} : memref<50x256xf32, #tpu.memory_space<vmem>>, vector<5x16xf32>,
    %c117_231 = arith.constant 117 : index
    %c0_232 = arith.constant 0 : index
    %170 = tpu.strided_load %arg8[%c117_231, %c0_232] {strides = array<i32: 2, 1>} : memref<338x16xf32, #tpu.memory_space<vmem>>, vector<5x16xf32>
    %c20_233 = arith.constant 20 : index
    %c64_234 = arith.constant 64 : index
    %171 = vector.load %arg9[%c20_233, %c64_234] : memref<50x256xf32, #tpu.memory_space<vmem>>, vector<5x16xf32>
    tpu.vector_store %arg9[%c20_233, %c64_234], %170 {strides = array<i32>} : memref<50x256xf32, #tpu.memory_space<vmem>>, vector<5x16xf32>,
    %c118_235 = arith.constant 118 : index
    %c0_236 = arith.constant 0 : index
    %172 = tpu.strided_load %arg8[%c118_235, %c0_236] {strides = array<i32: 2, 1>} : memref<338x16xf32, #tpu.memory_space<vmem>>, vector<5x16xf32>
    %c20_237 = arith.constant 20 : index
    %c80_238 = arith.constant 80 : index
    %173 = vector.load %arg9[%c20_237, %c80_238] : memref<50x256xf32, #tpu.memory_space<vmem>>, vector<5x16xf32>
    tpu.vector_store %arg9[%c20_237, %c80_238], %172 {strides = array<i32>} : memref<50x256xf32, #tpu.memory_space<vmem>>, vector<5x16xf32>,
    %c119_239 = arith.constant 119 : index
    %c0_240 = arith.constant 0 : index
    %174 = tpu.strided_load %arg8[%c119_239, %c0_240] {strides = array<i32: 2, 1>} : memref<338x16xf32, #tpu.memory_space<vmem>>, vector<5x16xf32>
    %c20_241 = arith.constant 20 : index
    %c96_242 = arith.constant 96 : index
    %175 = vector.load %arg9[%c20_241, %c96_242] : memref<50x256xf32, #tpu.memory_space<vmem>>, vector<5x16xf32>
    tpu.vector_store %arg9[%c20_241, %c96_242], %174 {strides = array<i32>} : memref<50x256xf32, #tpu.memory_space<vmem>>, vector<5x16xf32>,
    %c120_243 = arith.constant 120 : index
    %c0_244 = arith.constant 0 : index
    %176 = tpu.strided_load %arg8[%c120_243, %c0_244] {strides = array<i32: 2, 1>} : memref<338x16xf32, #tpu.memory_space<vmem>>, vector<5x16xf32>
    %c20_245 = arith.constant 20 : index
    %c112_246 = arith.constant 112 : index
    %177 = vector.load %arg9[%c20_245, %c112_246] : memref<50x256xf32, #tpu.memory_space<vmem>>, vector<5x16xf32>
    tpu.vector_store %arg9[%c20_245, %c112_246], %176 {strides = array<i32>} : memref<50x256xf32, #tpu.memory_space<vmem>>, vector<5x16xf32>,
    %c130 = arith.constant 130 : index
    %c0_247 = arith.constant 0 : index
    %178 = tpu.strided_load %arg8[%c130, %c0_247] {strides = array<i32: 2, 1>} : memref<338x16xf32, #tpu.memory_space<vmem>>, vector<5x16xf32>
    %c20_248 = arith.constant 20 : index
    %c128_249 = arith.constant 128 : index
    %179 = vector.load %arg9[%c20_248, %c128_249] : memref<50x256xf32, #tpu.memory_space<vmem>>, vector<5x16xf32>
    tpu.vector_store %arg9[%c20_248, %c128_249], %178 {strides = array<i32>} : memref<50x256xf32, #tpu.memory_space<vmem>>, vector<5x16xf32>,
    %c131 = arith.constant 131 : index
    %c0_250 = arith.constant 0 : index
    %180 = tpu.strided_load %arg8[%c131, %c0_250] {strides = array<i32: 2, 1>} : memref<338x16xf32, #tpu.memory_space<vmem>>, vector<5x16xf32>
    %c20_251 = arith.constant 20 : index
    %c144_252 = arith.constant 144 : index
    %181 = vector.load %arg9[%c20_251, %c144_252] : memref<50x256xf32, #tpu.memory_space<vmem>>, vector<5x16xf32>
    tpu.vector_store %arg9[%c20_251, %c144_252], %180 {strides = array<i32>} : memref<50x256xf32, #tpu.memory_space<vmem>>, vector<5x16xf32>,
    %c132 = arith.constant 132 : index
    %c0_253 = arith.constant 0 : index
    %182 = tpu.strided_load %arg8[%c132, %c0_253] {strides = array<i32: 2, 1>} : memref<338x16xf32, #tpu.memory_space<vmem>>, vector<5x16xf32>
    %c20_254 = arith.constant 20 : index
    %c160_255 = arith.constant 160 : index
    %183 = vector.load %arg9[%c20_254, %c160_255] : memref<50x256xf32, #tpu.memory_space<vmem>>, vector<5x16xf32>
    tpu.vector_store %arg9[%c20_254, %c160_255], %182 {strides = array<i32>} : memref<50x256xf32, #tpu.memory_space<vmem>>, vector<5x16xf32>,
    %c133 = arith.constant 133 : index
    %c0_256 = arith.constant 0 : index
    %184 = tpu.strided_load %arg8[%c133, %c0_256] {strides = array<i32: 2, 1>} : memref<338x16xf32, #tpu.memory_space<vmem>>, vector<5x16xf32>
    %c20_257 = arith.constant 20 : index
    %c176_258 = arith.constant 176 : index
    %185 = vector.load %arg9[%c20_257, %c176_258] : memref<50x256xf32, #tpu.memory_space<vmem>>, vector<5x16xf32>
    tpu.vector_store %arg9[%c20_257, %c176_258], %184 {strides = array<i32>} : memref<50x256xf32, #tpu.memory_space<vmem>>, vector<5x16xf32>,
    %c143 = arith.constant 143 : index
    %c0_259 = arith.constant 0 : index
    %186 = tpu.strided_load %arg8[%c143, %c0_259] {strides = array<i32: 2, 1>} : memref<338x16xf32, #tpu.memory_space<vmem>>, vector<5x16xf32>
    %c20_260 = arith.constant 20 : index
    %c192_261 = arith.constant 192 : index
    %187 = vector.load %arg9[%c20_260, %c192_261] : memref<50x256xf32, #tpu.memory_space<vmem>>, vector<5x16xf32>
    tpu.vector_store %arg9[%c20_260, %c192_261], %186 {strides = array<i32>} : memref<50x256xf32, #tpu.memory_space<vmem>>, vector<5x16xf32>,
    %c144_262 = arith.constant 144 : index
    %c0_263 = arith.constant 0 : index
    %188 = tpu.strided_load %arg8[%c144_262, %c0_263] {strides = array<i32: 2, 1>} : memref<338x16xf32, #tpu.memory_space<vmem>>, vector<5x16xf32>
    %c20_264 = arith.constant 20 : index
    %c208_265 = arith.constant 208 : index
    %189 = vector.load %arg9[%c20_264, %c208_265] : memref<50x256xf32, #tpu.memory_space<vmem>>, vector<5x16xf32>
    tpu.vector_store %arg9[%c20_264, %c208_265], %188 {strides = array<i32>} : memref<50x256xf32, #tpu.memory_space<vmem>>, vector<5x16xf32>,
    %c145 = arith.constant 145 : index
    %c0_266 = arith.constant 0 : index
    %190 = tpu.strided_load %arg8[%c145, %c0_266] {strides = array<i32: 2, 1>} : memref<338x16xf32, #tpu.memory_space<vmem>>, vector<5x16xf32>
    %c20_267 = arith.constant 20 : index
    %c224_268 = arith.constant 224 : index
    %191 = vector.load %arg9[%c20_267, %c224_268] : memref<50x256xf32, #tpu.memory_space<vmem>>, vector<5x16xf32>
    tpu.vector_store %arg9[%c20_267, %c224_268], %190 {strides = array<i32>} : memref<50x256xf32, #tpu.memory_space<vmem>>, vector<5x16xf32>,
    %c146 = arith.constant 146 : index
    %c0_269 = arith.constant 0 : index
    %192 = tpu.strided_load %arg8[%c146, %c0_269] {strides = array<i32: 2, 1>} : memref<338x16xf32, #tpu.memory_space<vmem>>, vector<5x16xf32>
    %c20_270 = arith.constant 20 : index
    %c240_271 = arith.constant 240 : index
    %193 = vector.load %arg9[%c20_270, %c240_271] : memref<50x256xf32, #tpu.memory_space<vmem>>, vector<5x16xf32>
    tpu.vector_store %arg9[%c20_270, %c240_271], %192 {strides = array<i32>} : memref<50x256xf32, #tpu.memory_space<vmem>>, vector<5x16xf32>,
    %c169 = arith.constant 169 : index
    %c0_272 = arith.constant 0 : index
    %194 = tpu.strided_load %arg8[%c169, %c0_272] {strides = array<i32: 2, 1>} : memref<338x16xf32, #tpu.memory_space<vmem>>, vector<5x16xf32>
    %c25 = arith.constant 25 : index
    %c0_273 = arith.constant 0 : index
    %195 = vector.load %arg9[%c25, %c0_273] : memref<50x256xf32, #tpu.memory_space<vmem>>, vector<5x16xf32>
    tpu.vector_store %arg9[%c25, %c0_273], %194 {strides = array<i32>} : memref<50x256xf32, #tpu.memory_space<vmem>>, vector<5x16xf32>,
    %c170 = arith.constant 170 : index
    %c0_274 = arith.constant 0 : index
    %196 = tpu.strided_load %arg8[%c170, %c0_274] {strides = array<i32: 2, 1>} : memref<338x16xf32, #tpu.memory_space<vmem>>, vector<5x16xf32>
    %c25_275 = arith.constant 25 : index
    %c16_276 = arith.constant 16 : index
    %197 = vector.load %arg9[%c25_275, %c16_276] : memref<50x256xf32, #tpu.memory_space<vmem>>, vector<5x16xf32>
    tpu.vector_store %arg9[%c25_275, %c16_276], %196 {strides = array<i32>} : memref<50x256xf32, #tpu.memory_space<vmem>>, vector<5x16xf32>,
    %c171 = arith.constant 171 : index
    %c0_277 = arith.constant 0 : index
    %198 = tpu.strided_load %arg8[%c171, %c0_277] {strides = array<i32: 2, 1>} : memref<338x16xf32, #tpu.memory_space<vmem>>, vector<5x16xf32>
    %c25_278 = arith.constant 25 : index
    %c32_279 = arith.constant 32 : index
    %199 = vector.load %arg9[%c25_278, %c32_279] : memref<50x256xf32, #tpu.memory_space<vmem>>, vector<5x16xf32>
    tpu.vector_store %arg9[%c25_278, %c32_279], %198 {strides = array<i32>} : memref<50x256xf32, #tpu.memory_space<vmem>>, vector<5x16xf32>,
    %c172 = arith.constant 172 : index
    %c0_280 = arith.constant 0 : index
    %200 = tpu.strided_load %arg8[%c172, %c0_280] {strides = array<i32: 2, 1>} : memref<338x16xf32, #tpu.memory_space<vmem>>, vector<5x16xf32>
    %c25_281 = arith.constant 25 : index
    %c48_282 = arith.constant 48 : index
    %201 = vector.load %arg9[%c25_281, %c48_282] : memref<50x256xf32, #tpu.memory_space<vmem>>, vector<5x16xf32>
    tpu.vector_store %arg9[%c25_281, %c48_282], %200 {strides = array<i32>} : memref<50x256xf32, #tpu.memory_space<vmem>>, vector<5x16xf32>,
    %c182 = arith.constant 182 : index
    %c0_283 = arith.constant 0 : index
    %202 = tpu.strided_load %arg8[%c182, %c0_283] {strides = array<i32: 2, 1>} : memref<338x16xf32, #tpu.memory_space<vmem>>, vector<5x16xf32>
    %c25_284 = arith.constant 25 : index
    %c64_285 = arith.constant 64 : index
    %203 = vector.load %arg9[%c25_284, %c64_285] : memref<50x256xf32, #tpu.memory_space<vmem>>, vector<5x16xf32>
    tpu.vector_store %arg9[%c25_284, %c64_285], %202 {strides = array<i32>} : memref<50x256xf32, #tpu.memory_space<vmem>>, vector<5x16xf32>,
    %c183 = arith.constant 183 : index
    %c0_286 = arith.constant 0 : index
    %204 = tpu.strided_load %arg8[%c183, %c0_286] {strides = array<i32: 2, 1>} : memref<338x16xf32, #tpu.memory_space<vmem>>, vector<5x16xf32>
    %c25_287 = arith.constant 25 : index
    %c80_288 = arith.constant 80 : index
    %205 = vector.load %arg9[%c25_287, %c80_288] : memref<50x256xf32, #tpu.memory_space<vmem>>, vector<5x16xf32>
    tpu.vector_store %arg9[%c25_287, %c80_288], %204 {strides = array<i32>} : memref<50x256xf32, #tpu.memory_space<vmem>>, vector<5x16xf32>,
    %c184 = arith.constant 184 : index
    %c0_289 = arith.constant 0 : index
    %206 = tpu.strided_load %arg8[%c184, %c0_289] {strides = array<i32: 2, 1>} : memref<338x16xf32, #tpu.memory_space<vmem>>, vector<5x16xf32>
    %c25_290 = arith.constant 25 : index
    %c96_291 = arith.constant 96 : index
    %207 = vector.load %arg9[%c25_290, %c96_291] : memref<50x256xf32, #tpu.memory_space<vmem>>, vector<5x16xf32>
    tpu.vector_store %arg9[%c25_290, %c96_291], %206 {strides = array<i32>} : memref<50x256xf32, #tpu.memory_space<vmem>>, vector<5x16xf32>,
    %c185 = arith.constant 185 : index
    %c0_292 = arith.constant 0 : index
    %208 = tpu.strided_load %arg8[%c185, %c0_292] {strides = array<i32: 2, 1>} : memref<338x16xf32, #tpu.memory_space<vmem>>, vector<5x16xf32>
    %c25_293 = arith.constant 25 : index
    %c112_294 = arith.constant 112 : index
    %209 = vector.load %arg9[%c25_293, %c112_294] : memref<50x256xf32, #tpu.memory_space<vmem>>, vector<5x16xf32>
    tpu.vector_store %arg9[%c25_293, %c112_294], %208 {strides = array<i32>} : memref<50x256xf32, #tpu.memory_space<vmem>>, vector<5x16xf32>,
    %c195 = arith.constant 195 : index
    %c0_295 = arith.constant 0 : index
    %210 = tpu.strided_load %arg8[%c195, %c0_295] {strides = array<i32: 2, 1>} : memref<338x16xf32, #tpu.memory_space<vmem>>, vector<5x16xf32>
    %c25_296 = arith.constant 25 : index
    %c128_297 = arith.constant 128 : index
    %211 = vector.load %arg9[%c25_296, %c128_297] : memref<50x256xf32, #tpu.memory_space<vmem>>, vector<5x16xf32>
    tpu.vector_store %arg9[%c25_296, %c128_297], %210 {strides = array<i32>} : memref<50x256xf32, #tpu.memory_space<vmem>>, vector<5x16xf32>,
    %c196 = arith.constant 196 : index
    %c0_298 = arith.constant 0 : index
    %212 = tpu.strided_load %arg8[%c196, %c0_298] {strides = array<i32: 2, 1>} : memref<338x16xf32, #tpu.memory_space<vmem>>, vector<5x16xf32>
    %c25_299 = arith.constant 25 : index
    %c144_300 = arith.constant 144 : index
    %213 = vector.load %arg9[%c25_299, %c144_300] : memref<50x256xf32, #tpu.memory_space<vmem>>, vector<5x16xf32>
    tpu.vector_store %arg9[%c25_299, %c144_300], %212 {strides = array<i32>} : memref<50x256xf32, #tpu.memory_space<vmem>>, vector<5x16xf32>,
    %c197 = arith.constant 197 : index
    %c0_301 = arith.constant 0 : index
    %214 = tpu.strided_load %arg8[%c197, %c0_301] {strides = array<i32: 2, 1>} : memref<338x16xf32, #tpu.memory_space<vmem>>, vector<5x16xf32>
    %c25_302 = arith.constant 25 : index
    %c160_303 = arith.constant 160 : index
    %215 = vector.load %arg9[%c25_302, %c160_303] : memref<50x256xf32, #tpu.memory_space<vmem>>, vector<5x16xf32>
    tpu.vector_store %arg9[%c25_302, %c160_303], %214 {strides = array<i32>} : memref<50x256xf32, #tpu.memory_space<vmem>>, vector<5x16xf32>,
    %c198 = arith.constant 198 : index
    %c0_304 = arith.constant 0 : index
    %216 = tpu.strided_load %arg8[%c198, %c0_304] {strides = array<i32: 2, 1>} : memref<338x16xf32, #tpu.memory_space<vmem>>, vector<5x16xf32>
    %c25_305 = arith.constant 25 : index
    %c176_306 = arith.constant 176 : index
    %217 = vector.load %arg9[%c25_305, %c176_306] : memref<50x256xf32, #tpu.memory_space<vmem>>, vector<5x16xf32>
    tpu.vector_store %arg9[%c25_305, %c176_306], %216 {strides = array<i32>} : memref<50x256xf32, #tpu.memory_space<vmem>>, vector<5x16xf32>,
    %c208_307 = arith.constant 208 : index
    %c0_308 = arith.constant 0 : index
    %218 = tpu.strided_load %arg8[%c208_307, %c0_308] {strides = array<i32: 2, 1>} : memref<338x16xf32, #tpu.memory_space<vmem>>, vector<5x16xf32>
    %c25_309 = arith.constant 25 : index
    %c192_310 = arith.constant 192 : index
    %219 = vector.load %arg9[%c25_309, %c192_310] : memref<50x256xf32, #tpu.memory_space<vmem>>, vector<5x16xf32>
    tpu.vector_store %arg9[%c25_309, %c192_310], %218 {strides = array<i32>} : memref<50x256xf32, #tpu.memory_space<vmem>>, vector<5x16xf32>,
    %c209 = arith.constant 209 : index
    %c0_311 = arith.constant 0 : index
    %220 = tpu.strided_load %arg8[%c209, %c0_311] {strides = array<i32: 2, 1>} : memref<338x16xf32, #tpu.memory_space<vmem>>, vector<5x16xf32>
    %c25_312 = arith.constant 25 : index
    %c208_313 = arith.constant 208 : index
    %221 = vector.load %arg9[%c25_312, %c208_313] : memref<50x256xf32, #tpu.memory_space<vmem>>, vector<5x16xf32>
    tpu.vector_store %arg9[%c25_312, %c208_313], %220 {strides = array<i32>} : memref<50x256xf32, #tpu.memory_space<vmem>>, vector<5x16xf32>,
    %c210 = arith.constant 210 : index
    %c0_314 = arith.constant 0 : index
    %222 = tpu.strided_load %arg8[%c210, %c0_314] {strides = array<i32: 2, 1>} : memref<338x16xf32, #tpu.memory_space<vmem>>, vector<5x16xf32>
    %c25_315 = arith.constant 25 : index
    %c224_316 = arith.constant 224 : index
    %223 = vector.load %arg9[%c25_315, %c224_316] : memref<50x256xf32, #tpu.memory_space<vmem>>, vector<5x16xf32>
    tpu.vector_store %arg9[%c25_315, %c224_316], %222 {strides = array<i32>} : memref<50x256xf32, #tpu.memory_space<vmem>>, vector<5x16xf32>,
    %c211 = arith.constant 211 : index
    %c0_317 = arith.constant 0 : index
    %224 = tpu.strided_load %arg8[%c211, %c0_317] {strides = array<i32: 2, 1>} : memref<338x16xf32, #tpu.memory_space<vmem>>, vector<5x16xf32>
    %c25_318 = arith.constant 25 : index
    %c240_319 = arith.constant 240 : index
    %225 = vector.load %arg9[%c25_318, %c240_319] : memref<50x256xf32, #tpu.memory_space<vmem>>, vector<5x16xf32>
    tpu.vector_store %arg9[%c25_318, %c240_319], %224 {strides = array<i32>} : memref<50x256xf32, #tpu.memory_space<vmem>>, vector<5x16xf32>,
    %c195_320 = arith.constant 195 : index
    %c0_321 = arith.constant 0 : index
    %226 = tpu.strided_load %arg8[%c195_320, %c0_321] {strides = array<i32: 2, 1>} : memref<338x16xf32, #tpu.memory_space<vmem>>, vector<5x16xf32>
    %c30 = arith.constant 30 : index
    %c0_322 = arith.constant 0 : index
    %227 = vector.load %arg9[%c30, %c0_322] : memref<50x256xf32, #tpu.memory_space<vmem>>, vector<5x16xf32>
    tpu.vector_store %arg9[%c30, %c0_322], %226 {strides = array<i32>} : memref<50x256xf32, #tpu.memory_space<vmem>>, vector<5x16xf32>,
    %c196_323 = arith.constant 196 : index
    %c0_324 = arith.constant 0 : index
    %228 = tpu.strided_load %arg8[%c196_323, %c0_324] {strides = array<i32: 2, 1>} : memref<338x16xf32, #tpu.memory_space<vmem>>, vector<5x16xf32>
    %c30_325 = arith.constant 30 : index
    %c16_326 = arith.constant 16 : index
    %229 = vector.load %arg9[%c30_325, %c16_326] : memref<50x256xf32, #tpu.memory_space<vmem>>, vector<5x16xf32>
    tpu.vector_store %arg9[%c30_325, %c16_326], %228 {strides = array<i32>} : memref<50x256xf32, #tpu.memory_space<vmem>>, vector<5x16xf32>,
    %c197_327 = arith.constant 197 : index
    %c0_328 = arith.constant 0 : index
    %230 = tpu.strided_load %arg8[%c197_327, %c0_328] {strides = array<i32: 2, 1>} : memref<338x16xf32, #tpu.memory_space<vmem>>, vector<5x16xf32>
    %c30_329 = arith.constant 30 : index
    %c32_330 = arith.constant 32 : index
    %231 = vector.load %arg9[%c30_329, %c32_330] : memref<50x256xf32, #tpu.memory_space<vmem>>, vector<5x16xf32>
    tpu.vector_store %arg9[%c30_329, %c32_330], %230 {strides = array<i32>} : memref<50x256xf32, #tpu.memory_space<vmem>>, vector<5x16xf32>,
    %c198_331 = arith.constant 198 : index
    %c0_332 = arith.constant 0 : index
    %232 = tpu.strided_load %arg8[%c198_331, %c0_332] {strides = array<i32: 2, 1>} : memref<338x16xf32, #tpu.memory_space<vmem>>, vector<5x16xf32>
    %c30_333 = arith.constant 30 : index
    %c48_334 = arith.constant 48 : index
    %233 = vector.load %arg9[%c30_333, %c48_334] : memref<50x256xf32, #tpu.memory_space<vmem>>, vector<5x16xf32>
    tpu.vector_store %arg9[%c30_333, %c48_334], %232 {strides = array<i32>} : memref<50x256xf32, #tpu.memory_space<vmem>>, vector<5x16xf32>,
    %c208_335 = arith.constant 208 : index
    %c0_336 = arith.constant 0 : index
    %234 = tpu.strided_load %arg8[%c208_335, %c0_336] {strides = array<i32: 2, 1>} : memref<338x16xf32, #tpu.memory_space<vmem>>, vector<5x16xf32>
    %c30_337 = arith.constant 30 : index
    %c64_338 = arith.constant 64 : index
    %235 = vector.load %arg9[%c30_337, %c64_338] : memref<50x256xf32, #tpu.memory_space<vmem>>, vector<5x16xf32>
    tpu.vector_store %arg9[%c30_337, %c64_338], %234 {strides = array<i32>} : memref<50x256xf32, #tpu.memory_space<vmem>>, vector<5x16xf32>,
    %c209_339 = arith.constant 209 : index
    %c0_340 = arith.constant 0 : index
    %236 = tpu.strided_load %arg8[%c209_339, %c0_340] {strides = array<i32: 2, 1>} : memref<338x16xf32, #tpu.memory_space<vmem>>, vector<5x16xf32>
    %c30_341 = arith.constant 30 : index
    %c80_342 = arith.constant 80 : index
    %237 = vector.load %arg9[%c30_341, %c80_342] : memref<50x256xf32, #tpu.memory_space<vmem>>, vector<5x16xf32>
    tpu.vector_store %arg9[%c30_341, %c80_342], %236 {strides = array<i32>} : memref<50x256xf32, #tpu.memory_space<vmem>>, vector<5x16xf32>,
    %c210_343 = arith.constant 210 : index
    %c0_344 = arith.constant 0 : index
    %238 = tpu.strided_load %arg8[%c210_343, %c0_344] {strides = array<i32: 2, 1>} : memref<338x16xf32, #tpu.memory_space<vmem>>, vector<5x16xf32>
    %c30_345 = arith.constant 30 : index
    %c96_346 = arith.constant 96 : index
    %239 = vector.load %arg9[%c30_345, %c96_346] : memref<50x256xf32, #tpu.memory_space<vmem>>, vector<5x16xf32>
    tpu.vector_store %arg9[%c30_345, %c96_346], %238 {strides = array<i32>} : memref<50x256xf32, #tpu.memory_space<vmem>>, vector<5x16xf32>,
    %c211_347 = arith.constant 211 : index
    %c0_348 = arith.constant 0 : index
    %240 = tpu.strided_load %arg8[%c211_347, %c0_348] {strides = array<i32: 2, 1>} : memref<338x16xf32, #tpu.memory_space<vmem>>, vector<5x16xf32>
    %c30_349 = arith.constant 30 : index
    %c112_350 = arith.constant 112 : index
    %241 = vector.load %arg9[%c30_349, %c112_350] : memref<50x256xf32, #tpu.memory_space<vmem>>, vector<5x16xf32>
    tpu.vector_store %arg9[%c30_349, %c112_350], %240 {strides = array<i32>} : memref<50x256xf32, #tpu.memory_space<vmem>>, vector<5x16xf32>,
    %c221 = arith.constant 221 : index
    %c0_351 = arith.constant 0 : index
    %242 = tpu.strided_load %arg8[%c221, %c0_351] {strides = array<i32: 2, 1>} : memref<338x16xf32, #tpu.memory_space<vmem>>, vector<5x16xf32>
    %c30_352 = arith.constant 30 : index
    %c128_353 = arith.constant 128 : index
    %243 = vector.load %arg9[%c30_352, %c128_353] : memref<50x256xf32, #tpu.memory_space<vmem>>, vector<5x16xf32>
    tpu.vector_store %arg9[%c30_352, %c128_353], %242 {strides = array<i32>} : memref<50x256xf32, #tpu.memory_space<vmem>>, vector<5x16xf32>,
    %c222 = arith.constant 222 : index
    %c0_354 = arith.constant 0 : index
    %244 = tpu.strided_load %arg8[%c222, %c0_354] {strides = array<i32: 2, 1>} : memref<338x16xf32, #tpu.memory_space<vmem>>, vector<5x16xf32>
    %c30_355 = arith.constant 30 : index
    %c144_356 = arith.constant 144 : index
    %245 = vector.load %arg9[%c30_355, %c144_356] : memref<50x256xf32, #tpu.memory_space<vmem>>, vector<5x16xf32>
    tpu.vector_store %arg9[%c30_355, %c144_356], %244 {strides = array<i32>} : memref<50x256xf32, #tpu.memory_space<vmem>>, vector<5x16xf32>,
    %c223 = arith.constant 223 : index
    %c0_357 = arith.constant 0 : index
    %246 = tpu.strided_load %arg8[%c223, %c0_357] {strides = array<i32: 2, 1>} : memref<338x16xf32, #tpu.memory_space<vmem>>, vector<5x16xf32>
    %c30_358 = arith.constant 30 : index
    %c160_359 = arith.constant 160 : index
    %247 = vector.load %arg9[%c30_358, %c160_359] : memref<50x256xf32, #tpu.memory_space<vmem>>, vector<5x16xf32>
    tpu.vector_store %arg9[%c30_358, %c160_359], %246 {strides = array<i32>} : memref<50x256xf32, #tpu.memory_space<vmem>>, vector<5x16xf32>,
    %c224_360 = arith.constant 224 : index
    %c0_361 = arith.constant 0 : index
    %248 = tpu.strided_load %arg8[%c224_360, %c0_361] {strides = array<i32: 2, 1>} : memref<338x16xf32, #tpu.memory_space<vmem>>, vector<5x16xf32>
    %c30_362 = arith.constant 30 : index
    %c176_363 = arith.constant 176 : index
    %249 = vector.load %arg9[%c30_362, %c176_363] : memref<50x256xf32, #tpu.memory_space<vmem>>, vector<5x16xf32>
    tpu.vector_store %arg9[%c30_362, %c176_363], %248 {strides = array<i32>} : memref<50x256xf32, #tpu.memory_space<vmem>>, vector<5x16xf32>,
    %c234 = arith.constant 234 : index
    %c0_364 = arith.constant 0 : index
    %250 = tpu.strided_load %arg8[%c234, %c0_364] {strides = array<i32: 2, 1>} : memref<338x16xf32, #tpu.memory_space<vmem>>, vector<5x16xf32>
    %c30_365 = arith.constant 30 : index
    %c192_366 = arith.constant 192 : index
    %251 = vector.load %arg9[%c30_365, %c192_366] : memref<50x256xf32, #tpu.memory_space<vmem>>, vector<5x16xf32>
    tpu.vector_store %arg9[%c30_365, %c192_366], %250 {strides = array<i32>} : memref<50x256xf32, #tpu.memory_space<vmem>>, vector<5x16xf32>,
    %c235 = arith.constant 235 : index
    %c0_367 = arith.constant 0 : index
    %252 = tpu.strided_load %arg8[%c235, %c0_367] {strides = array<i32: 2, 1>} : memref<338x16xf32, #tpu.memory_space<vmem>>, vector<5x16xf32>
    %c30_368 = arith.constant 30 : index
    %c208_369 = arith.constant 208 : index
    %253 = vector.load %arg9[%c30_368, %c208_369] : memref<50x256xf32, #tpu.memory_space<vmem>>, vector<5x16xf32>
    tpu.vector_store %arg9[%c30_368, %c208_369], %252 {strides = array<i32>} : memref<50x256xf32, #tpu.memory_space<vmem>>, vector<5x16xf32>,
    %c236 = arith.constant 236 : index
    %c0_370 = arith.constant 0 : index
    %254 = tpu.strided_load %arg8[%c236, %c0_370] {strides = array<i32: 2, 1>} : memref<338x16xf32, #tpu.memory_space<vmem>>, vector<5x16xf32>
    %c30_371 = arith.constant 30 : index
    %c224_372 = arith.constant 224 : index
    %255 = vector.load %arg9[%c30_371, %c224_372] : memref<50x256xf32, #tpu.memory_space<vmem>>, vector<5x16xf32>
    tpu.vector_store %arg9[%c30_371, %c224_372], %254 {strides = array<i32>} : memref<50x256xf32, #tpu.memory_space<vmem>>, vector<5x16xf32>,
    %c237 = arith.constant 237 : index
    %c0_373 = arith.constant 0 : index
    %256 = tpu.strided_load %arg8[%c237, %c0_373] {strides = array<i32: 2, 1>} : memref<338x16xf32, #tpu.memory_space<vmem>>, vector<5x16xf32>
    %c30_374 = arith.constant 30 : index
    %c240_375 = arith.constant 240 : index
    %257 = vector.load %arg9[%c30_374, %c240_375] : memref<50x256xf32, #tpu.memory_space<vmem>>, vector<5x16xf32>
    tpu.vector_store %arg9[%c30_374, %c240_375], %256 {strides = array<i32>} : memref<50x256xf32, #tpu.memory_space<vmem>>, vector<5x16xf32>,
    %c221_376 = arith.constant 221 : index
    %c0_377 = arith.constant 0 : index
    %258 = tpu.strided_load %arg8[%c221_376, %c0_377] {strides = array<i32: 2, 1>} : memref<338x16xf32, #tpu.memory_space<vmem>>, vector<5x16xf32>
    %c35 = arith.constant 35 : index
    %c0_378 = arith.constant 0 : index
    %259 = vector.load %arg9[%c35, %c0_378] : memref<50x256xf32, #tpu.memory_space<vmem>>, vector<5x16xf32>
    tpu.vector_store %arg9[%c35, %c0_378], %258 {strides = array<i32>} : memref<50x256xf32, #tpu.memory_space<vmem>>, vector<5x16xf32>,
    %c222_379 = arith.constant 222 : index
    %c0_380 = arith.constant 0 : index
    %260 = tpu.strided_load %arg8[%c222_379, %c0_380] {strides = array<i32: 2, 1>} : memref<338x16xf32, #tpu.memory_space<vmem>>, vector<5x16xf32>
    %c35_381 = arith.constant 35 : index
    %c16_382 = arith.constant 16 : index
    %261 = vector.load %arg9[%c35_381, %c16_382] : memref<50x256xf32, #tpu.memory_space<vmem>>, vector<5x16xf32>
    tpu.vector_store %arg9[%c35_381, %c16_382], %260 {strides = array<i32>} : memref<50x256xf32, #tpu.memory_space<vmem>>, vector<5x16xf32>,
    %c223_383 = arith.constant 223 : index
    %c0_384 = arith.constant 0 : index
    %262 = tpu.strided_load %arg8[%c223_383, %c0_384] {strides = array<i32: 2, 1>} : memref<338x16xf32, #tpu.memory_space<vmem>>, vector<5x16xf32>
    %c35_385 = arith.constant 35 : index
    %c32_386 = arith.constant 32 : index
    %263 = vector.load %arg9[%c35_385, %c32_386] : memref<50x256xf32, #tpu.memory_space<vmem>>, vector<5x16xf32>
    tpu.vector_store %arg9[%c35_385, %c32_386], %262 {strides = array<i32>} : memref<50x256xf32, #tpu.memory_space<vmem>>, vector<5x16xf32>,
    %c224_387 = arith.constant 224 : index
    %c0_388 = arith.constant 0 : index
    %264 = tpu.strided_load %arg8[%c224_387, %c0_388] {strides = array<i32: 2, 1>} : memref<338x16xf32, #tpu.memory_space<vmem>>, vector<5x16xf32>
    %c35_389 = arith.constant 35 : index
    %c48_390 = arith.constant 48 : index
    %265 = vector.load %arg9[%c35_389, %c48_390] : memref<50x256xf32, #tpu.memory_space<vmem>>, vector<5x16xf32>
    tpu.vector_store %arg9[%c35_389, %c48_390], %264 {strides = array<i32>} : memref<50x256xf32, #tpu.memory_space<vmem>>, vector<5x16xf32>,
    %c234_391 = arith.constant 234 : index
    %c0_392 = arith.constant 0 : index
    %266 = tpu.strided_load %arg8[%c234_391, %c0_392] {strides = array<i32: 2, 1>} : memref<338x16xf32, #tpu.memory_space<vmem>>, vector<5x16xf32>
    %c35_393 = arith.constant 35 : index
    %c64_394 = arith.constant 64 : index
    %267 = vector.load %arg9[%c35_393, %c64_394] : memref<50x256xf32, #tpu.memory_space<vmem>>, vector<5x16xf32>
    tpu.vector_store %arg9[%c35_393, %c64_394], %266 {strides = array<i32>} : memref<50x256xf32, #tpu.memory_space<vmem>>, vector<5x16xf32>,
    %c235_395 = arith.constant 235 : index
    %c0_396 = arith.constant 0 : index
    %268 = tpu.strided_load %arg8[%c235_395, %c0_396] {strides = array<i32: 2, 1>} : memref<338x16xf32, #tpu.memory_space<vmem>>, vector<5x16xf32>
    %c35_397 = arith.constant 35 : index
    %c80_398 = arith.constant 80 : index
    %269 = vector.load %arg9[%c35_397, %c80_398] : memref<50x256xf32, #tpu.memory_space<vmem>>, vector<5x16xf32>
    tpu.vector_store %arg9[%c35_397, %c80_398], %268 {strides = array<i32>} : memref<50x256xf32, #tpu.memory_space<vmem>>, vector<5x16xf32>,
    %c236_399 = arith.constant 236 : index
    %c0_400 = arith.constant 0 : index
    %270 = tpu.strided_load %arg8[%c236_399, %c0_400] {strides = array<i32: 2, 1>} : memref<338x16xf32, #tpu.memory_space<vmem>>, vector<5x16xf32>
    %c35_401 = arith.constant 35 : index
    %c96_402 = arith.constant 96 : index
    %271 = vector.load %arg9[%c35_401, %c96_402] : memref<50x256xf32, #tpu.memory_space<vmem>>, vector<5x16xf32>
    tpu.vector_store %arg9[%c35_401, %c96_402], %270 {strides = array<i32>} : memref<50x256xf32, #tpu.memory_space<vmem>>, vector<5x16xf32>,
    %c237_403 = arith.constant 237 : index
    %c0_404 = arith.constant 0 : index
    %272 = tpu.strided_load %arg8[%c237_403, %c0_404] {strides = array<i32: 2, 1>} : memref<338x16xf32, #tpu.memory_space<vmem>>, vector<5x16xf32>
    %c35_405 = arith.constant 35 : index
    %c112_406 = arith.constant 112 : index
    %273 = vector.load %arg9[%c35_405, %c112_406] : memref<50x256xf32, #tpu.memory_space<vmem>>, vector<5x16xf32>
    tpu.vector_store %arg9[%c35_405, %c112_406], %272 {strides = array<i32>} : memref<50x256xf32, #tpu.memory_space<vmem>>, vector<5x16xf32>,
    %c247 = arith.constant 247 : index
    %c0_407 = arith.constant 0 : index
    %274 = tpu.strided_load %arg8[%c247, %c0_407] {strides = array<i32: 2, 1>} : memref<338x16xf32, #tpu.memory_space<vmem>>, vector<5x16xf32>
    %c35_408 = arith.constant 35 : index
    %c128_409 = arith.constant 128 : index
    %275 = vector.load %arg9[%c35_408, %c128_409] : memref<50x256xf32, #tpu.memory_space<vmem>>, vector<5x16xf32>
    tpu.vector_store %arg9[%c35_408, %c128_409], %274 {strides = array<i32>} : memref<50x256xf32, #tpu.memory_space<vmem>>, vector<5x16xf32>,
    %c248 = arith.constant 248 : index
    %c0_410 = arith.constant 0 : index
    %276 = tpu.strided_load %arg8[%c248, %c0_410] {strides = array<i32: 2, 1>} : memref<338x16xf32, #tpu.memory_space<vmem>>, vector<5x16xf32>
    %c35_411 = arith.constant 35 : index
    %c144_412 = arith.constant 144 : index
    %277 = vector.load %arg9[%c35_411, %c144_412] : memref<50x256xf32, #tpu.memory_space<vmem>>, vector<5x16xf32>
    tpu.vector_store %arg9[%c35_411, %c144_412], %276 {strides = array<i32>} : memref<50x256xf32, #tpu.memory_space<vmem>>, vector<5x16xf32>,
    %c249 = arith.constant 249 : index
    %c0_413 = arith.constant 0 : index
    %278 = tpu.strided_load %arg8[%c249, %c0_413] {strides = array<i32: 2, 1>} : memref<338x16xf32, #tpu.memory_space<vmem>>, vector<5x16xf32>
    %c35_414 = arith.constant 35 : index
    %c160_415 = arith.constant 160 : index
    %279 = vector.load %arg9[%c35_414, %c160_415] : memref<50x256xf32, #tpu.memory_space<vmem>>, vector<5x16xf32>
    tpu.vector_store %arg9[%c35_414, %c160_415], %278 {strides = array<i32>} : memref<50x256xf32, #tpu.memory_space<vmem>>, vector<5x16xf32>,
    %c250 = arith.constant 250 : index
    %c0_416 = arith.constant 0 : index
    %280 = tpu.strided_load %arg8[%c250, %c0_416] {strides = array<i32: 2, 1>} : memref<338x16xf32, #tpu.memory_space<vmem>>, vector<5x16xf32>
    %c35_417 = arith.constant 35 : index
    %c176_418 = arith.constant 176 : index
    %281 = vector.load %arg9[%c35_417, %c176_418] : memref<50x256xf32, #tpu.memory_space<vmem>>, vector<5x16xf32>
    tpu.vector_store %arg9[%c35_417, %c176_418], %280 {strides = array<i32>} : memref<50x256xf32, #tpu.memory_space<vmem>>, vector<5x16xf32>,
    %c260 = arith.constant 260 : index
    %c0_419 = arith.constant 0 : index
    %282 = tpu.strided_load %arg8[%c260, %c0_419] {strides = array<i32: 2, 1>} : memref<338x16xf32, #tpu.memory_space<vmem>>, vector<5x16xf32>
    %c35_420 = arith.constant 35 : index
    %c192_421 = arith.constant 192 : index
    %283 = vector.load %arg9[%c35_420, %c192_421] : memref<50x256xf32, #tpu.memory_space<vmem>>, vector<5x16xf32>
    tpu.vector_store %arg9[%c35_420, %c192_421], %282 {strides = array<i32>} : memref<50x256xf32, #tpu.memory_space<vmem>>, vector<5x16xf32>,
    %c261 = arith.constant 261 : index
    %c0_422 = arith.constant 0 : index
    %284 = tpu.strided_load %arg8[%c261, %c0_422] {strides = array<i32: 2, 1>} : memref<338x16xf32, #tpu.memory_space<vmem>>, vector<5x16xf32>
    %c35_423 = arith.constant 35 : index
    %c208_424 = arith.constant 208 : index
    %285 = vector.load %arg9[%c35_423, %c208_424] : memref<50x256xf32, #tpu.memory_space<vmem>>, vector<5x16xf32>
    tpu.vector_store %arg9[%c35_423, %c208_424], %284 {strides = array<i32>} : memref<50x256xf32, #tpu.memory_space<vmem>>, vector<5x16xf32>,
    %c262 = arith.constant 262 : index
    %c0_425 = arith.constant 0 : index
    %286 = tpu.strided_load %arg8[%c262, %c0_425] {strides = array<i32: 2, 1>} : memref<338x16xf32, #tpu.memory_space<vmem>>, vector<5x16xf32>
    %c35_426 = arith.constant 35 : index
    %c224_427 = arith.constant 224 : index
    %287 = vector.load %arg9[%c35_426, %c224_427] : memref<50x256xf32, #tpu.memory_space<vmem>>, vector<5x16xf32>
    tpu.vector_store %arg9[%c35_426, %c224_427], %286 {strides = array<i32>} : memref<50x256xf32, #tpu.memory_space<vmem>>, vector<5x16xf32>,
    %c263 = arith.constant 263 : index
    %c0_428 = arith.constant 0 : index
    %288 = tpu.strided_load %arg8[%c263, %c0_428] {strides = array<i32: 2, 1>} : memref<338x16xf32, #tpu.memory_space<vmem>>, vector<5x16xf32>
    %c35_429 = arith.constant 35 : index
    %c240_430 = arith.constant 240 : index
    %289 = vector.load %arg9[%c35_429, %c240_430] : memref<50x256xf32, #tpu.memory_space<vmem>>, vector<5x16xf32>
    tpu.vector_store %arg9[%c35_429, %c240_430], %288 {strides = array<i32>} : memref<50x256xf32, #tpu.memory_space<vmem>>, vector<5x16xf32>,
    %c247_431 = arith.constant 247 : index
    %c0_432 = arith.constant 0 : index
    %290 = tpu.strided_load %arg8[%c247_431, %c0_432] {strides = array<i32: 2, 1>} : memref<338x16xf32, #tpu.memory_space<vmem>>, vector<5x16xf32>
    %c40_433 = arith.constant 40 : index
    %c0_434 = arith.constant 0 : index
    %291 = vector.load %arg9[%c40_433, %c0_434] : memref<50x256xf32, #tpu.memory_space<vmem>>, vector<5x16xf32>
    tpu.vector_store %arg9[%c40_433, %c0_434], %290 {strides = array<i32>} : memref<50x256xf32, #tpu.memory_space<vmem>>, vector<5x16xf32>,
    %c248_435 = arith.constant 248 : index
    %c0_436 = arith.constant 0 : index
    %292 = tpu.strided_load %arg8[%c248_435, %c0_436] {strides = array<i32: 2, 1>} : memref<338x16xf32, #tpu.memory_space<vmem>>, vector<5x16xf32>
    %c40_437 = arith.constant 40 : index
    %c16_438 = arith.constant 16 : index
    %293 = vector.load %arg9[%c40_437, %c16_438] : memref<50x256xf32, #tpu.memory_space<vmem>>, vector<5x16xf32>
    tpu.vector_store %arg9[%c40_437, %c16_438], %292 {strides = array<i32>} : memref<50x256xf32, #tpu.memory_space<vmem>>, vector<5x16xf32>,
    %c249_439 = arith.constant 249 : index
    %c0_440 = arith.constant 0 : index
    %294 = tpu.strided_load %arg8[%c249_439, %c0_440] {strides = array<i32: 2, 1>} : memref<338x16xf32, #tpu.memory_space<vmem>>, vector<5x16xf32>
    %c40_441 = arith.constant 40 : index
    %c32_442 = arith.constant 32 : index
    %295 = vector.load %arg9[%c40_441, %c32_442] : memref<50x256xf32, #tpu.memory_space<vmem>>, vector<5x16xf32>
    tpu.vector_store %arg9[%c40_441, %c32_442], %294 {strides = array<i32>} : memref<50x256xf32, #tpu.memory_space<vmem>>, vector<5x16xf32>,
    %c250_443 = arith.constant 250 : index
    %c0_444 = arith.constant 0 : index
    %296 = tpu.strided_load %arg8[%c250_443, %c0_444] {strides = array<i32: 2, 1>} : memref<338x16xf32, #tpu.memory_space<vmem>>, vector<5x16xf32>
    %c40_445 = arith.constant 40 : index
    %c48_446 = arith.constant 48 : index
    %297 = vector.load %arg9[%c40_445, %c48_446] : memref<50x256xf32, #tpu.memory_space<vmem>>, vector<5x16xf32>
    tpu.vector_store %arg9[%c40_445, %c48_446], %296 {strides = array<i32>} : memref<50x256xf32, #tpu.memory_space<vmem>>, vector<5x16xf32>,
    %c260_447 = arith.constant 260 : index
    %c0_448 = arith.constant 0 : index
    %298 = tpu.strided_load %arg8[%c260_447, %c0_448] {strides = array<i32: 2, 1>} : memref<338x16xf32, #tpu.memory_space<vmem>>, vector<5x16xf32>
    %c40_449 = arith.constant 40 : index
    %c64_450 = arith.constant 64 : index
    %299 = vector.load %arg9[%c40_449, %c64_450] : memref<50x256xf32, #tpu.memory_space<vmem>>, vector<5x16xf32>
    tpu.vector_store %arg9[%c40_449, %c64_450], %298 {strides = array<i32>} : memref<50x256xf32, #tpu.memory_space<vmem>>, vector<5x16xf32>,
    %c261_451 = arith.constant 261 : index
    %c0_452 = arith.constant 0 : index
    %300 = tpu.strided_load %arg8[%c261_451, %c0_452] {strides = array<i32: 2, 1>} : memref<338x16xf32, #tpu.memory_space<vmem>>, vector<5x16xf32>
    %c40_453 = arith.constant 40 : index
    %c80_454 = arith.constant 80 : index
    %301 = vector.load %arg9[%c40_453, %c80_454] : memref<50x256xf32, #tpu.memory_space<vmem>>, vector<5x16xf32>
    tpu.vector_store %arg9[%c40_453, %c80_454], %300 {strides = array<i32>} : memref<50x256xf32, #tpu.memory_space<vmem>>, vector<5x16xf32>,
    %c262_455 = arith.constant 262 : index
    %c0_456 = arith.constant 0 : index
    %302 = tpu.strided_load %arg8[%c262_455, %c0_456] {strides = array<i32: 2, 1>} : memref<338x16xf32, #tpu.memory_space<vmem>>, vector<5x16xf32>
    %c40_457 = arith.constant 40 : index
    %c96_458 = arith.constant 96 : index
    %303 = vector.load %arg9[%c40_457, %c96_458] : memref<50x256xf32, #tpu.memory_space<vmem>>, vector<5x16xf32>
    tpu.vector_store %arg9[%c40_457, %c96_458], %302 {strides = array<i32>} : memref<50x256xf32, #tpu.memory_space<vmem>>, vector<5x16xf32>,
    %c263_459 = arith.constant 263 : index
    %c0_460 = arith.constant 0 : index
    %304 = tpu.strided_load %arg8[%c263_459, %c0_460] {strides = array<i32: 2, 1>} : memref<338x16xf32, #tpu.memory_space<vmem>>, vector<5x16xf32>
    %c40_461 = arith.constant 40 : index
    %c112_462 = arith.constant 112 : index
    %305 = vector.load %arg9[%c40_461, %c112_462] : memref<50x256xf32, #tpu.memory_space<vmem>>, vector<5x16xf32>
    tpu.vector_store %arg9[%c40_461, %c112_462], %304 {strides = array<i32>} : memref<50x256xf32, #tpu.memory_space<vmem>>, vector<5x16xf32>,
    %c273 = arith.constant 273 : index
    %c0_463 = arith.constant 0 : index
    %306 = tpu.strided_load %arg8[%c273, %c0_463] {strides = array<i32: 2, 1>} : memref<338x16xf32, #tpu.memory_space<vmem>>, vector<5x16xf32>
    %c40_464 = arith.constant 40 : index
    %c128_465 = arith.constant 128 : index
    %307 = vector.load %arg9[%c40_464, %c128_465] : memref<50x256xf32, #tpu.memory_space<vmem>>, vector<5x16xf32>
    tpu.vector_store %arg9[%c40_464, %c128_465], %306 {strides = array<i32>} : memref<50x256xf32, #tpu.memory_space<vmem>>, vector<5x16xf32>,
    %c274 = arith.constant 274 : index
    %c0_466 = arith.constant 0 : index
    %308 = tpu.strided_load %arg8[%c274, %c0_466] {strides = array<i32: 2, 1>} : memref<338x16xf32, #tpu.memory_space<vmem>>, vector<5x16xf32>
    %c40_467 = arith.constant 40 : index
    %c144_468 = arith.constant 144 : index
    %309 = vector.load %arg9[%c40_467, %c144_468] : memref<50x256xf32, #tpu.memory_space<vmem>>, vector<5x16xf32>
    tpu.vector_store %arg9[%c40_467, %c144_468], %308 {strides = array<i32>} : memref<50x256xf32, #tpu.memory_space<vmem>>, vector<5x16xf32>,
    %c275 = arith.constant 275 : index
    %c0_469 = arith.constant 0 : index
    %310 = tpu.strided_load %arg8[%c275, %c0_469] {strides = array<i32: 2, 1>} : memref<338x16xf32, #tpu.memory_space<vmem>>, vector<5x16xf32>
    %c40_470 = arith.constant 40 : index
    %c160_471 = arith.constant 160 : index
    %311 = vector.load %arg9[%c40_470, %c160_471] : memref<50x256xf32, #tpu.memory_space<vmem>>, vector<5x16xf32>
    tpu.vector_store %arg9[%c40_470, %c160_471], %310 {strides = array<i32>} : memref<50x256xf32, #tpu.memory_space<vmem>>, vector<5x16xf32>,
    %c276 = arith.constant 276 : index
    %c0_472 = arith.constant 0 : index
    %312 = tpu.strided_load %arg8[%c276, %c0_472] {strides = array<i32: 2, 1>} : memref<338x16xf32, #tpu.memory_space<vmem>>, vector<5x16xf32>
    %c40_473 = arith.constant 40 : index
    %c176_474 = arith.constant 176 : index
    %313 = vector.load %arg9[%c40_473, %c176_474] : memref<50x256xf32, #tpu.memory_space<vmem>>, vector<5x16xf32>
    tpu.vector_store %arg9[%c40_473, %c176_474], %312 {strides = array<i32>} : memref<50x256xf32, #tpu.memory_space<vmem>>, vector<5x16xf32>,
    %c286 = arith.constant 286 : index
    %c0_475 = arith.constant 0 : index
    %314 = tpu.strided_load %arg8[%c286, %c0_475] {strides = array<i32: 2, 1>} : memref<338x16xf32, #tpu.memory_space<vmem>>, vector<5x16xf32>
    %c40_476 = arith.constant 40 : index
    %c192_477 = arith.constant 192 : index
    %315 = vector.load %arg9[%c40_476, %c192_477] : memref<50x256xf32, #tpu.memory_space<vmem>>, vector<5x16xf32>
    tpu.vector_store %arg9[%c40_476, %c192_477], %314 {strides = array<i32>} : memref<50x256xf32, #tpu.memory_space<vmem>>, vector<5x16xf32>,
    %c287 = arith.constant 287 : index
    %c0_478 = arith.constant 0 : index
    %316 = tpu.strided_load %arg8[%c287, %c0_478] {strides = array<i32: 2, 1>} : memref<338x16xf32, #tpu.memory_space<vmem>>, vector<5x16xf32>
    %c40_479 = arith.constant 40 : index
    %c208_480 = arith.constant 208 : index
    %317 = vector.load %arg9[%c40_479, %c208_480] : memref<50x256xf32, #tpu.memory_space<vmem>>, vector<5x16xf32>
    tpu.vector_store %arg9[%c40_479, %c208_480], %316 {strides = array<i32>} : memref<50x256xf32, #tpu.memory_space<vmem>>, vector<5x16xf32>,
    %c288 = arith.constant 288 : index
    %c0_481 = arith.constant 0 : index
    %318 = tpu.strided_load %arg8[%c288, %c0_481] {strides = array<i32: 2, 1>} : memref<338x16xf32, #tpu.memory_space<vmem>>, vector<5x16xf32>
    %c40_482 = arith.constant 40 : index
    %c224_483 = arith.constant 224 : index
    %319 = vector.load %arg9[%c40_482, %c224_483] : memref<50x256xf32, #tpu.memory_space<vmem>>, vector<5x16xf32>
    tpu.vector_store %arg9[%c40_482, %c224_483], %318 {strides = array<i32>} : memref<50x256xf32, #tpu.memory_space<vmem>>, vector<5x16xf32>,
    %c289 = arith.constant 289 : index
    %c0_484 = arith.constant 0 : index
    %320 = tpu.strided_load %arg8[%c289, %c0_484] {strides = array<i32: 2, 1>} : memref<338x16xf32, #tpu.memory_space<vmem>>, vector<5x16xf32>
    %c40_485 = arith.constant 40 : index
    %c240_486 = arith.constant 240 : index
    %321 = vector.load %arg9[%c40_485, %c240_486] : memref<50x256xf32, #tpu.memory_space<vmem>>, vector<5x16xf32>
    tpu.vector_store %arg9[%c40_485, %c240_486], %320 {strides = array<i32>} : memref<50x256xf32, #tpu.memory_space<vmem>>, vector<5x16xf32>,
    %c273_487 = arith.constant 273 : index
    %c0_488 = arith.constant 0 : index
    %322 = tpu.strided_load %arg8[%c273_487, %c0_488] {strides = array<i32: 2, 1>} : memref<338x16xf32, #tpu.memory_space<vmem>>, vector<5x16xf32>
    %c45 = arith.constant 45 : index
    %c0_489 = arith.constant 0 : index
    %323 = vector.load %arg9[%c45, %c0_489] : memref<50x256xf32, #tpu.memory_space<vmem>>, vector<5x16xf32>
    tpu.vector_store %arg9[%c45, %c0_489], %322 {strides = array<i32>} : memref<50x256xf32, #tpu.memory_space<vmem>>, vector<5x16xf32>,
    %c274_490 = arith.constant 274 : index
    %c0_491 = arith.constant 0 : index
    %324 = tpu.strided_load %arg8[%c274_490, %c0_491] {strides = array<i32: 2, 1>} : memref<338x16xf32, #tpu.memory_space<vmem>>, vector<5x16xf32>
    %c45_492 = arith.constant 45 : index
    %c16_493 = arith.constant 16 : index
    %325 = vector.load %arg9[%c45_492, %c16_493] : memref<50x256xf32, #tpu.memory_space<vmem>>, vector<5x16xf32>
    tpu.vector_store %arg9[%c45_492, %c16_493], %324 {strides = array<i32>} : memref<50x256xf32, #tpu.memory_space<vmem>>, vector<5x16xf32>,
    %c275_494 = arith.constant 275 : index
    %c0_495 = arith.constant 0 : index
    %326 = tpu.strided_load %arg8[%c275_494, %c0_495] {strides = array<i32: 2, 1>} : memref<338x16xf32, #tpu.memory_space<vmem>>, vector<5x16xf32>
    %c45_496 = arith.constant 45 : index
    %c32_497 = arith.constant 32 : index
    %327 = vector.load %arg9[%c45_496, %c32_497] : memref<50x256xf32, #tpu.memory_space<vmem>>, vector<5x16xf32>
    tpu.vector_store %arg9[%c45_496, %c32_497], %326 {strides = array<i32>} : memref<50x256xf32, #tpu.memory_space<vmem>>, vector<5x16xf32>,
    %c276_498 = arith.constant 276 : index
    %c0_499 = arith.constant 0 : index
    %328 = tpu.strided_load %arg8[%c276_498, %c0_499] {strides = array<i32: 2, 1>} : memref<338x16xf32, #tpu.memory_space<vmem>>, vector<5x16xf32>
    %c45_500 = arith.constant 45 : index
    %c48_501 = arith.constant 48 : index
    %329 = vector.load %arg9[%c45_500, %c48_501] : memref<50x256xf32, #tpu.memory_space<vmem>>, vector<5x16xf32>
    tpu.vector_store %arg9[%c45_500, %c48_501], %328 {strides = array<i32>} : memref<50x256xf32, #tpu.memory_space<vmem>>, vector<5x16xf32>,
    %c286_502 = arith.constant 286 : index
    %c0_503 = arith.constant 0 : index
    %330 = tpu.strided_load %arg8[%c286_502, %c0_503] {strides = array<i32: 2, 1>} : memref<338x16xf32, #tpu.memory_space<vmem>>, vector<5x16xf32>
    %c45_504 = arith.constant 45 : index
    %c64_505 = arith.constant 64 : index
    %331 = vector.load %arg9[%c45_504, %c64_505] : memref<50x256xf32, #tpu.memory_space<vmem>>, vector<5x16xf32>
    tpu.vector_store %arg9[%c45_504, %c64_505], %330 {strides = array<i32>} : memref<50x256xf32, #tpu.memory_space<vmem>>, vector<5x16xf32>,
    %c287_506 = arith.constant 287 : index
    %c0_507 = arith.constant 0 : index
    %332 = tpu.strided_load %arg8[%c287_506, %c0_507] {strides = array<i32: 2, 1>} : memref<338x16xf32, #tpu.memory_space<vmem>>, vector<5x16xf32>
    %c45_508 = arith.constant 45 : index
    %c80_509 = arith.constant 80 : index
    %333 = vector.load %arg9[%c45_508, %c80_509] : memref<50x256xf32, #tpu.memory_space<vmem>>, vector<5x16xf32>
    tpu.vector_store %arg9[%c45_508, %c80_509], %332 {strides = array<i32>} : memref<50x256xf32, #tpu.memory_space<vmem>>, vector<5x16xf32>,
    %c288_510 = arith.constant 288 : index
    %c0_511 = arith.constant 0 : index
    %334 = tpu.strided_load %arg8[%c288_510, %c0_511] {strides = array<i32: 2, 1>} : memref<338x16xf32, #tpu.memory_space<vmem>>, vector<5x16xf32>
    %c45_512 = arith.constant 45 : index
    %c96_513 = arith.constant 96 : index
    %335 = vector.load %arg9[%c45_512, %c96_513] : memref<50x256xf32, #tpu.memory_space<vmem>>, vector<5x16xf32>
    tpu.vector_store %arg9[%c45_512, %c96_513], %334 {strides = array<i32>} : memref<50x256xf32, #tpu.memory_space<vmem>>, vector<5x16xf32>,
    %c289_514 = arith.constant 289 : index
    %c0_515 = arith.constant 0 : index
    %336 = tpu.strided_load %arg8[%c289_514, %c0_515] {strides = array<i32: 2, 1>} : memref<338x16xf32, #tpu.memory_space<vmem>>, vector<5x16xf32>
    %c45_516 = arith.constant 45 : index
    %c112_517 = arith.constant 112 : index
    %337 = vector.load %arg9[%c45_516, %c112_517] : memref<50x256xf32, #tpu.memory_space<vmem>>, vector<5x16xf32>
    tpu.vector_store %arg9[%c45_516, %c112_517], %336 {strides = array<i32>} : memref<50x256xf32, #tpu.memory_space<vmem>>, vector<5x16xf32>,
    %c299 = arith.constant 299 : index
    %c0_518 = arith.constant 0 : index
    %338 = tpu.strided_load %arg8[%c299, %c0_518] {strides = array<i32: 2, 1>} : memref<338x16xf32, #tpu.memory_space<vmem>>, vector<5x16xf32>
    %c45_519 = arith.constant 45 : index
    %c128_520 = arith.constant 128 : index
    %339 = vector.load %arg9[%c45_519, %c128_520] : memref<50x256xf32, #tpu.memory_space<vmem>>, vector<5x16xf32>
    tpu.vector_store %arg9[%c45_519, %c128_520], %338 {strides = array<i32>} : memref<50x256xf32, #tpu.memory_space<vmem>>, vector<5x16xf32>,
    %c300 = arith.constant 300 : index
    %c0_521 = arith.constant 0 : index
    %340 = tpu.strided_load %arg8[%c300, %c0_521] {strides = array<i32: 2, 1>} : memref<338x16xf32, #tpu.memory_space<vmem>>, vector<5x16xf32>
    %c45_522 = arith.constant 45 : index
    %c144_523 = arith.constant 144 : index
    %341 = vector.load %arg9[%c45_522, %c144_523] : memref<50x256xf32, #tpu.memory_space<vmem>>, vector<5x16xf32>
    tpu.vector_store %arg9[%c45_522, %c144_523], %340 {strides = array<i32>} : memref<50x256xf32, #tpu.memory_space<vmem>>, vector<5x16xf32>,
    %c301 = arith.constant 301 : index
    %c0_524 = arith.constant 0 : index
    %342 = tpu.strided_load %arg8[%c301, %c0_524] {strides = array<i32: 2, 1>} : memref<338x16xf32, #tpu.memory_space<vmem>>, vector<5x16xf32>
    %c45_525 = arith.constant 45 : index
    %c160_526 = arith.constant 160 : index
    %343 = vector.load %arg9[%c45_525, %c160_526] : memref<50x256xf32, #tpu.memory_space<vmem>>, vector<5x16xf32>
    tpu.vector_store %arg9[%c45_525, %c160_526], %342 {strides = array<i32>} : memref<50x256xf32, #tpu.memory_space<vmem>>, vector<5x16xf32>,
    %c302 = arith.constant 302 : index
    %c0_527 = arith.constant 0 : index
    %344 = tpu.strided_load %arg8[%c302, %c0_527] {strides = array<i32: 2, 1>} : memref<338x16xf32, #tpu.memory_space<vmem>>, vector<5x16xf32>
    %c45_528 = arith.constant 45 : index
    %c176_529 = arith.constant 176 : index
    %345 = vector.load %arg9[%c45_528, %c176_529] : memref<50x256xf32, #tpu.memory_space<vmem>>, vector<5x16xf32>
    tpu.vector_store %arg9[%c45_528, %c176_529], %344 {strides = array<i32>} : memref<50x256xf32, #tpu.memory_space<vmem>>, vector<5x16xf32>,
    %c312 = arith.constant 312 : index
    %c0_530 = arith.constant 0 : index
    %346 = tpu.strided_load %arg8[%c312, %c0_530] {strides = array<i32: 2, 1>} : memref<338x16xf32, #tpu.memory_space<vmem>>, vector<5x16xf32>
    %c45_531 = arith.constant 45 : index
    %c192_532 = arith.constant 192 : index
    %347 = vector.load %arg9[%c45_531, %c192_532] : memref<50x256xf32, #tpu.memory_space<vmem>>, vector<5x16xf32>
    tpu.vector_store %arg9[%c45_531, %c192_532], %346 {strides = array<i32>} : memref<50x256xf32, #tpu.memory_space<vmem>>, vector<5x16xf32>,
    %c313 = arith.constant 313 : index
    %c0_533 = arith.constant 0 : index
    %348 = tpu.strided_load %arg8[%c313, %c0_533] {strides = array<i32: 2, 1>} : memref<338x16xf32, #tpu.memory_space<vmem>>, vector<5x16xf32>
    %c45_534 = arith.constant 45 : index
    %c208_535 = arith.constant 208 : index
    %349 = vector.load %arg9[%c45_534, %c208_535] : memref<50x256xf32, #tpu.memory_space<vmem>>, vector<5x16xf32>
    tpu.vector_store %arg9[%c45_534, %c208_535], %348 {strides = array<i32>} : memref<50x256xf32, #tpu.memory_space<vmem>>, vector<5x16xf32>,
    %c314 = arith.constant 314 : index
    %c0_536 = arith.constant 0 : index
    %350 = tpu.strided_load %arg8[%c314, %c0_536] {strides = array<i32: 2, 1>} : memref<338x16xf32, #tpu.memory_space<vmem>>, vector<5x16xf32>
    %c45_537 = arith.constant 45 : index
    %c224_538 = arith.constant 224 : index
    %351 = vector.load %arg9[%c45_537, %c224_538] : memref<50x256xf32, #tpu.memory_space<vmem>>, vector<5x16xf32>
    tpu.vector_store %arg9[%c45_537, %c224_538], %350 {strides = array<i32>} : memref<50x256xf32, #tpu.memory_space<vmem>>, vector<5x16xf32>,
    %c315 = arith.constant 315 : index
    %c0_539 = arith.constant 0 : index
    %352 = tpu.strided_load %arg8[%c315, %c0_539] {strides = array<i32: 2, 1>} : memref<338x16xf32, #tpu.memory_space<vmem>>, vector<5x16xf32>
    %c45_540 = arith.constant 45 : index
    %c240_541 = arith.constant 240 : index
    %353 = vector.load %arg9[%c45_540, %c240_541] : memref<50x256xf32, #tpu.memory_space<vmem>>, vector<5x16xf32>
    tpu.vector_store %arg9[%c45_540, %c240_541], %352 {strides = array<i32>} : memref<50x256xf32, #tpu.memory_space<vmem>>, vector<5x16xf32>,
    %c0_542 = arith.constant 0 : index
    %c0_543 = arith.constant 0 : index
    %354 = vector.load %arg9[%c0_542, %c0_543] : memref<50x256xf32, #tpu.memory_space<vmem>>, vector<50x256xf32>
    %355 = arith.truncf %354 : vector<50x256xf32> to vector<50x256xbf16>
    %c0_544 = arith.constant 0 : index
    %c0_545 = arith.constant 0 : index
    %356 = vector.load %arg3[%c0_544, %c0_545] : memref<256x32xbf16, #tpu.memory_space<vmem>>, vector<256x32xbf16>
    %cst_546 = arith.constant dense<0.000000e+00> : vector<50x32xf32>
    %357 = tpu.matmul %355, %356, %cst_546 {dimension_numbers = #tpu.dot_dimension_numbers<[1], [0], [0], [1], [0, 0, 1, 1], [], []>} : vector<50x256xbf16>, vector<256x32xbf16>, vector<50x32xf32> -> vector<50x32xf32>
    %c0_547 = arith.constant 0 : index
    %c0_548 = arith.constant 0 : index
    %358 = vector.load %arg4[%c0_547, %c0_548] : memref<2x32xf32, #tpu.memory_space<vmem>>, vector<2x32xf32>
    %cst_549 = arith.constant dense<0.000000e+00> : vector<32xf32>
    %359 = vector.multi_reduction <add>, %357, %cst_549 [0] : vector<50x32xf32> to vector<32xf32>
    %360 = vector.shape_cast %359 : vector<32xf32> to vector<1x32xf32>
    %cst_550 = arith.constant 2.000000e-02 : f32
    %361 = vector.broadcast %cst_550 : f32 to vector<1x32xf32>
    %362 = arith.mulf %360, %361 : vector<1x32xf32>
    %363 = arith.mulf %357, %357 : vector<50x32xf32>
    %cst_551 = arith.constant dense<0.000000e+00> : vector<32xf32>
    %364 = vector.multi_reduction <add>, %363, %cst_551 [0] : vector<50x32xf32> to vector<32xf32>
    %365 = vector.shape_cast %364 : vector<32xf32> to vector<1x32xf32>
    %cst_552 = arith.constant 2.000000e-02 : f32
    %366 = vector.broadcast %cst_552 : f32 to vector<1x32xf32>
    %367 = arith.mulf %365, %366 : vector<1x32xf32>
    %368 = arith.mulf %362, %362 : vector<1x32xf32>
    %369 = arith.subf %367, %368 : vector<1x32xf32>
    %370 = vector.broadcast %362 : vector<1x32xf32> to vector<50x32xf32>
    %371 = arith.subf %357, %370 : vector<50x32xf32>
    %cst_553 = arith.constant 9.99999974E-6 : f32
    %372 = vector.broadcast %cst_553 : f32 to vector<1x32xf32>
    %373 = arith.addf %369, %372 : vector<1x32xf32>
    %374 = math.rsqrt %373 : vector<1x32xf32>
    %375 = vector.broadcast %374 : vector<1x32xf32> to vector<50x32xf32>
    %376 = arith.mulf %371, %375 : vector<50x32xf32>
    %377 = vector.extract_strided_slice %358 {offsets = [0, 0], sizes = [1, 32], strides = [1, 1]} : vector<2x32xf32> to vector<1x32xf32>
    %378 = vector.broadcast %377 : vector<1x32xf32> to vector<50x32xf32>
    %379 = arith.mulf %376, %378 : vector<50x32xf32>
    %380 = vector.extract_strided_slice %358 {offsets = [1, 0], sizes = [1, 32], strides = [1, 1]} : vector<2x32xf32> to vector<1x32xf32>
    %381 = vector.broadcast %380 : vector<1x32xf32> to vector<50x32xf32>
    %382 = arith.addf %379, %381 : vector<50x32xf32>
    %cst_554 = arith.constant 0.000000e+00 : f32
    %383 = vector.broadcast %cst_554 : f32 to vector<50x32xf32>
    %384 = arith.cmpf ogt, %382, %383 : vector<50x32xf32>
    %cst_555 = arith.constant 2.000000e-01 : f32
    %385 = vector.broadcast %cst_555 : f32 to vector<50x32xf32>
    %386 = arith.mulf %385, %382 : vector<50x32xf32>
    %387 = arith.select %384, %382, %386 : vector<50x32xi1>, vector<50x32xf32>
    %c0_556 = arith.constant 0 : index
    %c0_557 = arith.constant 0 : index
    %388 = vector.load %arg10[%c0_556, %c0_557] : memref<50x32xf32, #tpu.memory_space<vmem>>, vector<50x32xf32>
    tpu.vector_store %arg10[%c0_556, %c0_557], %387 {strides = array<i32>} : memref<50x32xf32, #tpu.memory_space<vmem>>, vector<50x32xf32>,
    %c0_558 = arith.constant 0 : index
    %c0_559 = arith.constant 0 : index
    %389 = tpu.strided_load %arg10[%c0_558, %c0_559] {strides = array<i32: 2, 1>} : memref<50x32xf32, #tpu.memory_space<vmem>>, vector<1x32xf32>
    %c0_560 = arith.constant 0 : index
    %c0_561 = arith.constant 0 : index
    %390 = vector.load %arg11[%c0_560, %c0_561] : memref<2x512xf32, #tpu.memory_space<vmem>>, vector<1x32xf32>
    tpu.vector_store %arg11[%c0_560, %c0_561], %389 {strides = array<i32>} : memref<2x512xf32, #tpu.memory_space<vmem>>, vector<1x32xf32>,
    %c1_562 = arith.constant 1 : index
    %c0_563 = arith.constant 0 : index
    %391 = tpu.strided_load %arg10[%c1_562, %c0_563] {strides = array<i32: 2, 1>} : memref<50x32xf32, #tpu.memory_space<vmem>>, vector<1x32xf32>
    %c0_564 = arith.constant 0 : index
    %c32_565 = arith.constant 32 : index
    %392 = vector.load %arg11[%c0_564, %c32_565] : memref<2x512xf32, #tpu.memory_space<vmem>>, vector<1x32xf32>
    tpu.vector_store %arg11[%c0_564, %c32_565], %391 {strides = array<i32>} : memref<2x512xf32, #tpu.memory_space<vmem>>, vector<1x32xf32>,
    %c2_566 = arith.constant 2 : index
    %c0_567 = arith.constant 0 : index
    %393 = tpu.strided_load %arg10[%c2_566, %c0_567] {strides = array<i32: 2, 1>} : memref<50x32xf32, #tpu.memory_space<vmem>>, vector<1x32xf32>
    %c0_568 = arith.constant 0 : index
    %c64_569 = arith.constant 64 : index
    %394 = vector.load %arg11[%c0_568, %c64_569] : memref<2x512xf32, #tpu.memory_space<vmem>>, vector<1x32xf32>
    tpu.vector_store %arg11[%c0_568, %c64_569], %393 {strides = array<i32>} : memref<2x512xf32, #tpu.memory_space<vmem>>, vector<1x32xf32>,
    %c3_570 = arith.constant 3 : index
    %c0_571 = arith.constant 0 : index
    %395 = tpu.strided_load %arg10[%c3_570, %c0_571] {strides = array<i32: 2, 1>} : memref<50x32xf32, #tpu.memory_space<vmem>>, vector<1x32xf32>
    %c0_572 = arith.constant 0 : index
    %c96_573 = arith.constant 96 : index
    %396 = vector.load %arg11[%c0_572, %c96_573] : memref<2x512xf32, #tpu.memory_space<vmem>>, vector<1x32xf32>
    tpu.vector_store %arg11[%c0_572, %c96_573], %395 {strides = array<i32>} : memref<2x512xf32, #tpu.memory_space<vmem>>, vector<1x32xf32>,
    %c5_574 = arith.constant 5 : index
    %c0_575 = arith.constant 0 : index
    %397 = tpu.strided_load %arg10[%c5_574, %c0_575] {strides = array<i32: 2, 1>} : memref<50x32xf32, #tpu.memory_space<vmem>>, vector<1x32xf32>
    %c0_576 = arith.constant 0 : index
    %c128_577 = arith.constant 128 : index
    %398 = vector.load %arg11[%c0_576, %c128_577] : memref<2x512xf32, #tpu.memory_space<vmem>>, vector<1x32xf32>
    tpu.vector_store %arg11[%c0_576, %c128_577], %397 {strides = array<i32>} : memref<2x512xf32, #tpu.memory_space<vmem>>, vector<1x32xf32>,
    %c6 = arith.constant 6 : index
    %c0_578 = arith.constant 0 : index
    %399 = tpu.strided_load %arg10[%c6, %c0_578] {strides = array<i32: 2, 1>} : memref<50x32xf32, #tpu.memory_space<vmem>>, vector<1x32xf32>
    %c0_579 = arith.constant 0 : index
    %c160_580 = arith.constant 160 : index
    %400 = vector.load %arg11[%c0_579, %c160_580] : memref<2x512xf32, #tpu.memory_space<vmem>>, vector<1x32xf32>
    tpu.vector_store %arg11[%c0_579, %c160_580], %399 {strides = array<i32>} : memref<2x512xf32, #tpu.memory_space<vmem>>, vector<1x32xf32>,
    %c7 = arith.constant 7 : index
    %c0_581 = arith.constant 0 : index
    %401 = tpu.strided_load %arg10[%c7, %c0_581] {strides = array<i32: 2, 1>} : memref<50x32xf32, #tpu.memory_space<vmem>>, vector<1x32xf32>
    %c0_582 = arith.constant 0 : index
    %c192_583 = arith.constant 192 : index
    %402 = vector.load %arg11[%c0_582, %c192_583] : memref<2x512xf32, #tpu.memory_space<vmem>>, vector<1x32xf32>
    tpu.vector_store %arg11[%c0_582, %c192_583], %401 {strides = array<i32>} : memref<2x512xf32, #tpu.memory_space<vmem>>, vector<1x32xf32>,
    %c8 = arith.constant 8 : index
    %c0_584 = arith.constant 0 : index
    %403 = tpu.strided_load %arg10[%c8, %c0_584] {strides = array<i32: 2, 1>} : memref<50x32xf32, #tpu.memory_space<vmem>>, vector<1x32xf32>
    %c0_585 = arith.constant 0 : index
    %c224_586 = arith.constant 224 : index
    %404 = vector.load %arg11[%c0_585, %c224_586] : memref<2x512xf32, #tpu.memory_space<vmem>>, vector<1x32xf32>
    tpu.vector_store %arg11[%c0_585, %c224_586], %403 {strides = array<i32>} : memref<2x512xf32, #tpu.memory_space<vmem>>, vector<1x32xf32>,
    %c10_587 = arith.constant 10 : index
    %c0_588 = arith.constant 0 : index
    %405 = tpu.strided_load %arg10[%c10_587, %c0_588] {strides = array<i32: 2, 1>} : memref<50x32xf32, #tpu.memory_space<vmem>>, vector<1x32xf32>
    %c0_589 = arith.constant 0 : index
    %c256 = arith.constant 256 : index
    %406 = vector.load %arg11[%c0_589, %c256] : memref<2x512xf32, #tpu.memory_space<vmem>>, vector<1x32xf32>
    tpu.vector_store %arg11[%c0_589, %c256], %405 {strides = array<i32>} : memref<2x512xf32, #tpu.memory_space<vmem>>, vector<1x32xf32>,
    %c11 = arith.constant 11 : index
    %c0_590 = arith.constant 0 : index
    %407 = tpu.strided_load %arg10[%c11, %c0_590] {strides = array<i32: 2, 1>} : memref<50x32xf32, #tpu.memory_space<vmem>>, vector<1x32xf32>
    %c0_591 = arith.constant 0 : index
    %c288_592 = arith.constant 288 : index
    %408 = vector.load %arg11[%c0_591, %c288_592] : memref<2x512xf32, #tpu.memory_space<vmem>>, vector<1x32xf32>
    tpu.vector_store %arg11[%c0_591, %c288_592], %407 {strides = array<i32>} : memref<2x512xf32, #tpu.memory_space<vmem>>, vector<1x32xf32>,
    %c12 = arith.constant 12 : index
    %c0_593 = arith.constant 0 : index
    %409 = tpu.strided_load %arg10[%c12, %c0_593] {strides = array<i32: 2, 1>} : memref<50x32xf32, #tpu.memory_space<vmem>>, vector<1x32xf32>
    %c0_594 = arith.constant 0 : index
    %c320 = arith.constant 320 : index
    %410 = vector.load %arg11[%c0_594, %c320] : memref<2x512xf32, #tpu.memory_space<vmem>>, vector<1x32xf32>
    tpu.vector_store %arg11[%c0_594, %c320], %409 {strides = array<i32>} : memref<2x512xf32, #tpu.memory_space<vmem>>, vector<1x32xf32>,
    %c13_595 = arith.constant 13 : index
    %c0_596 = arith.constant 0 : index
    %411 = tpu.strided_load %arg10[%c13_595, %c0_596] {strides = array<i32: 2, 1>} : memref<50x32xf32, #tpu.memory_space<vmem>>, vector<1x32xf32>
    %c0_597 = arith.constant 0 : index
    %c352 = arith.constant 352 : index
    %412 = vector.load %arg11[%c0_597, %c352] : memref<2x512xf32, #tpu.memory_space<vmem>>, vector<1x32xf32>
    tpu.vector_store %arg11[%c0_597, %c352], %411 {strides = array<i32>} : memref<2x512xf32, #tpu.memory_space<vmem>>, vector<1x32xf32>,
    %c15_598 = arith.constant 15 : index
    %c0_599 = arith.constant 0 : index
    %413 = tpu.strided_load %arg10[%c15_598, %c0_599] {strides = array<i32: 2, 1>} : memref<50x32xf32, #tpu.memory_space<vmem>>, vector<1x32xf32>
    %c0_600 = arith.constant 0 : index
    %c384 = arith.constant 384 : index
    %414 = vector.load %arg11[%c0_600, %c384] : memref<2x512xf32, #tpu.memory_space<vmem>>, vector<1x32xf32>
    tpu.vector_store %arg11[%c0_600, %c384], %413 {strides = array<i32>} : memref<2x512xf32, #tpu.memory_space<vmem>>, vector<1x32xf32>,
    %c16_601 = arith.constant 16 : index
    %c0_602 = arith.constant 0 : index
    %415 = tpu.strided_load %arg10[%c16_601, %c0_602] {strides = array<i32: 2, 1>} : memref<50x32xf32, #tpu.memory_space<vmem>>, vector<1x32xf32>
    %c0_603 = arith.constant 0 : index
    %c416 = arith.constant 416 : index
    %416 = vector.load %arg11[%c0_603, %c416] : memref<2x512xf32, #tpu.memory_space<vmem>>, vector<1x32xf32>
    tpu.vector_store %arg11[%c0_603, %c416], %415 {strides = array<i32>} : memref<2x512xf32, #tpu.memory_space<vmem>>, vector<1x32xf32>,
    %c17 = arith.constant 17 : index
    %c0_604 = arith.constant 0 : index
    %417 = tpu.strided_load %arg10[%c17, %c0_604] {strides = array<i32: 2, 1>} : memref<50x32xf32, #tpu.memory_space<vmem>>, vector<1x32xf32>
    %c0_605 = arith.constant 0 : index
    %c448 = arith.constant 448 : index
    %418 = vector.load %arg11[%c0_605, %c448] : memref<2x512xf32, #tpu.memory_space<vmem>>, vector<1x32xf32>
    tpu.vector_store %arg11[%c0_605, %c448], %417 {strides = array<i32>} : memref<2x512xf32, #tpu.memory_space<vmem>>, vector<1x32xf32>,
    %c18 = arith.constant 18 : index
    %c0_606 = arith.constant 0 : index
    %419 = tpu.strided_load %arg10[%c18, %c0_606] {strides = array<i32: 2, 1>} : memref<50x32xf32, #tpu.memory_space<vmem>>, vector<1x32xf32>
    %c0_607 = arith.constant 0 : index
    %c480 = arith.constant 480 : index
    %420 = vector.load %arg11[%c0_607, %c480] : memref<2x512xf32, #tpu.memory_space<vmem>>, vector<1x32xf32>
    tpu.vector_store %arg11[%c0_607, %c480], %419 {strides = array<i32>} : memref<2x512xf32, #tpu.memory_space<vmem>>, vector<1x32xf32>,
    %c25_608 = arith.constant 25 : index
    %c0_609 = arith.constant 0 : index
    %421 = tpu.strided_load %arg10[%c25_608, %c0_609] {strides = array<i32: 2, 1>} : memref<50x32xf32, #tpu.memory_space<vmem>>, vector<1x32xf32>
    %c1_610 = arith.constant 1 : index
    %c0_611 = arith.constant 0 : index
    %422 = vector.load %arg11[%c1_610, %c0_611] : memref<2x512xf32, #tpu.memory_space<vmem>>, vector<1x32xf32>
    tpu.vector_store %arg11[%c1_610, %c0_611], %421 {strides = array<i32>} : memref<2x512xf32, #tpu.memory_space<vmem>>, vector<1x32xf32>,
    %c26_612 = arith.constant 26 : index
    %c0_613 = arith.constant 0 : index
    %423 = tpu.strided_load %arg10[%c26_612, %c0_613] {strides = array<i32: 2, 1>} : memref<50x32xf32, #tpu.memory_space<vmem>>, vector<1x32xf32>
    %c1_614 = arith.constant 1 : index
    %c32_615 = arith.constant 32 : index
    %424 = vector.load %arg11[%c1_614, %c32_615] : memref<2x512xf32, #tpu.memory_space<vmem>>, vector<1x32xf32>
    tpu.vector_store %arg11[%c1_614, %c32_615], %423 {strides = array<i32>} : memref<2x512xf32, #tpu.memory_space<vmem>>, vector<1x32xf32>,
    %c27_616 = arith.constant 27 : index
    %c0_617 = arith.constant 0 : index
    %425 = tpu.strided_load %arg10[%c27_616, %c0_617] {strides = array<i32: 2, 1>} : memref<50x32xf32, #tpu.memory_space<vmem>>, vector<1x32xf32>
    %c1_618 = arith.constant 1 : index
    %c64_619 = arith.constant 64 : index
    %426 = vector.load %arg11[%c1_618, %c64_619] : memref<2x512xf32, #tpu.memory_space<vmem>>, vector<1x32xf32>
    tpu.vector_store %arg11[%c1_618, %c64_619], %425 {strides = array<i32>} : memref<2x512xf32, #tpu.memory_space<vmem>>, vector<1x32xf32>,
    %c28_620 = arith.constant 28 : index
    %c0_621 = arith.constant 0 : index
    %427 = tpu.strided_load %arg10[%c28_620, %c0_621] {strides = array<i32: 2, 1>} : memref<50x32xf32, #tpu.memory_space<vmem>>, vector<1x32xf32>
    %c1_622 = arith.constant 1 : index
    %c96_623 = arith.constant 96 : index
    %428 = vector.load %arg11[%c1_622, %c96_623] : memref<2x512xf32, #tpu.memory_space<vmem>>, vector<1x32xf32>
    tpu.vector_store %arg11[%c1_622, %c96_623], %427 {strides = array<i32>} : memref<2x512xf32, #tpu.memory_space<vmem>>, vector<1x32xf32>,
    %c30_624 = arith.constant 30 : index
    %c0_625 = arith.constant 0 : index
    %429 = tpu.strided_load %arg10[%c30_624, %c0_625] {strides = array<i32: 2, 1>} : memref<50x32xf32, #tpu.memory_space<vmem>>, vector<1x32xf32>
    %c1_626 = arith.constant 1 : index
    %c128_627 = arith.constant 128 : index
    %430 = vector.load %arg11[%c1_626, %c128_627] : memref<2x512xf32, #tpu.memory_space<vmem>>, vector<1x32xf32>
    tpu.vector_store %arg11[%c1_626, %c128_627], %429 {strides = array<i32>} : memref<2x512xf32, #tpu.memory_space<vmem>>, vector<1x32xf32>,
    %c31 = arith.constant 31 : index
    %c0_628 = arith.constant 0 : index
    %431 = tpu.strided_load %arg10[%c31, %c0_628] {strides = array<i32: 2, 1>} : memref<50x32xf32, #tpu.memory_space<vmem>>, vector<1x32xf32>
    %c1_629 = arith.constant 1 : index
    %c160_630 = arith.constant 160 : index
    %432 = vector.load %arg11[%c1_629, %c160_630] : memref<2x512xf32, #tpu.memory_space<vmem>>, vector<1x32xf32>
    tpu.vector_store %arg11[%c1_629, %c160_630], %431 {strides = array<i32>} : memref<2x512xf32, #tpu.memory_space<vmem>>, vector<1x32xf32>,
    %c32_631 = arith.constant 32 : index
    %c0_632 = arith.constant 0 : index
    %433 = tpu.strided_load %arg10[%c32_631, %c0_632] {strides = array<i32: 2, 1>} : memref<50x32xf32, #tpu.memory_space<vmem>>, vector<1x32xf32>
    %c1_633 = arith.constant 1 : index
    %c192_634 = arith.constant 192 : index
    %434 = vector.load %arg11[%c1_633, %c192_634] : memref<2x512xf32, #tpu.memory_space<vmem>>, vector<1x32xf32>
    tpu.vector_store %arg11[%c1_633, %c192_634], %433 {strides = array<i32>} : memref<2x512xf32, #tpu.memory_space<vmem>>, vector<1x32xf32>,
    %c33 = arith.constant 33 : index
    %c0_635 = arith.constant 0 : index
    %435 = tpu.strided_load %arg10[%c33, %c0_635] {strides = array<i32: 2, 1>} : memref<50x32xf32, #tpu.memory_space<vmem>>, vector<1x32xf32>
    %c1_636 = arith.constant 1 : index
    %c224_637 = arith.constant 224 : index
    %436 = vector.load %arg11[%c1_636, %c224_637] : memref<2x512xf32, #tpu.memory_space<vmem>>, vector<1x32xf32>
    tpu.vector_store %arg11[%c1_636, %c224_637], %435 {strides = array<i32>} : memref<2x512xf32, #tpu.memory_space<vmem>>, vector<1x32xf32>,
    %c35_638 = arith.constant 35 : index
    %c0_639 = arith.constant 0 : index
    %437 = tpu.strided_load %arg10[%c35_638, %c0_639] {strides = array<i32: 2, 1>} : memref<50x32xf32, #tpu.memory_space<vmem>>, vector<1x32xf32>
    %c1_640 = arith.constant 1 : index
    %c256_641 = arith.constant 256 : index
    %438 = vector.load %arg11[%c1_640, %c256_641] : memref<2x512xf32, #tpu.memory_space<vmem>>, vector<1x32xf32>
    tpu.vector_store %arg11[%c1_640, %c256_641], %437 {strides = array<i32>} : memref<2x512xf32, #tpu.memory_space<vmem>>, vector<1x32xf32>,
    %c36 = arith.constant 36 : index
    %c0_642 = arith.constant 0 : index
    %439 = tpu.strided_load %arg10[%c36, %c0_642] {strides = array<i32: 2, 1>} : memref<50x32xf32, #tpu.memory_space<vmem>>, vector<1x32xf32>
    %c1_643 = arith.constant 1 : index
    %c288_644 = arith.constant 288 : index
    %440 = vector.load %arg11[%c1_643, %c288_644] : memref<2x512xf32, #tpu.memory_space<vmem>>, vector<1x32xf32>
    tpu.vector_store %arg11[%c1_643, %c288_644], %439 {strides = array<i32>} : memref<2x512xf32, #tpu.memory_space<vmem>>, vector<1x32xf32>,
    %c37 = arith.constant 37 : index
    %c0_645 = arith.constant 0 : index
    %441 = tpu.strided_load %arg10[%c37, %c0_645] {strides = array<i32: 2, 1>} : memref<50x32xf32, #tpu.memory_space<vmem>>, vector<1x32xf32>
    %c1_646 = arith.constant 1 : index
    %c320_647 = arith.constant 320 : index
    %442 = vector.load %arg11[%c1_646, %c320_647] : memref<2x512xf32, #tpu.memory_space<vmem>>, vector<1x32xf32>
    tpu.vector_store %arg11[%c1_646, %c320_647], %441 {strides = array<i32>} : memref<2x512xf32, #tpu.memory_space<vmem>>, vector<1x32xf32>,
    %c38 = arith.constant 38 : index
    %c0_648 = arith.constant 0 : index
    %443 = tpu.strided_load %arg10[%c38, %c0_648] {strides = array<i32: 2, 1>} : memref<50x32xf32, #tpu.memory_space<vmem>>, vector<1x32xf32>
    %c1_649 = arith.constant 1 : index
    %c352_650 = arith.constant 352 : index
    %444 = vector.load %arg11[%c1_649, %c352_650] : memref<2x512xf32, #tpu.memory_space<vmem>>, vector<1x32xf32>
    tpu.vector_store %arg11[%c1_649, %c352_650], %443 {strides = array<i32>} : memref<2x512xf32, #tpu.memory_space<vmem>>, vector<1x32xf32>,
    %c40_651 = arith.constant 40 : index
    %c0_652 = arith.constant 0 : index
    %445 = tpu.strided_load %arg10[%c40_651, %c0_652] {strides = array<i32: 2, 1>} : memref<50x32xf32, #tpu.memory_space<vmem>>, vector<1x32xf32>
    %c1_653 = arith.constant 1 : index
    %c384_654 = arith.constant 384 : index
    %446 = vector.load %arg11[%c1_653, %c384_654] : memref<2x512xf32, #tpu.memory_space<vmem>>, vector<1x32xf32>
    tpu.vector_store %arg11[%c1_653, %c384_654], %445 {strides = array<i32>} : memref<2x512xf32, #tpu.memory_space<vmem>>, vector<1x32xf32>,
    %c41_655 = arith.constant 41 : index
    %c0_656 = arith.constant 0 : index
    %447 = tpu.strided_load %arg10[%c41_655, %c0_656] {strides = array<i32: 2, 1>} : memref<50x32xf32, #tpu.memory_space<vmem>>, vector<1x32xf32>
    %c1_657 = arith.constant 1 : index
    %c416_658 = arith.constant 416 : index
    %448 = vector.load %arg11[%c1_657, %c416_658] : memref<2x512xf32, #tpu.memory_space<vmem>>, vector<1x32xf32>
    tpu.vector_store %arg11[%c1_657, %c416_658], %447 {strides = array<i32>} : memref<2x512xf32, #tpu.memory_space<vmem>>, vector<1x32xf32>,
    %c42_659 = arith.constant 42 : index
    %c0_660 = arith.constant 0 : index
    %449 = tpu.strided_load %arg10[%c42_659, %c0_660] {strides = array<i32: 2, 1>} : memref<50x32xf32, #tpu.memory_space<vmem>>, vector<1x32xf32>
    %c1_661 = arith.constant 1 : index
    %c448_662 = arith.constant 448 : index
    %450 = vector.load %arg11[%c1_661, %c448_662] : memref<2x512xf32, #tpu.memory_space<vmem>>, vector<1x32xf32>
    tpu.vector_store %arg11[%c1_661, %c448_662], %449 {strides = array<i32>} : memref<2x512xf32, #tpu.memory_space<vmem>>, vector<1x32xf32>,
    %c43 = arith.constant 43 : index
    %c0_663 = arith.constant 0 : index
    %451 = tpu.strided_load %arg10[%c43, %c0_663] {strides = array<i32: 2, 1>} : memref<50x32xf32, #tpu.memory_space<vmem>>, vector<1x32xf32>
    %c1_664 = arith.constant 1 : index
    %c480_665 = arith.constant 480 : index
    %452 = vector.load %arg11[%c1_664, %c480_665] : memref<2x512xf32, #tpu.memory_space<vmem>>, vector<1x32xf32>
    tpu.vector_store %arg11[%c1_664, %c480_665], %451 {strides = array<i32>} : memref<2x512xf32, #tpu.memory_space<vmem>>, vector<1x32xf32>,
    %c0_666 = arith.constant 0 : index
    %c0_667 = arith.constant 0 : index
    %453 = vector.load %arg11[%c0_666, %c0_667] : memref<2x512xf32, #tpu.memory_space<vmem>>, vector<2x512xf32>
    %c0_668 = arith.constant 0 : index
    %c0_669 = arith.constant 0 : index
    %454 = vector.load %arg5[%c0_668, %c0_669] : memref<1x512xf32, #tpu.memory_space<vmem>>, vector<1x512xf32>
    %455 = vector.broadcast %454 : vector<1x512xf32> to vector<2x512xf32>
    %456 = arith.mulf %453, %455 : vector<2x512xf32>
    %cst_670 = arith.constant dense<0.000000e+00> : vector<2xf32>
    %457 = vector.multi_reduction <add>, %456, %cst_670 [1] : vector<2x512xf32> to vector<2xf32>
    %458 = vector.shape_cast %457 : vector<2xf32> to vector<2x1xf32>
    %c0_671 = arith.constant 0 : index
    %c0_672 = arith.constant 0 : index
    %459 = vector.load %arg6[%c0_671, %c0_672] : memref<1x1xf32, #tpu.memory_space<vmem>>, vector<1x1xf32>
    %460 = vector.broadcast %459 : vector<1x1xf32> to vector<2x1xf32>
    %461 = arith.addf %458, %460 : vector<2x1xf32>
    %c0_673 = arith.constant 0 : index
    %c0_674 = arith.constant 0 : index
    %462 = vector.load %arg7[%c0_673, %c0_674] : memref<2x1xf32, #tpu.memory_space<vmem>>, vector<2x1xf32>
    tpu.vector_store %arg7[%c0_673, %c0_674], %461 {strides = array<i32>} : memref<2x1xf32, #tpu.memory_space<vmem>>, vector<2x1xf32>,
    return
  }
}

</mosaic_0001>

<bundles_post_ra>
// kernel: discriminator_forward.1
= control target key start
LH: loop header
LB: loop body
LE: loop exit
PB: predicated region body
PF: predicated region fallthrough
CT: control target
= control target key end

     0   :  { %vm204_vm0 = vcmask 392192   ;;  %vm480_vm1 = vcmask 130048   ;;  %vm4856_vm2 = vcmask 123904   ;;  %s3387_s27 = smov 16   ;;  %vm4855_vm5 = vcmask 126976   ;;  %s3388_s28 = smov 48   ;;  %s4847_s1 = inlined_call_operand.vmem [shape: bf16[48,16], index: 1, kind: input, shape index: {}]   ;;  %s4848_s0 = inlined_call_operand.vmem [shape: bf16[338,48], index: 0, kind: input, shape index: {}]   ;;  %s4849_s2 = inlined_call_operand.vmem [shape: f32[2,16], index: 2, kind: input, shape index: {}]   ;;  %s4850_s3 = inlined_call_operand.vmem [shape: bf16[256,32], index: 3, kind: input, shape index: {}]   ;;  %s4851_s4 = inlined_call_operand.vmem [shape: f32[2,32], index: 4, kind: input, shape index: {}]   ;;  %s4852_s6 = inlined_call_operand.<no memory space> [shape: f32[1,1], index: 6, kind: input, shape index: {}]   ;;  %s4853_s5 = inlined_call_operand.vmem [shape: f32[1,512], index: 5, kind: input, shape index: {}]   ;;  %s4854_s7 = inlined_call_operand.vmem [shape: f32[2,1], index: 7, kind: output, shape index: {}]  }
   0x1   :  { %v3341_v0 = vld [vmem:[%s4847_s1] sm:$0xff]   ;;  %v3342_v1 = vld [vmem:[%s4847_s1 + $0x8] sm:$0xff]   ;;  %v3343_v3 = vld [vmem:[%s4847_s1 + $0x10] sm:$0xff]   ;;  %s3389_s29 = smov 64   ;;  %s3390_s30 = smov 80  }
   0x2   :  { %3283 = vmatprep.subr.bf16.mxu0 %v3341_v0  ;;  %v3344_v2 = vld [vmem:[%s4848_s0] sm:$0xff]   ;;  %v3345_v4 = vld [vmem:[%s4848_s0 + $0x8] sm:$0xff]   ;;  %v3346_v5 = vld [vmem:[%s4848_s0 + $0x10] sm:$0xff]   ;;  %s3391_s8 = smov 96   ;;  %s3392_s9 = smov 112  }
   0x3   :  { %3284 = vmatpush3.bf16.msra.mxu0 %v3341_v0  ;;  %3289 = vmatprep.mubr.msk.bf16.mxu0 %vm204_vm0, %v3344_v2  ;;  %v3347_v6 = vld [vmem:[%s4848_s0 + $0x18] sm:$0xff]   ;;  %v3348_v7 = vld [vmem:[%s4848_s0 + $0x20] sm:$0xff]   ;;  %v3349_v8 = vld [vmem:[%s4848_s0 + $0x28] sm:$0xff]  }
   0x4   :  { %3285 = vmatprep.subr.bf16.mxu0 %v3342_v1  ;;  %v3350_v9 = vld [vmem:[%s4848_s0 + $0x30] sm:$0xff]   ;;  %v3351_v10 = vld [vmem:[%s4848_s0 + $0x38] sm:$0xff]   ;;  %v3352_v11 = vld [vmem:[%s4848_s0 + $0x40] sm:$0xff]  }
   0x5   :  { %v3353_v12 = vld [vmem:[%s4848_s0 + $0x48] sm:$0xff]   ;;  %v3354_v13 = vld [vmem:[%s4848_s0 + $0x50] sm:$0xff]   ;;  %v3355_v14 = vld [vmem:[%s4848_s0 + $0x58] sm:$0xff]  }
   0x6   :  { %v3356_v15 = vld [vmem:[%s4848_s0 + $0x60] sm:$0xff]   ;;  %v3357_v16 = vld [vmem:[%s4848_s0 + $0x68] sm:$0xff]   ;;  %v3358_v17 = vld [vmem:[%s4848_s0 + $0x70] sm:$0xff]  }
   0x7   :  { %3286 = vmatpush3.bf16.msra.mxu0 %v3342_v1  ;;  %v3359_v18 = vld [vmem:[%s4848_s0 + $0x78] sm:$0xff]   ;;  %v3360_v19 = vld [vmem:[%s4848_s0 + $0x80] sm:$0xff]   ;;  %v3361_v20 = vld [vmem:[%s4848_s0 + $0x88] sm:$0xff]  }
   0x8   :  { %3287 = vmatprep.subr.bf16.mxu0 %v3343_v3  ;;  %v3362_v21 = vld [vmem:[%s4848_s0 + $0x90] sm:$0xff]   ;;  %v3363_v22 = vld [vmem:[%s4848_s0 + $0x98] sm:$0xff]   ;;  %v3364_v23 = vld [vmem:[%s4848_s0 + $0xa0] sm:$0xff]  }
   0x9   :  { %v3365_v24 = vld [vmem:[%s4848_s0 + $0xa8] ss:$0 sps:$4 sm:$0x11]  }
   0xb   :  { %3288 = vmatpush3.bf16.msra.mxu0 %v3343_v3 }
   0xe   :  { %3290 = vmatmul.mubr.msk.bf16.vlgmr.msra.gmra.mrb[0].mxu0 %vm204_vm0, %v3345_v4 }
   0xf   :  { %3293 = vmatprep.mubr.msk.bf16.mxu0 %vm204_vm0, %v3346_v5 }
  0x16   :  { %3294 = vmatmul.mubr.msk.bf16.gmra.mrb[4].mxu0 %vm204_vm0, %v3347_v6 }
  0x17   :  { %3297 = vmatprep.mubr.msk.bf16.mxu0 %vm204_vm0, %v3348_v7 }
  0x1e   :  { %3298 = vmatmul.mubr.msk.bf16.gmra.mrb[8].mxu0 %vm204_vm0, %v3349_v8 }
  0x1f   :  { %3301 = vmatprep.mubr.msk.bf16.mxu0 %vm204_vm0, %v3350_v9 }
  0x26   :  { %3302 = vmatmul.mubr.msk.bf16.gmra.mrb[12].mxu0 %vm204_vm0, %v3351_v10 }
  0x27   :  { %3305 = vmatprep.mubr.msk.bf16.mxu0 %vm204_vm0, %v3352_v11 }
  0x2e   :  { %3306 = vmatmul.mubr.msk.bf16.gmra.mrb[16].mxu0 %vm204_vm0, %v3353_v12 }
  0x2f   :  { %3309 = vmatprep.mubr.msk.bf16.mxu0 %vm204_vm0, %v3354_v13 }
  0x36   :  { %3310 = vmatmul.mubr.msk.bf16.gmra.mrb[20].mxu0 %vm204_vm0, %v3355_v14 }
  0x37   :  { %3313 = vmatprep.mubr.msk.bf16.mxu0 %vm204_vm0, %v3356_v15 }
  0x3e   :  { %3314 = vmatmul.mubr.msk.bf16.gmra.mrb[24].mxu0 %vm204_vm0, %v3357_v16 }
  0x3f   :  { %3317 = vmatprep.mubr.msk.bf16.mxu0 %vm204_vm0, %v3358_v17 }
  0x46   :  { %3318 = vmatmul.mubr.msk.bf16.gmra.mrb[28].mxu0 %vm204_vm0, %v3359_v18 }
  0x47   :  { %3321 = vmatprep.mubr.msk.bf16.mxu0 %vm204_vm0, %v3360_v19 }
  0x4e   :  { %3322 = vmatmul.mubr.msk.bf16.gmra.mrb[32].mxu0 %vm204_vm0, %v3361_v20 }
  0x4f   :  { %3325 = vmatprep.mubr.msk.bf16.mxu0 %vm204_vm0, %v3362_v21 }
  0x56   :  { %3326 = vmatmul.mubr.msk.bf16.gmra.mrb[36].mxu0 %vm204_vm0, %v3363_v22 }
  0x57   :  { %3329 = vmatprep.mubr.msk.bf16.mxu0 %vm204_vm0, %v3364_v23 }
  0x5e   :  { %3330 = vmatmul.mubr.msk.bf16.gmra.mrb[40].mxu0 %vm204_vm0, %v3365_v24 }
  0xe1   :  { %v3531_v25 = vpop.f32.mrb[0].mxu0 }
  0xe2   :  { %v3533_v26 = vpop.f32.mrb[1].mxu0  ;;  %v576_v30 = vmul.f32 %v3531_v25, %v3531_v25  ;;  %v484_v35 = vsel %vm480_vm1, %v3531_v25, 0.0 }
  0xe3   :  { %v574_v27 = vmul.f32 %v3533_v26, %v3533_v26  ;;  %v3537_v28 = vpop.f32.mrb[2].mxu0  ;;  %v481_v31 = vsel %vm480_vm1, %v3533_v26, 0.0 }
  0xe4   :  { %v3539_v29 = vpop.f32.mrb[3].mxu0  ;;  %v577_v37 = vmul.f32 %v3537_v28, %v3537_v28  ;;  %v620_v41 = vsel %vm480_vm1, %v576_v30, 0.0  ;;  %v486_v42 = vsel %vm480_vm1, %v3537_v28, 0.0 }
  0xe5   :  { %v482_v32 = vsel %vm480_vm1, %v3539_v29, 0.0  ;;  %v575_v33 = vmul.f32 %v3539_v29, %v3539_v29  ;;  %v617_v36 = vsel %vm480_vm1, %v574_v27, 0.0 }
  0xe6   :  { %v483_v34 = vadd.f32 %v482_v32, %v481_v31  ;;  %v622_v47 = vsel %vm480_vm1, %v577_v37, 0.0 }
  0xe7   :  { %v618_v38 = vsel %vm480_vm1, %v575_v33, 0.0 }
  0xe8   :  { %v485_v39 = vadd.f32 %v484_v35, %v483_v34  ;;  %v619_v40 = vadd.f32 %v618_v38, %v617_v36 }
  0xe9   :  { %v3558_v43 = vpop.f32.mrb[4].mxu0 }
  0xea   :  { %v621_v44 = vadd.f32 %v620_v41, %v619_v40  ;;  %v3560_v45 = vpop.f32.mrb[5].mxu0  ;;  %v487_v46 = vadd.f32 %v486_v42, %v485_v39  ;;  %v580_v54 = vmul.f32 %v3558_v43, %v3558_v43  ;;  %v492_v60 = vsel %vm480_vm1, %v3558_v43, 0.0 }
  0xeb   :  { %v488_v48 = vsel %vm480_vm1, %v3560_v45, 0.0  ;;  %v578_v49 = vmul.f32 %v3560_v45, %v3560_v45  ;;  %v3567_v50 = vpop.f32.mrb[6].mxu0 }
  0xec   :  { %v489_v51 = vadd.f32 %v488_v48, %v487_v46  ;;  %v623_v52 = vadd.f32 %v622_v47, %v621_v44  ;;  %v3569_v53 = vpop.f32.mrb[7].mxu0  ;;  %v581_v61 = vmul.f32 %v3567_v50, %v3567_v50  ;;  %v628_v1 = vsel %vm480_vm1, %v580_v54, 0.0 }
  0xed   :  { %v624_v55 = vsel %vm480_vm1, %v578_v49, 0.0  ;;  %v490_v56 = vsel %vm480_vm1, %v3569_v53, 0.0  ;;  %v579_v57 = vmul.f32 %v3569_v53, %v3569_v53  ;;  %v494_v2 = vsel %vm480_vm1, %v3567_v50, 0.0 }
  0xee   :  { %v625_v58 = vadd.f32 %v624_v55, %v623_v52  ;;  %v491_v59 = vadd.f32 %v490_v56, %v489_v51  ;;  %v630_v7 = vsel %vm480_vm1, %v581_v61, 0.0 }
  0xef   :  { %v626_v62 = vsel %vm480_vm1, %v579_v57, 0.0 }
  0xf0   :  { %v493_v63 = vadd.f32 %v492_v60, %v491_v59  ;;  %v627_v0 = vadd.f32 %v626_v62, %v625_v58 }
  0xf1   :  { %v3586_v3 = vpop.f32.mrb[8].mxu0 }
  0xf2   :  { %v629_v4 = vadd.f32 %v628_v1, %v627_v0  ;;  %v3588_v5 = vpop.f32.mrb[9].mxu0  ;;  %v495_v6 = vadd.f32 %v494_v2, %v493_v63  ;;  %v584_v14 = vmul.f32 %v3586_v3, %v3586_v3  ;;  %v500_v20 = vsel %vm480_vm1, %v3586_v3, 0.0 }
  0xf3   :  { %v496_v8 = vsel %vm480_vm1, %v3588_v5, 0.0  ;;  %v582_v9 = vmul.f32 %v3588_v5, %v3588_v5  ;;  %v3595_v10 = vpop.f32.mrb[10].mxu0 }
  0xf4   :  { %v497_v11 = vadd.f32 %v496_v8, %v495_v6  ;;  %v631_v12 = vadd.f32 %v630_v7, %v629_v4  ;;  %v3597_v13 = vpop.f32.mrb[11].mxu0  ;;  %v585_v21 = vmul.f32 %v3595_v10, %v3595_v10  ;;  %v636_v27 = vsel %vm480_vm1, %v584_v14, 0.0 }
  0xf5   :  { %v632_v15 = vsel %vm480_vm1, %v582_v9, 0.0  ;;  %v498_v16 = vsel %vm480_vm1, %v3597_v13, 0.0  ;;  %v583_v17 = vmul.f32 %v3597_v13, %v3597_v13  ;;  %v502_v30 = vsel %vm480_vm1, %v3595_v10, 0.0 }
  0xf6   :  { %v633_v18 = vadd.f32 %v632_v15, %v631_v12  ;;  %v499_v19 = vadd.f32 %v498_v16, %v497_v11  ;;  %v638_v35 = vsel %vm480_vm1, %v585_v21, 0.0 }
  0xf7   :  { %v634_v22 = vsel %vm480_vm1, %v583_v17, 0.0 }
  0xf8   :  { %v501_v23 = vadd.f32 %v500_v20, %v499_v19  ;;  %v635_v24 = vadd.f32 %v634_v22, %v633_v18 }
  0xf9   :  { %v3614_v31 = vpop.f32.mrb[12].mxu0 }
  0xfa   :  { %v637_v32 = vadd.f32 %v636_v27, %v635_v24  ;;  %v3616_v33 = vpop.f32.mrb[13].mxu0  ;;  %v503_v34 = vadd.f32 %v502_v30, %v501_v23  ;;  %v588_v42 = vmul.f32 %v3614_v31, %v3614_v31  ;;  %v508_v51 = vsel %vm480_vm1, %v3614_v31, 0.0 }
  0xfb   :  { %v504_v36 = vsel %vm480_vm1, %v3616_v33, 0.0  ;;  %v586_v37 = vmul.f32 %v3616_v33, %v3616_v33  ;;  %v3623_v38 = vpop.f32.mrb[14].mxu0 }
  0xfc   :  { %v505_v39 = vadd.f32 %v504_v36, %v503_v34  ;;  %v639_v40 = vadd.f32 %v638_v35, %v637_v32  ;;  %v3625_v41 = vpop.f32.mrb[15].mxu0  ;;  %v589_v52 = vmul.f32 %v3623_v38, %v3623_v38  ;;  %v644_v57 = vsel %vm480_vm1, %v588_v42, 0.0 }
  0xfd   :  { %v640_v44 = vsel %vm480_vm1, %v586_v37, 0.0  ;;  %v506_v46 = vsel %vm480_vm1, %v3625_v41, 0.0  ;;  %v587_v47 = vmul.f32 %v3625_v41, %v3625_v41  ;;  %v510_v58 = vsel %vm480_vm1, %v3623_v38, 0.0 }
  0xfe   :  { %v641_v48 = vadd.f32 %v640_v44, %v639_v40  ;;  %v507_v49 = vadd.f32 %v506_v46, %v505_v39  ;;  %v646_v63 = vsel %vm480_vm1, %v589_v52, 0.0 }
  0xff   :  { %v642_v54 = vsel %vm480_vm1, %v587_v47, 0.0 }
 0x100   :  { %v509_v55 = vadd.f32 %v508_v51, %v507_v49  ;;  %v643_v56 = vadd.f32 %v642_v54, %v641_v48 }
 0x101   :  { %v3642_v59 = vpop.f32.mrb[16].mxu0 }
 0x102   :  { %v645_v60 = vadd.f32 %v644_v57, %v643_v56  ;;  %v3644_v61 = vpop.f32.mrb[17].mxu0  ;;  %v511_v62 = vadd.f32 %v510_v58, %v509_v55  ;;  %v592_v8 = vmul.f32 %v3642_v59, %v3642_v59  ;;  %v516_v16 = vsel %vm480_vm1, %v3642_v59, 0.0 }
 0x103   :  { %v512_v0 = vsel %vm480_vm1, %v3644_v61, 0.0  ;;  %v590_v1 = vmul.f32 %v3644_v61, %v3644_v61  ;;  %v3651_v2 = vpop.f32.mrb[18].mxu0 }
 0x104   :  { %v513_v4 = vadd.f32 %v512_v0, %v511_v62  ;;  %v647_v6 = vadd.f32 %v646_v63, %v645_v60  ;;  %v3653_v7 = vpop.f32.mrb[19].mxu0  ;;  %v593_v17 = vmul.f32 %v3651_v2, %v3651_v2  ;;  %v652_v21 = vsel %vm480_vm1, %v592_v8, 0.0 }
 0x105   :  { %v648_v9 = vsel %vm480_vm1, %v590_v1, 0.0  ;;  %v514_v11 = vsel %vm480_vm1, %v3653_v7, 0.0  ;;  %v591_v12 = vmul.f32 %v3653_v7, %v3653_v7  ;;  %v518_v22 = vsel %vm480_vm1, %v3651_v2, 0.0 }
 0x106   :  { %v649_v14 = vadd.f32 %v648_v9, %v647_v6  ;;  %v515_v15 = vadd.f32 %v514_v11, %v513_v4  ;;  %v654_v32 = vsel %vm480_vm1, %v593_v17, 0.0 }
 0x107   :  { %v650_v18 = vsel %vm480_vm1, %v591_v12, 0.0 }
 0x108   :  { %v517_v19 = vadd.f32 %v516_v16, %v515_v15  ;;  %v651_v20 = vadd.f32 %v650_v18, %v649_v14 }
 0x109   :  { %v3670_v23 = vpop.f32.mrb[20].mxu0 }
 0x10a   :  { %v653_v24 = vadd.f32 %v652_v21, %v651_v20  ;;  %v385_v27 = vpop.f32.mrb[21].mxu0  ;;  %v519_v30 = vadd.f32 %v518_v22, %v517_v19  ;;  %v596_v42 = vmul.f32 %v3670_v23, %v3670_v23  ;;  %v524_v51 = vsel %vm480_vm1, %v3670_v23, 0.0 }
 0x10b   :  { %v520_v34 = vsel %vm480_vm1, %v385_v27, 0.0  ;;  %v594_v35 = vmul.f32 %v385_v27, %v385_v27  ;;  %v3674_v36 = vpop.f32.mrb[22].mxu0 }
 0x10c   :  { %v521_v37 = vadd.f32 %v520_v34, %v519_v30  ;;  %v655_v39 = vadd.f32 %v654_v32, %v653_v24  ;;  %v3676_v40 = vpop.f32.mrb[23].mxu0  ;;  %v597_v52 = vmul.f32 %v3674_v36, %v3674_v36  ;;  %v660_v57 = vsel %vm480_vm1, %v596_v42, 0.0 }
 0x10d   :  { %v656_v44 = vsel %vm480_vm1, %v594_v35, 0.0  ;;  %v522_v46 = vsel %vm480_vm1, %v3676_v40, 0.0  ;;  %v595_v47 = vmul.f32 %v3676_v40, %v3676_v40  ;;  %v526_v58 = vsel %vm480_vm1, %v3674_v36, 0.0 }
 0x10e   :  { %v657_v48 = vadd.f32 %v656_v44, %v655_v39  ;;  %v523_v49 = vadd.f32 %v522_v46, %v521_v37  ;;  %v662_v1 = vsel %vm480_vm1, %v597_v52, 0.0 }
 0x10f   :  { %v658_v54 = vsel %vm480_vm1, %v595_v47, 0.0 }
 0x110   :  { %v525_v55 = vadd.f32 %v524_v51, %v523_v49  ;;  %v659_v56 = vadd.f32 %v658_v54, %v657_v48 }
 0x111   :  { %v3693_v60 = vpop.f32.mrb[24].mxu0 }
 0x112   :  { %v661_v62 = vadd.f32 %v660_v57, %v659_v56  ;;  %v3695_v63 = vpop.f32.mrb[25].mxu0  ;;  %v527_v0 = vadd.f32 %v526_v58, %v525_v55  ;;  %v600_v14 = vmul.f32 %v3693_v60, %v3693_v60  ;;  %v532_v20 = vsel %vm480_vm1, %v3693_v60, 0.0 }
 0x113   :  { %v528_v4 = vsel %vm480_vm1, %v3695_v63, 0.0  ;;  %v598_v6 = vmul.f32 %v3695_v63, %v3695_v63  ;;  %v3702_v8 = vpop.f32.mrb[26].mxu0 }
 0x114   :  { %v529_v9 = vadd.f32 %v528_v4, %v527_v0  ;;  %v663_v11 = vadd.f32 %v662_v1, %v661_v62  ;;  %v3704_v12 = vpop.f32.mrb[27].mxu0  ;;  %v601_v21 = vmul.f32 %v3702_v8, %v3702_v8  ;;  %v668_v30 = vsel %vm480_vm1, %v600_v14, 0.0 }
 0x115   :  { %v664_v15 = vsel %vm480_vm1, %v598_v6, 0.0  ;;  %v530_v16 = vsel %vm480_vm1, %v3704_v12, 0.0  ;;  %v599_v17 = vmul.f32 %v3704_v12, %v3704_v12  ;;  %v534_v32 = vsel %vm480_vm1, %v3702_v8, 0.0 }
 0x116   :  { %v665_v18 = vadd.f32 %v664_v15, %v663_v11  ;;  %v531_v19 = vadd.f32 %v530_v16, %v529_v9  ;;  %v670_v42 = vsel %vm480_vm1, %v601_v21, 0.0 }
 0x117   :  { %v666_v22 = vsel %vm480_vm1, %v599_v17, 0.0 }
 0x118   :  { %v533_v24 = vadd.f32 %v532_v20, %v531_v19  ;;  %v667_v27 = vadd.f32 %v666_v22, %v665_v18 }
 0x119   :  { %v3721_v34 = vpop.f32.mrb[28].mxu0 }
 0x11a   :  { %v669_v35 = vadd.f32 %v668_v30, %v667_v27  ;;  %v3723_v37 = vpop.f32.mrb[29].mxu0  ;;  %v535_v39 = vadd.f32 %v534_v32, %v533_v24  ;;  %v604_v52 = vmul.f32 %v3721_v34, %v3721_v34  ;;  %v540_v62 = vsel %vm480_vm1, %v3721_v34, 0.0 }
 0x11b   :  { %v536_v44 = vsel %vm480_vm1, %v3723_v37, 0.0  ;;  %v602_v46 = vmul.f32 %v3723_v37, %v3723_v37  ;;  %v3730_v47 = vpop.f32.mrb[30].mxu0 }
 0x11c   :  { %v537_v48 = vadd.f32 %v536_v44, %v535_v39  ;;  %v671_v49 = vadd.f32 %v670_v42, %v669_v35  ;;  %v3732_v51 = vpop.f32.mrb[31].mxu0  ;;  %v605_v0 = vmul.f32 %v3730_v47, %v3730_v47  ;;  %v676_v9 = vsel %vm480_vm1, %v604_v52, 0.0 }
 0x11d   :  { %v672_v54 = vsel %vm480_vm1, %v602_v46, 0.0  ;;  %v538_v55 = vsel %vm480_vm1, %v3732_v51, 0.0  ;;  %v603_v56 = vmul.f32 %v3732_v51, %v3732_v51  ;;  %v542_v11 = vsel %vm480_vm1, %v3730_v47, 0.0 }
 0x11e   :  { %v673_v57 = vadd.f32 %v672_v54, %v671_v49  ;;  %v539_v58 = vadd.f32 %v538_v55, %v537_v48  ;;  %v678_v18 = vsel %vm480_vm1, %v605_v0, 0.0 }
 0x11f   :  { %v674_v1 = vsel %vm480_vm1, %v603_v56, 0.0 }
 0x120   :  { %v541_v4 = vadd.f32 %v540_v62, %v539_v58  ;;  %v675_v6 = vadd.f32 %v674_v1, %v673_v57 }
 0x121   :  { %v3749_v14 = vpop.f32.mrb[32].mxu0 }
 0x122   :  { %v677_v15 = vadd.f32 %v676_v9, %v675_v6  ;;  %v3751_v16 = vpop.f32.mrb[33].mxu0  ;;  %v543_v17 = vadd.f32 %v542_v11, %v541_v4  ;;  %v608_v30 = vmul.f32 %v3749_v14, %v3749_v14  ;;  %v548_v46 = vsel %vm480_vm1, %v3749_v14, 0.0 }
 0x123   :  { %v544_v19 = vsel %vm480_vm1, %v3751_v16, 0.0  ;;  %v606_v20 = vmul.f32 %v3751_v16, %v3751_v16  ;;  %v3758_v21 = vpop.f32.mrb[34].mxu0 }
 0x124   :  { %v545_v22 = vadd.f32 %v544_v19, %v543_v17  ;;  %v679_v24 = vadd.f32 %v678_v18, %v677_v15  ;;  %v3760_v27 = vpop.f32.mrb[35].mxu0  ;;  %v609_v48 = vmul.f32 %v3758_v21, %v3758_v21  ;;  %v684_v55 = vsel %vm480_vm1, %v608_v30, 0.0 }
 0x125   :  { %v680_v32 = vsel %vm480_vm1, %v606_v20, 0.0  ;;  %v546_v35 = vsel %vm480_vm1, %v3760_v27, 0.0  ;;  %v607_v39 = vmul.f32 %v3760_v27, %v3760_v27  ;;  %v550_v56 = vsel %vm480_vm1, %v3758_v21, 0.0 }
 0x126   :  { %v681_v42 = vadd.f32 %v680_v32, %v679_v24  ;;  %v547_v44 = vadd.f32 %v546_v35, %v545_v22  ;;  %v686_v1 = vsel %vm480_vm1, %v609_v48, 0.0 }
 0x127   :  { %v682_v49 = vsel %vm480_vm1, %v607_v39, 0.0 }
 0x128   :  { %v549_v52 = vadd.f32 %v548_v46, %v547_v44  ;;  %v683_v54 = vadd.f32 %v682_v49, %v681_v42 }
 0x129   :  { %v3777_v57 = vpop.f32.mrb[36].mxu0 }
 0x12a   :  { %v685_v58 = vadd.f32 %v684_v55, %v683_v54  ;;  %v3779_v62 = vpop.f32.mrb[37].mxu0  ;;  %v551_v0 = vadd.f32 %v550_v56, %v549_v52  ;;  %v612_v18 = vmul.f32 %v3777_v57, %v3777_v57  ;;  %v556_v32 = vsel %vm480_vm1, %v3777_v57, 0.0 }
 0x12b   :  { %v552_v4 = vsel %vm480_vm1, %v3779_v62, 0.0  ;;  %v610_v6 = vmul.f32 %v3779_v62, %v3779_v62  ;;  %v3786_v9 = vpop.f32.mrb[38].mxu0 }
 0x12c   :  { %v553_v11 = vadd.f32 %v552_v4, %v551_v0  ;;  %v687_v15 = vadd.f32 %v686_v1, %v685_v58  ;;  %v3788_v17 = vpop.f32.mrb[39].mxu0  ;;  %v613_v35 = vmul.f32 %v3786_v9, %v3786_v9  ;;  %v692_v46 = vsel %vm480_vm1, %v612_v18, 0.0 }
 0x12d   :  { %v688_v19 = vsel %vm480_vm1, %v610_v6, 0.0  ;;  %v554_v20 = vsel %vm480_vm1, %v3788_v17, 0.0  ;;  %v611_v22 = vmul.f32 %v3788_v17, %v3788_v17  ;;  %v558_v48 = vsel %vm480_vm1, %v3786_v9, 0.0 }
 0x12e   :  { %v689_v24 = vadd.f32 %v688_v19, %v687_v15  ;;  %v555_v30 = vadd.f32 %v554_v20, %v553_v11  ;;  %v694_v56 = vsel %vm480_vm1, %v613_v35, 0.0 }
 0x12f   :  { %v690_v39 = vsel %vm480_vm1, %v611_v22, 0.0 }
 0x130   :  { %v557_v42 = vadd.f32 %v556_v32, %v555_v30  ;;  %v691_v44 = vadd.f32 %v690_v39, %v689_v24 }
 0x131   :  { %v3331_v49 = vpop.f32.mrb[40].mxu0 }
 0x132   :  { %v693_v52 = vadd.f32 %v692_v46, %v691_v44  ;;  %v3805_v54 = vpop.f32.mrb[41].mxu0  ;;  %v559_v55 = vadd.f32 %v558_v48, %v557_v42  ;;  %v616_v15 = vmul.f32 %v3331_v49, %v3331_v49  ;;  %v565_v30 = vsel %vm4856_vm2, %v3331_v49, 0.0 }
 0x133   :  { %v560_v58 = vsel %vm480_vm1, %v3805_v54, 0.0  ;;  %v614_v0 = vmul.f32 %v3805_v54, %v3805_v54  ;;  %v3332_v1 = vpop.f32.mrb[42].mxu0 }
 0x134   :  { %v561_v4 = vadd.f32 %v560_v58, %v559_v55  ;;  %v695_v6 = vadd.f32 %v694_v56, %v693_v52  ;;  %v468_v11 = vpop.f32.mrb[43].mxu0  ;;  %v700_v42 = vsel %vm4856_vm2, %v616_v15, 0.0  ;;  %v799_v58 = vlaneseq }
 0x135   :  { %v696_v18 = vsel %vm480_vm1, %v614_v0, 0.0  ;;  %v562_v19 = vsel %vm480_vm1, %v468_v11, 0.0  ;;  %v615_v20 = vmul.f32 %v468_v11, %v468_v11 }
 0x136   :  { %v697_v22 = vadd.f32 %v696_v18, %v695_v6  ;;  %v563_v24 = vadd.f32 %v562_v19, %v561_v4  ;;  %v3817_v4 = vshrl.u32 %v799_v58, 7 }
 0x137   :  { %v698_v32 = vsel %vm480_vm1, %v615_v20, 0.0 }
 0x138   :  { %v566_v35 = vadd.f32 %v565_v30, %v563_v24  ;;  %v699_v39 = vadd.f32 %v698_v32, %v697_v22  ;;  %v3822_v15 = vsub.s32 0, %v3817_v4 }
 0x13a   :  { %v567_v44 = vrot.slane %v566_v35, 4  ;;  %v701_v46 = vadd.f32 %v700_v42, %v699_v39 }
 0x13c   :  { %v568_v48 = vadd.f32 %v567_v44, %v566_v35  ;;  %v702_v52 = vrot.slane %v701_v46, 4 }
 0x13e   :  { %v569_v55 = vrot.slane %v568_v48, 2  ;;  %v703_v56 = vadd.f32 %v702_v52, %v701_v46 }
 0x140   :  { %v570_v0 = vadd.f32 %v569_v55, %v568_v48  ;;  %v704_v1 = vrot.slane %v703_v56, 2 }
 0x142   :  { %v571_v11 = vrot.slane %v570_v0, 1  ;;  %v705_v6 = vadd.f32 %v704_v1, %v703_v56 }
 0x144   :  { %v572_v49 = vadd.f32 %v571_v11, %v570_v0  ;;  %v706_v18 = vrot.slane %v705_v6, 1 }
 0x146   :  { %v3819_v19 = vmul.f32 0.00295858, %v572_v49  ;;  %v707_v20 = vadd.f32 %v706_v18, %v705_v6 }
 0x148   :  { %v708_v22 = vmul.f32 0.00295858, %v707_v20  ;;  %v709_v24 = vmul.f32 %v3819_v19, %v3819_v19  ;;  %v711_v30 = vsub.f32 %v3533_v26, %v3819_v19  ;;  %v712_v32 = vsub.f32 %v3539_v29, %v3819_v19 }
 0x149   :  { %v713_v35 = vsub.f32 %v3531_v25, %v3819_v19  ;;  %v714_v39 = vsub.f32 %v3537_v28, %v3819_v19  ;;  %v715_v42 = vsub.f32 %v3560_v45, %v3819_v19  ;;  %v716_v46 = vsub.f32 %v3569_v53, %v3819_v19 }
 0x14a   :  { %v710_v44 = vsub.f32 %v708_v22, %v709_v24  ;;  %v717_v48 = vsub.f32 %v3558_v43, %v3819_v19  ;;  %v718_v26 = vsub.f32 %v3567_v50, %v3819_v19  ;;  %v719_v29 = vsub.f32 %v3588_v5, %v3819_v19 }
 0x14b   :  { %v720_v25 = vsub.f32 %v3597_v13, %v3819_v19  ;;  %v721_v28 = vsub.f32 %v3586_v3, %v3819_v19  ;;  %v722_v45 = vsub.f32 %v3595_v10, %v3819_v19  ;;  %v723_v53 = vsub.f32 %v3616_v33, %v3819_v19 }
 0x14c   :  { %v754_v52 = vadd.f32 1e-05, %v710_v44  ;;  %v724_v43 = vsub.f32 %v3625_v41, %v3819_v19  ;;  %v725_v50 = vsub.f32 %v3614_v31, %v3819_v19  ;;  %v726_v5 = vsub.f32 %v3623_v38, %v3819_v19 }
 0x14d   :  { %v727_v13 = vsub.f32 %v3644_v61, %v3819_v19  ;;  %v728_v3 = vsub.f32 %v3653_v7, %v3819_v19  ;;  %v729_v10 = vsub.f32 %v3642_v59, %v3819_v19  ;;  %v730_v33 = vsub.f32 %v3651_v2, %v3819_v19 }
 0x14e   :  { %3382 = vrsqrt.f32 %v754_v52  ;;  %v732_v41 = vsub.f32 %v3676_v40, %v3819_v19  ;;  %v733_v31 = vsub.f32 %v3670_v23, %v3819_v19  ;;  %v734_v38 = vsub.f32 %v3674_v36, %v3819_v19 }
 0x14f   :  { %v735_v61 = vsub.f32 %v3695_v63, %v3819_v19  ;;  %v736_v7 = vsub.f32 %v3704_v12, %v3819_v19  ;;  %v737_v59 = vsub.f32 %v3693_v60, %v3819_v19  ;;  %v738_v2 = vsub.f32 %v3702_v8, %v3819_v19 }
 0x150   :  { %v739_v40 = vsub.f32 %v3723_v37, %v3819_v19  ;;  %v740_v23 = vsub.f32 %v3732_v51, %v3819_v19  ;;  %v741_v36 = vsub.f32 %v3721_v34, %v3819_v19  ;;  %v742_v63 = vsub.f32 %v3730_v47, %v3819_v19 }
 0x151   :  { %v743_v12 = vsub.f32 %v3751_v16, %v3819_v19  ;;  %v744_v60 = vsub.f32 %v3760_v27, %v3819_v19  ;;  %v745_v8 = vsub.f32 %v3749_v14, %v3819_v19  ;;  %v746_v37 = vsub.f32 %v3758_v21, %v3819_v19  ;;  %v479_v14 = vld [vmem:[%s4849_s2] sm:$0x3]  ;;  %s3386_s2 = smov 32  }
 0x152   :  { %v747_v51 = vsub.f32 %v3779_v62, %v3819_v19  ;;  %v748_v34 = vsub.f32 %v3788_v17, %v3819_v19  ;;  %v749_v47 = vsub.f32 %v3777_v57, %v3819_v19  ;;  %v750_v16 = vsub.f32 %v3786_v9, %v3819_v19 }
 0x153   :  { %v751_v27 = vsub.f32 %v3805_v54, %v3819_v19  ;;  %v3910_v21 = vsub.s32 1, %v3817_v4  ;;  %v3913_v62 = vrot.slane %v479_v14, %v3822_v15 }
 0x155   :  { %v3916_v55 = vrot.slane %v479_v14, %v3910_v21 }
 0x158   :  { %v3383_v17 = vpop.eup %3382 }
 0x159   :  { %v759_v57 = vmul.f32 %v3383_v17, %v714_v39  ;;  %v760_v56 = vmul.f32 %v3383_v17, %v715_v42  ;;  %v756_v9 = vmul.f32 %v3383_v17, %v711_v30  ;;  %v757_v58 = vmul.f32 %v3383_v17, %v712_v32 }
 0x15a   :  { %v758_v0 = vmul.f32 %v3383_v17, %v713_v35  ;;  %v761_v54 = vmul.f32 %v3383_v17, %v716_v46  ;;  %v762_v1 = vmul.f32 %v3383_v17, %v717_v48  ;;  %v763_v49 = vmul.f32 %v3383_v17, %v718_v26 }
 0x15b   :  { %v806_v11 = vmul.f32 %v3913_v62, %v759_v57  ;;  %v807_v6 = vmul.f32 %v3913_v62, %v760_v56  ;;  %v764_v18 = vmul.f32 %v3383_v17, %v719_v29  ;;  %v765_v19 = vmul.f32 %v3383_v17, %v720_v25 }
 0x15c   :  { %v766_v20 = vmul.f32 %v3383_v17, %v721_v28  ;;  %v767_v22 = vmul.f32 %v3383_v17, %v722_v45  ;;  %v768_v39 = vmul.f32 %v3383_v17, %v723_v53  ;;  %v769_v42 = vmul.f32 %v3383_v17, %v724_v43 }
 0x15d   :  { %v853_v24 = vadd.f32 %v3916_v55, %v806_v11  ;;  %v854_v44 = vadd.f32 %v3916_v55, %v807_v6  ;;  %v770_v30 = vmul.f32 %v3383_v17, %v725_v50  ;;  %v771_v32 = vmul.f32 %v3383_v17, %v726_v5 }
 0x15e   :  { %v772_v35 = vmul.f32 %v3383_v17, %v727_v13  ;;  %v773_v52 = vmul.f32 %v3383_v17, %v728_v3  ;;  %v774_v14 = vmul.f32 %v3383_v17, %v729_v10  ;;  %v775_v26 = vmul.f32 %v3383_v17, %v730_v33 }
 0x15f   :  { %vm896_vm3 = vcmp.gt.f32.partialorder %v853_v24, 0.0  ;;  %vm897_vm4 = vcmp.gt.f32.partialorder %v854_v44, 0.0  ;;  %v939_v46 = vmul.f32 0.2, %v853_v24  ;;  %v940_v48 = vmul.f32 0.2, %v854_v44 }
 0x160   :  { %v777_v29 = vmul.f32 %v3383_v17, %v732_v41  ;;  %v778_v45 = vmul.f32 %v3383_v17, %v733_v31  ;;  %v779_v57 = vmul.f32 %v3383_v17, %v734_v38  ;;  %v780_v53 = vmul.f32 %v3383_v17, %v735_v61 }
 0x161   :  { %v982_v25 = vsel %vm896_vm3, %v853_v24, %v939_v46  ;;  %v983_v28 = vsel %vm897_vm4, %v854_v44, %v940_v48  ;;  %v781_v43 = vmul.f32 %v3383_v17, %v736_v7  ;;  %v782_v50 = vmul.f32 %v3383_v17, %v737_v59 }
 0x162   :  { %1025 = vst.msk [vmem:[#allocation2 + $0x18] sm:$0xff] %vm480_vm1, %v982_v25  ;;  %1026 = vst.msk [vmem:[#allocation2 + $0x20] sm:$0xff] %vm480_vm1, %v983_v28  ;;  %v783_v5 = vmul.f32 %v3383_v17, %v738_v2  ;;  %v784_v13 = vmul.f32 %v3383_v17, %v739_v40  ;;  %v785_v56 = vmul.f32 %v3383_v17, %v740_v23 }
 0x163   :  { %v786_v11 = vmul.f32 %v3383_v17, %v741_v36  ;;  %v787_v6 = vmul.f32 %v3383_v17, %v742_v63  ;;  %v788_v3 = vmul.f32 %v3383_v17, %v743_v12  ;;  %v789_v10 = vmul.f32 %v3383_v17, %v744_v60 }
 0x164   :  { %v790_v33 = vmul.f32 %v3383_v17, %v745_v8  ;;  %v791_v41 = vmul.f32 %v3383_v17, %v746_v37  ;;  %v792_v24 = vmul.f32 %v3383_v17, %v747_v51  ;;  %v793_v44 = vmul.f32 %v3383_v17, %v748_v34 }
 0x165   :  { %v794_v31 = vmul.f32 %v3383_v17, %v749_v47  ;;  %v795_v38 = vmul.f32 %v3383_v17, %v750_v16  ;;  %v796_v46 = vmul.f32 %v3383_v17, %v751_v27  ;;  %v803_v59 = vmul.f32 %v3913_v62, %v756_v9 }
 0x166   :  { %v804_v2 = vmul.f32 %v3913_v62, %v757_v58  ;;  %v805_v40 = vmul.f32 %v3913_v62, %v758_v0  ;;  %v808_v23 = vmul.f32 %v3913_v62, %v761_v54  ;;  %v809_v36 = vmul.f32 %v3913_v62, %v762_v1 }
 0x167   :  { %v810_v63 = vmul.f32 %v3913_v62, %v763_v49  ;;  %v811_v12 = vmul.f32 %v3913_v62, %v764_v18  ;;  %v812_v60 = vmul.f32 %v3913_v62, %v765_v19  ;;  %v813_v8 = vmul.f32 %v3913_v62, %v766_v20 }
 0x168   :  { %v814_v37 = vmul.f32 %v3913_v62, %v767_v22  ;;  %v815_v51 = vmul.f32 %v3913_v62, %v768_v39  ;;  %v816_v34 = vmul.f32 %v3913_v62, %v769_v42  ;;  %v817_v47 = vmul.f32 %v3913_v62, %v770_v30 }
 0x169   :  { %v1135_v48 = vld [vmem:[#allocation2 + $0x1c] ss:$2 sm:$0x1f]  ;;  %v1128_v25 = vld [vmem:[#allocation2 + $0x1b] ss:$2 sm:$0x1f]  ;;  %v818_v16 = vmul.f32 %v3913_v62, %v771_v32  ;;  %v819_v27 = vmul.f32 %v3913_v62, %v772_v35  ;;  %v820_v17 = vmul.f32 %v3913_v62, %v773_v52  ;;  %v821_v9 = vmul.f32 %v3913_v62, %v774_v14 }
 0x16a   :  { %1137 = vrot.lane.b32.xlu1 %v1135_v48, %s3386_s2  ;;  %1130 = vrot.lane.b32.xlu0 %v1128_v25, %s3387_s27  ;;  %v1125_v61 = vld [vmem:[#allocation2 + $0x1a] ss:$2 sm:$0x1f]  ;;  %v1142_v7 = vld [vmem:[#allocation2 + $0x1d] ss:$2 sm:$0x1f]  ;;  %v822_v58 = vmul.f32 %v3913_v62, %v775_v26  ;;  %v824_v0 = vmul.f32 %v3913_v62, %v777_v29  ;;  %v825_v54 = vmul.f32 %v3913_v62, %v778_v45 }
 0x16b   :  { %1126 = vst.msk [vmem:[#allocation3 + $0x8] sm:$0x1f] %vm4855_vm5, %v1125_v61  ;;  %v826_v1 = vmul.f32 %v3913_v62, %v779_v57  ;;  %v827_v49 = vmul.f32 %v3913_v62, %v780_v53  ;;  %v828_v18 = vmul.f32 %v3913_v62, %v781_v43  ;;  %v829_v19 = vmul.f32 %v3913_v62, %v782_v50 }
 0x16c   :  { %v830_v20 = vmul.f32 %v3913_v62, %v783_v5  ;;  %v831_v22 = vmul.f32 %v3913_v62, %v784_v13  ;;  %v832_v39 = vmul.f32 %v3913_v62, %v785_v56  ;;  %v833_v42 = vmul.f32 %v3913_v62, %v786_v11 }
 0x16d   :  { %v834_v30 = vmul.f32 %v3913_v62, %v787_v6  ;;  %v835_v32 = vmul.f32 %v3913_v62, %v788_v3  ;;  %v836_v35 = vmul.f32 %v3913_v62, %v789_v10  ;;  %v850_v52 = vadd.f32 %v3916_v55, %v803_v59 }
 0x16e   :  { %1144 = vrot.lane.b32.xlu1 %v1142_v7, %s3388_s28  ;;  %v837_v14 = vmul.f32 %v3913_v62, %v790_v33  ;;  %v838_v26 = vmul.f32 %v3913_v62, %v791_v41  ;;  %v839_v29 = vmul.f32 %v3913_v62, %v792_v24  ;;  %v851_v28 = vadd.f32 %v3916_v55, %v804_v2 }
 0x16f   :  { %v840_v45 = vmul.f32 %v3913_v62, %v793_v44  ;;  %v841_v57 = vmul.f32 %v3913_v62, %v794_v31  ;;  %v842_v53 = vmul.f32 %v3913_v62, %v795_v38  ;;  %v843_v43 = vmul.f32 %v3913_v62, %v796_v46 }
 0x170   :  { %v3969_v50 = vadd.f32 %v3916_v55, %v805_v40  ;;  %v3972_v5 = vadd.f32 %v3916_v55, %v808_v23  ;;  %v3975_v13 = vadd.f32 %v3916_v55, %v809_v36  ;;  %v3978_v56 = vadd.f32 %v3916_v55, %v810_v63 }
 0x171   :  { %v3981_v11 = vadd.f32 %v3916_v55, %v811_v12  ;;  %v3984_v6 = vadd.f32 %v3916_v55, %v812_v60  ;;  %vm893_vm6 = vcmp.gt.f32.partialorder %v850_v52, 0.0  ;;  %v3987_v62 = vadd.f32 %v3916_v55, %v813_v8 }
 0x172   :  { %vm894_vm7 = vcmp.gt.f32.partialorder %v851_v28, 0.0  ;;  %v936_v3 = vmul.f32 0.2, %v850_v52  ;;  %v937_v10 = vmul.f32 0.2, %v851_v28  ;;  %v3990_v33 = vadd.f32 %v3916_v55, %v814_v37 }
 0x173   :  { %v3993_v41 = vadd.f32 %v3916_v55, %v815_v51  ;;  %v3996_v24 = vadd.f32 %v3916_v55, %v816_v34  ;;  %v3999_v44 = vadd.f32 %v3916_v55, %v817_v47  ;;  %v4002_v31 = vadd.f32 %v3916_v55, %v818_v16 }
 0x174   :  { %v4005_v38 = vadd.f32 %v3916_v55, %v819_v27  ;;  %v979_v46 = vsel %vm893_vm6, %v850_v52, %v936_v3  ;;  %v980_v48 = vsel %vm894_vm7, %v851_v28, %v937_v10  ;;  %v4008_v25 = vadd.f32 %v3916_v55, %v820_v17 }
 0x175   :  { %v4011_v61 = vadd.f32 %v3916_v55, %v821_v9  ;;  %v4014_v7 = vadd.f32 %v3916_v55, %v822_v58  ;;  %1022 = vst.msk [vmem:[#allocation2] sm:$0xff] %vm480_vm1, %v979_v46  ;;  %1023 = vst.msk [vmem:[#allocation2 + $0x8] sm:$0xff] %vm480_vm1, %v980_v48  ;;  %v4019_v59 = vadd.f32 %v3916_v55, %v824_v0  ;;  %vm895_vm8 = vcmp.gt.f32.partialorder %v3969_v50, 0.0 }
 0x176   :  { %v4022_v2 = vadd.f32 %v3916_v55, %v825_v54  ;;  %v4025_v40 = vadd.f32 %v3916_v55, %v826_v1  ;;  %v4028_v23 = vadd.f32 %v3916_v55, %v827_v49  ;;  %v4031_v36 = vadd.f32 %v3916_v55, %v828_v18 }
 0x177   :  { %v4034_v63 = vadd.f32 %v3916_v55, %v829_v19  ;;  %v4037_v12 = vadd.f32 %v3916_v55, %v830_v20  ;;  %v4040_v60 = vadd.f32 %v3916_v55, %v831_v22  ;;  %v4043_v8 = vadd.f32 %v3916_v55, %v832_v39 }
 0x178   :  { %v4046_v37 = vadd.f32 %v3916_v55, %v833_v42  ;;  %v4049_v51 = vadd.f32 %v3916_v55, %v834_v30  ;;  %v4052_v34 = vadd.f32 %v3916_v55, %v835_v32  ;;  %v4055_v47 = vadd.f32 %v3916_v55, %v836_v35 }
 0x179   :  { %v4058_v16 = vadd.f32 %v3916_v55, %v837_v14  ;;  %v4061_v27 = vadd.f32 %v3916_v55, %v838_v26  ;;  %v4064_v17 = vadd.f32 %v3916_v55, %v839_v29  ;;  %v4067_v9 = vadd.f32 %v3916_v55, %v840_v45 }
 0x17a   :  { %v4070_v58 = vadd.f32 %v3916_v55, %v841_v57  ;;  %vm898_vm9 = vcmp.gt.f32.partialorder %v3972_v5, 0.0  ;;  %vm899_vm10 = vcmp.gt.f32.partialorder %v3975_v13, 0.0  ;;  %vm900_vm11 = vcmp.gt.f32.partialorder %v3978_v56, 0.0 }
 0x17b   :  { %vm901_vm12 = vcmp.gt.f32.partialorder %v3981_v11, 0.0  ;;  %vm902_vm13 = vcmp.gt.f32.partialorder %v3984_v6, 0.0  ;;  %v4079_v0 = vadd.f32 %v3916_v55, %v842_v53  ;;  %vm903_vm14 = vcmp.gt.f32.partialorder %v3987_v62, 0.0 }
 0x17c   :  { %v1069_v54 = vld [vmem:[#allocation2 + $0x1] ss:$2 sm:$0x1f]  ;;  %vm904_vm15 = vcmp.gt.f32.partialorder %v3990_v33, 0.0  ;;  %vm905_vm0 = vcmp.gt.f32.partialorder %v3993_v41, 0.0  ;;  %v4085_v1 = vadd.f32 %v3916_v55, %v843_v43  ;;  %vm907_vm4 = vcmp.gt.f32.partialorder %v3999_v44, 0.0 }
 0x17d   :  { %1071 = vrot.lane.b32.xlu0 %v1069_v54, %s3387_s27  ;;  %v938_v49 = vmul.f32 0.2, %v3969_v50  ;;  %v941_v18 = vmul.f32 0.2, %v3972_v5  ;;  %v942_v19 = vmul.f32 0.2, %v3975_v13 }
 0x17e   :  { %v943_v20 = vmul.f32 0.2, %v3978_v56  ;;  %v944_v22 = vmul.f32 0.2, %v3981_v11  ;;  %v945_v55 = vmul.f32 0.2, %v3984_v6 }
 0x17f   :  { %vm911_vm2 = vcmp.gt.f32.partialorder %v4011_v61, 0.0  ;;  %vm912_vm3 = vcmp.gt.f32.partialorder %v4014_v7, 0.0  ;;  %v946_v39 = vmul.f32 0.2, %v3987_v62  ;;  %v947_v42 = vmul.f32 0.2, %v3990_v33 }
 0x180   :  { %v948_v30 = vmul.f32 0.2, %v3993_v41  ;;  %v984_v32 = vsel %vm898_vm9, %v3972_v5, %v941_v18  ;;  %v949_v35 = vmul.f32 0.2, %v3996_v24  ;;  %v950_v52 = vmul.f32 0.2, %v3999_v44 }
 0x181   :  { %v951_v14 = vmul.f32 0.2, %v4002_v31  ;;  %1027 = vst.msk [vmem:[#allocation2 + $0x28] sm:$0xff] %vm480_vm1, %v984_v32  ;;  %v981_v26 = vsel %vm895_vm8, %v3969_v50, %v938_v49  ;;  %vm917_vm9 = vcmp.gt.f32.partialorder %v4028_v23, 0.0  ;;  %v952_v29 = vmul.f32 0.2, %v4005_v38 }
 0x182   :  { %v953_v28 = vmul.f32 0.2, %v4008_v25  ;;  %v954_v45 = vmul.f32 0.2, %v4011_v61  ;;  %v985_v57 = vsel %vm899_vm10, %v3975_v13, %v942_v19  ;;  %1024 = vst.msk [vmem:[#allocation2 + $0x10] sm:$0xff] %vm480_vm1, %v981_v26  ;;  %vm924_vm5 = vcmp.gt.f32.partialorder %v4049_v51, 0.0 }
 0x183   :  { %v955_v53 = vmul.f32 0.2, %v4014_v7  ;;  %v957_v43 = vmul.f32 0.2, %v4019_v59  ;;  %v986_v50 = vsel %vm900_vm11, %v3978_v56, %v943_v20  ;;  %1028 = vst.msk [vmem:[#allocation2 + $0x30] sm:$0xff] %vm480_vm1, %v985_v57  ;;  %vm925_vm10 = vcmp.gt.f32.partialorder %v4052_v34, 0.0 }
 0x184   :  { %v958_v5 = vmul.f32 0.2, %v4022_v2  ;;  %v959_v13 = vmul.f32 0.2, %v4025_v40  ;;  %v960_v3 = vmul.f32 0.2, %v4028_v23  ;;  %v987_v56 = vsel %vm901_vm12, %v3981_v11, %v944_v22 }
 0x185   :  { %1029 = vst.msk [vmem:[#allocation2 + $0x38] sm:$0xff] %vm480_vm1, %v986_v50  ;;  %vm929_vm11 = vcmp.gt.f32.partialorder %v4064_v17, 0.0  ;;  %vm930_vm8 = vcmp.gt.f32.partialorder %v4067_v9, 0.0  ;;  %vm931_vm6 = vcmp.gt.f32.partialorder %v4070_v58, 0.0  ;;  %vm932_vm7 = vcmp.gt.f32.partialorder %v4079_v0, 0.0  ;;  %1030 = vst.msk [vmem:[#allocation2 + $0x40] sm:$0xff] %vm480_vm1, %v987_v56 }
 0x186   :  { %v961_v10 = vmul.f32 0.2, %v4031_v36  ;;  %v962_v46 = vmul.f32 0.2, %v4034_v63  ;;  %v963_v48 = vmul.f32 0.2, %v4037_v12  ;;  %v988_v11 = vsel %vm902_vm13, %v3984_v6, %v945_v55 }
 0x187   :  { %vm933_vm12 = vcmp.gt.f32.partialorder %v4085_v1, 0.0  ;;  %v964_v54 = vmul.f32 0.2, %v4040_v60  ;;  %v965_v49 = vmul.f32 0.2, %v4043_v8  ;;  %v989_v19 = vsel %vm903_vm14, %v3987_v62, %v946_v39  ;;  %1031 = vst.msk [vmem:[#allocation2 + $0x48] sm:$0xff] %vm480_vm1, %v988_v11 }
 0x188   :  { %v966_v18 = vmul.f32 0.2, %v4046_v37  ;;  %v967_v20 = vmul.f32 0.2, %v4049_v51  ;;  %v968_v6 = vmul.f32 0.2, %v4052_v34  ;;  %v990_v55 = vsel %vm904_vm15, %v3990_v33, %v947_v42 }
 0x189   :  { %v969_v22 = vmul.f32 0.2, %v4055_v47  ;;  %1032 = vst.msk [vmem:[#allocation2 + $0x50] sm:$0xff] %vm480_vm1, %v989_v19  ;;  %v970_v32 = vmul.f32 0.2, %v4058_v16  ;;  %v991_v39 = vsel %vm905_vm0, %v3993_v41, %v948_v30  ;;  %1033 = vst.msk [vmem:[#allocation2 + $0x58] sm:$0xff] %vm480_vm1, %v990_v55  ;;  %v993_v41 = vsel %vm907_vm4, %v3999_v44, %v950_v52 }
 0x18a   :  { %v971_v26 = vmul.f32 0.2, %v4061_v27  ;;  %v972_v62 = vmul.f32 0.2, %v4064_v17  ;;  %v973_v57 = vmul.f32 0.2, %v4067_v9  ;;  %v998_v44 = vsel %vm912_vm3, %v4014_v7, %v955_v53 }
 0x18b   :  { %v974_v50 = vmul.f32 0.2, %v4070_v58  ;;  %v975_v33 = vmul.f32 0.2, %v4079_v0  ;;  %vm4866_vm13 = vcmp.gt.f32.partialorder %v3996_v24, 0.0  ;;  %1034 = vst.msk [vmem:[#allocation2 + $0x60] sm:$0xff] %vm480_vm1, %v991_v39  ;;  %v1003_v7 = vsel %vm917_vm9, %v4028_v23, %v960_v3 }
 0x18c   :  { %v992_v42 = vsel %vm4866_vm13, %v3996_v24, %v949_v35  ;;  %v976_v56 = vmul.f32 0.2, %v4085_v1  ;;  %vm4867_vm14 = vcmp.gt.f32.partialorder %v4002_v31, 0.0  ;;  %v1149_v11 = vld [vmem:[#allocation2 + $0x27] ss:$2 sm:$0x1f]  ;;  %v997_v35 = vsel %vm911_vm2, %v4011_v61, %v954_v45 }
 0x18d   :  { %v994_v30 = vsel %vm4867_vm14, %v4002_v31, %v951_v14  ;;  %1035 = vst.msk [vmem:[#allocation2 + $0x68] sm:$0xff] %vm480_vm1, %v992_v42  ;;  %vm4868_vm15 = vcmp.gt.f32.partialorder %v4005_v38, 0.0  ;;  %vm4869_vm0 = vcmp.gt.f32.partialorder %v4008_v25, 0.0  ;;  %1036 = vst.msk [vmem:[#allocation2 + $0x70] sm:$0xff] %vm480_vm1, %v993_v41  ;;  %1151 = vrot.lane.b32.xlu1 %v1149_v11, %s3389_s29  ;;  %vm4870_vm4 = vcmp.gt.f32.partialorder %v4019_v59, 0.0 }
 0x18e   :  { %v995_v19 = vsel %vm4868_vm15, %v4005_v38, %v952_v29  ;;  %v996_v24 = vsel %vm4869_vm0, %v4008_v25, %v953_v28  ;;  %1037 = vst.msk [vmem:[#allocation2 + $0x78] sm:$0xff] %vm480_vm1, %v994_v30  ;;  %v1000_v31 = vsel %vm4870_vm4, %v4019_v59, %v957_v43  ;;  %vm4871_vm13 = vcmp.gt.f32.partialorder %v4022_v2, 0.0  ;;  %v1077_v61 = vld [vmem:[#allocation2 + $0x2] ss:$2 sm:$0x1f]  ;;  %1040 = vst.msk [vmem:[#allocation2 + $0x90] sm:$0xff] %vm480_vm1, %v997_v35 }
 0x18f   :  { %v1001_v38 = vsel %vm4871_vm13, %v4022_v2, %v958_v5  ;;  %vm4872_vm2 = vcmp.gt.f32.partialorder %v4025_v40, 0.0  ;;  %1038 = vst.msk [vmem:[#allocation2 + $0x80] sm:$0xff] %vm480_vm1, %v995_v19  ;;  %1039 = vst.msk [vmem:[#allocation2 + $0x88] sm:$0xff] %vm480_vm1, %v996_v24  ;;  %vm4873_vm3 = vcmp.gt.f32.partialorder %v4031_v36, 0.0  ;;  %vm4874_vm14 = vcmp.gt.f32.partialorder %v4034_v63, 0.0  ;;  %1079 = vrot.lane.b32.xlu0 %v1077_v61, %s3386_s2 }
 0x190   :  { %v1002_v25 = vsel %vm4872_vm2, %v4025_v40, %v959_v13  ;;  %1041 = vst.msk [vmem:[#allocation2 + $0x98] sm:$0xff] %vm480_vm1, %v998_v44  ;;  %v1004_v59 = vsel %vm4873_vm3, %v4031_v36, %v961_v10  ;;  %v1005_v2 = vsel %vm4874_vm14, %v4034_v63, %v962_v46  ;;  %vm4875_vm15 = vcmp.gt.f32.partialorder %v4037_v12, 0.0  ;;  %1043 = vst.msk [vmem:[#allocation2 + $0xa8] sm:$0xff] %vm480_vm1, %v1000_v31  ;;  %v1101_v14 = vld [vmem:[#allocation2 + $0xe] ss:$2 sm:$0x1f] }
 0x191   :  { %v1006_v40 = vsel %vm4875_vm15, %v4037_v12, %v963_v48  ;;  %1044 = vst.msk [vmem:[#allocation2 + $0xb0] sm:$0xff] %vm480_vm1, %v1001_v38  ;;  %1045 = vst.msk [vmem:[#allocation2 + $0xb8] sm:$0xff] %vm480_vm1, %v1002_v25  ;;  %vm4876_vm9 = vcmp.gt.f32.partialorder %v4040_v60, 0.0  ;;  %vm4877_vm0 = vcmp.gt.f32.partialorder %v4043_v8, 0.0  ;;  %vm4878_vm4 = vcmp.gt.f32.partialorder %v4046_v37, 0.0 }
 0x192   :  { %v1007_v23 = vsel %vm4876_vm9, %v4040_v60, %v964_v54  ;;  %v1008_v36 = vsel %vm4877_vm0, %v4043_v8, %v965_v49  ;;  %v1009_v63 = vsel %vm4878_vm4, %v4046_v37, %v966_v18  ;;  %v1010_v12 = vsel %vm924_vm5, %v4049_v51, %v967_v20  ;;  %1046 = vst.msk [vmem:[#allocation2 + $0xc0] sm:$0xff] %vm480_vm1, %v1003_v7  ;;  %v1176_v29 = vld [vmem:[#allocation2 + $0x1a] ss:$2 sm:$0x1f] }
 0x193   :  { %1047 = vst.msk [vmem:[#allocation2 + $0xc8] sm:$0xff] %vm480_vm1, %v1004_v59  ;;  %1048 = vst.msk [vmem:[#allocation2 + $0xd0] sm:$0xff] %vm480_vm1, %v1005_v2  ;;  %v1011_v60 = vsel %vm925_vm10, %v4052_v34, %v968_v6  ;;  %vm4879_vm13 = vcmp.gt.f32.partialorder %v4055_v47, 0.0  ;;  %vm4880_vm2 = vcmp.gt.f32.partialorder %v4058_v16, 0.0  ;;  %vm4881_vm5 = vcmp.gt.f32.partialorder %v4061_v27, 0.0 }
 0x194   :  { %1049 = vst.msk [vmem:[#allocation2 + $0xd8] sm:$0xff] %vm480_vm1, %v1006_v40  ;;  %v1012_v8 = vsel %vm4879_vm13, %v4055_v47, %v969_v22  ;;  %v1013_v37 = vsel %vm4880_vm2, %v4058_v16, %v970_v32  ;;  %v1014_v51 = vsel %vm4881_vm5, %v4061_v27, %v971_v26  ;;  %1050 = vst.msk [vmem:[#allocation2 + $0xe0] sm:$0xff] %vm480_vm1, %v1007_v23  ;;  %v1156_v34 = vld [vmem:[#allocation2 + $0x28] ss:$2 sm:$0x1f]  ;;  %v1178_v53 = vrot.slane %v1176_v29, 3 }
 0x195   :  { %1051 = vst.msk [vmem:[#allocation2 + $0xe8] sm:$0xff] %vm480_vm1, %v1008_v36  ;;  %1052 = vst.msk [vmem:[#allocation2 + $0xf0] sm:$0xff] %vm480_vm1, %v1009_v63  ;;  %v1015_v47 = vsel %vm929_vm11, %v4064_v17, %v972_v62  ;;  %v1016_v16 = vsel %vm930_vm8, %v4067_v9, %v973_v57  ;;  %v1017_v27 = vsel %vm931_vm6, %v4070_v58, %v974_v50  ;;  %1158 = vrot.lane.b32.xlu1 %v1156_v34, %s3390_s30  ;;  %v1085_v17 = vld [vmem:[#allocation2 + $0x3] ss:$2 sm:$0x1f]  ;;  %vm4882_vm6 = vcmask 123904  }
 0x196   :  { %1053 = vst.msk [vmem:[#allocation2 + $0xf8] sm:$0xff] %vm480_vm1, %v1010_v12  ;;  %v1018_v52 = vsel %vm932_vm7, %v4079_v0, %v975_v33  ;;  %1054 = vst.msk [vmem:[#allocation2 + $0x100] sm:$0xff] %vm480_vm1, %v1011_v60  ;;  %v1019_v9 = vsel %vm933_vm12, %v4085_v1, %v976_v56  ;;  %1087 = vrot.lane.b32.xlu0 %v1085_v17, %s3388_s28  ;;  %v1163_v58 = vld [vmem:[#allocation2 + $0x29] ss:$2 sm:$0x1f]  ;;  %vm4883_vm7 = vcmask 126976  }
 0x197   :  { %1055 = vst.msk [vmem:[#allocation2 + $0x108] sm:$0xff] %vm480_vm1, %v1012_v8  ;;  %1056 = vst.msk [vmem:[#allocation2 + $0x110] sm:$0xff] %vm480_vm1, %v1013_v37  ;;  %v1093_v0 = vld [vmem:[#allocation2 + $0xd] ss:$2 sm:$0x1f]  ;;  %vm1327_vm11 = vcmask 129026  }
 0x198   :  { %1057 = vst.msk [vmem:[#allocation2 + $0x118] sm:$0xff] %vm480_vm1, %v1014_v51  ;;  %1058 = vst.msk [vmem:[#allocation2 + $0x120] sm:$0xff] %vm480_vm1, %v1015_v47  ;;  %v1170_v1 = vld [vmem:[#allocation2 + $0x2a] ss:$2 sm:$0x1f]  ;;  %vm1451_vm12 = vcmask 130055  }
 0x199   :  { %1059 = vst.msk [vmem:[#allocation2 + $0x128] sm:$0xff] %vm480_vm1, %v1016_v16  ;;  %1060 = vst.msk [vmem:[#allocation2 + $0x130] sm:$0xff] %vm480_vm1, %v1017_v27  ;;  %1165 = vrot.lane.b32.xlu1 %v1163_v58, %s3391_s8  ;;  %v1109_v45 = vld [vmem:[#allocation2 + $0xf] ss:$2 sm:$0x1f]  ;;  %vm1453_vm3 = vcmask 125952  }
 0x19a   :  { %1061 = vst.msk [vmem:[#allocation2 + $0x138] sm:$0xff] %vm480_vm1, %v1018_v52  ;;  %1062 = vst.msk [vmem:[#allocation2 + $0x140] sm:$0xff] %vm480_vm1, %v1019_v9  ;;  %1095 = vrot.lane.b32.xlu0 %v1093_v0, %s3389_s29  ;;  %vm1180_vm1 = vcmask 130053   ;;  %v1117_v5 = vld [vmem:[#allocation2 + $0x10] ss:$2 sm:$0x1f] }
 0x19b   :  { %1181 = vst.msk [vmem:[#allocation3] sm:$0xe0] %vm1180_vm1, %v1178_v53  ;;  %v1392_v20 = vld [vmem:[#allocation2 + $0x4f] ss:$2 sm:$0x1f]  ;;  %vm4884_vm8 = vmmov %vm4883_vm7  ;;  %vm1074_vm14 = vcmask 258176  }
 0x19c   :  { %1182 = vst.msk [vmem:[#allocation3 + $0x10] sm:$0x3] %vm4882_vm6, %v1178_v53  ;;  %v1065_v22 = vld [vmem:[#allocation2] ss:$2 sm:$0x1f]  ;;  %v1394_v32 = vrot.slane %v1392_v20, 6  ;;  %vm4885_vm10 = vmmov %vm4883_vm7 }
 0x19d   :  { %1172 = vrot.lane.b32.xlu1 %v1170_v1, %s3392_s9  ;;  %v2149_v43 = vld [vmem:[#allocation2 + $0xf8] ss:$2 sm:$0x1f]  ;;  %v2155_v13 = vld [vmem:[#allocation2 + $0xf9] ss:$2 sm:$0x1f]  ;;  %vm4886_vm15 = vmmov %vm4882_vm6 }
 0x19e   :  { %1103 = vrot.lane.b32.xlu0 %v1101_v14, %s3390_s30  ;;  %v2161_v10 = vld [vmem:[#allocation2 + $0xfa] ss:$2 sm:$0x1f]  ;;  %v2167_v48 = vld [vmem:[#allocation2 + $0x104] ss:$2 sm:$0x1f] }
 0x19f   :  { %v2195_v28 = vld [vmem:[#allocation2 + $0x112] ss:$2 sm:$0x1f]  ;;  %v2202_v3 = vld [vmem:[#allocation2 + $0x113] ss:$2 sm:$0x1f] }
 0x1a0   :  { %v2209_v46 = vld [vmem:[#allocation2 + $0x114] ss:$2 sm:$0x1f]  ;;  %v2216_v54 = vld [vmem:[#allocation2 + $0x11e] ss:$2 sm:$0x1f] }
 0x1a1   :  { %2197 = vrot.lane.b32.xlu1 %v2195_v28, %s3387_s27  ;;  %v2173_v49 = vld [vmem:[#allocation2 + $0x105] ss:$2 sm:$0x1f]  ;;  %v2179_v6 = vld [vmem:[#allocation2 + $0x106] ss:$2 sm:$0x1f] }
 0x1a2   :  { %1111 = vrot.lane.b32.xlu0 %v1109_v45, %s3391_s8  ;;  %v2223_v18 = vld [vmem:[#allocation2 + $0x11f] ss:$2 sm:$0x1f]  ;;  %v2230_v55 = vld [vmem:[#allocation2 + $0x120] ss:$2 sm:$0x1f] }
 0x1a3   :  { %1067 = vst.msk [vmem:[#allocation3] sm:$0x1f] %vm4883_vm7, %v1065_v22  ;;  %v1533_v26 = vld [vmem:[#allocation2 + $0x69] ss:$2 sm:$0x1f]  ;;  %vm1082_vm9 = vcmask 389376  }
 0x1a4   :  { %v2237_v62 = vld [vmem:[#allocation2 + $0x121] ss:$2 sm:$0x1f]  ;;  %v1261_v39 = vld [vmem:[#allocation2 + $0x35] ss:$2 sm:$0x1f] }
 0x1a5   :  { %2151 = vrot.lane.b32.xlu1 %v2149_v43, %s3387_s27  ;;  %v1535_v57 = vrot.slane %v1533_v26, 1  ;;  %v1183_v50 = vld [vmem:[#allocation2 + $0x1b] ss:$2 sm:$0x1f]  ;;  %v1263_v33 = vrot.slane %v1261_v39, 3  ;;  %vm1090_vm0 = vcmask 520576  }
 0x1a6   :  { %1119 = vrot.lane.b32.xlu0 %v1117_v5, %s3392_s9  ;;  %v1270_v42 = vld [vmem:[#allocation2 + $0x36] ss:$2 sm:$0x1f]  ;;  %v2192_v56 = vld [vmem:[#allocation2 + $0x111] ss:$2 sm:$0x1f] }
 0x1a7   :  { %v1272_v41 = vrot.slane %v1270_v42, 3  ;;  %v1185_v30 = vrot.slane %v1183_v50, 3  ;;  %2193 = vst.msk [vmem:[#allocation3 + $0x58] sm:$0x1f] %vm4884_vm8, %v2192_v56  ;;  %vm1098_vm4 = vcmask 651776   ;;  %vm1106_vm13 = vcmask 782976  }
 0x1a8   :  { %v1400_v11 = vld [vmem:[#allocation2 + $0x50] ss:$2 sm:$0x1f]  ;;  %v2147_v19 = vld [vmem:[#allocation2 + $0xf7] ss:$2 sm:$0x1f] }
 0x1a9   :  { %2157 = vrot.lane.b32.xlu1 %v2155_v13, %s3386_s2  ;;  %v1329_v24 = vld [vmem:[#allocation2 + $0x35] ss:$2 sm:$0x1f]  ;;  %2148 = vst.msk [vmem:[#allocation3 + $0x50] sm:$0x1f] %vm4885_vm10, %v2147_v19  ;;  %v1402_v35 = vrot.slane %v1400_v11, 6 }
 0x1aa   :  { %2204 = vrot.lane.b32.xlu0 %v2202_v3, %s3386_s2  ;;  %v1331_v44 = vrot.slane %v1329_v24, 6  ;;  %v1542_v31 = vld [vmem:[#allocation2 + $0x6a] ss:$2 sm:$0x1f]  ;;  %v3367_v11 = vld [vmem:[%s4850_s3] sm:$0xff]   ;;  %vm1114_vm2 = vcmask 914176  }
 0x1ab   :  { %v1455_v38 = vld [vmem:[#allocation2 + $0x4f] ss:$2 sm:$0x1f]  ;;  %v1544_v25 = vrot.slane %v1542_v31, 1  ;;  %vm4857_vm5 = vcmask 1045376   ;;  %vm1599_vm6 = vcmask 130052  }
 0x1ac   :  { %v1457_v61 = vrot.slane %v1455_v38, 1  ;;  %v1279_v7 = vld [vmem:[#allocation2 + $0x37] ss:$2 sm:$0x1f]  ;;  %v3368_v38 = vld [vmem:[%s4850_s3 + $0x48] sm:$0xff]   ;;  %vm1601_vm7 = vcmask 122880  }
 0x1ad   :  { %2163 = vrot.lane.b32.xlu1 %v2161_v10, %s3388_s28  ;;  %v1193_v59 = vld [vmem:[#allocation2 + $0x1c] ss:$2 sm:$0x1f]  ;;  %v1281_v2 = vrot.slane %v1279_v7, 3  ;;  %vm1748_vm8 = vcmask 128001   ;;  %vm1879_vm10 = vcmask 130054  }
 0x1ae   :  { %2211 = vrot.lane.b32.xlu0 %v2209_v46, %s3388_s28  ;;  %v1408_v40 = vld [vmem:[#allocation2 + $0x51] ss:$2 sm:$0x1f]  ;;  %v1195_v23 = vrot.slane %v1193_v59, 3 }
 0x1af   :  { %v1386_v36 = vld [vmem:[#allocation2 + $0x4e] ss:$2 sm:$0x1f]  ;;  %v1410_v60 = vrot.slane %v1408_v40, 6 }
 0x1b0   :  { %v1337_v63 = vld [vmem:[#allocation2 + $0x36] ss:$2 sm:$0x1f]  ;;  %v1388_v12 = vrot.slane %v1386_v36, 6 }
 0x1b1   :  { %2169 = vrot.lane.b32.xlu1 %v2167_v48, %s3389_s29  ;;  %v1551_v8 = vld [vmem:[#allocation2 + $0x6b] ss:$2 sm:$0x1f]  ;;  %v1526_v37 = vld [vmem:[#allocation2 + $0x68] ss:$2 sm:$0x1f] }
 0x1b2   :  { %2218 = vrot.lane.b32.xlu0 %v2216_v54, %s3389_s29  ;;  %1390 = vst.msk [vmem:[#allocation3 + $0x18] sm:$0x7c] %vm1327_vm11, %v1388_v12  ;;  %v1339_v51 = vrot.slane %v1337_v63, 6  ;;  %v1528_v34 = vrot.slane %v1526_v37, 1  ;;  %v1553_v52 = vrot.slane %v1551_v8, 1  ;;  %v3370_v40 = vld [vmem:[%s4850_s3 + $0x50] sm:$0xff]  }
 0x1b3   :  { %v1254_v47 = vld [vmem:[#allocation2 + $0x34] ss:$2 sm:$0x1f]  ;;  %v1203_v17 = vld [vmem:[#allocation2 + $0x1d] ss:$2 sm:$0x1f] }
 0x1b4   :  { %v1465_v16 = vld [vmem:[#allocation2 + $0x50] ss:$2 sm:$0x1f]  ;;  %v1256_v27 = vrot.slane %v1254_v47, 3  ;;  %1530 = vst.msk [vmem:[#allocation3 + $0x18] sm:$0x80] %vm1451_vm12, %v1528_v34 }
 0x1b5   :  { %2175 = vrot.lane.b32.xlu1 %v2173_v49, %s3390_s30  ;;  %1531 = vst.msk [vmem:[#allocation3 + $0x28] sm:$0xf] %vm1453_vm3, %v1528_v34  ;;  %v1467_v9 = vrot.slane %v1465_v16, 1  ;;  %v1288_v58 = vld [vmem:[#allocation2 + $0x41] ss:$2 sm:$0x1f] }
 0x1b6   :  { %2225 = vrot.lane.b32.xlu0 %v2223_v18, %s3390_s30  ;;  %1258 = vst.msk [vmem:[#allocation3 + $0x8] sm:$0xe0] %vm1180_vm1, %v1256_v27  ;;  %v1323_v14 = vld [vmem:[#allocation2 + $0x34] ss:$2 sm:$0x1f]  ;;  %v1290_v28 = vrot.slane %v1288_v58, 3 }
 0x1b7   :  { %1259 = vst.msk [vmem:[#allocation3 + $0x18] sm:$0x3] %vm4886_vm15, %v1256_v27  ;;  %v1325_v29 = vrot.slane %v1323_v14, 6  ;;  %v1205_v45 = vrot.slane %v1203_v17, 3  ;;  %v3371_v63 = vld [vmem:[%s4850_s3 + $0x10] sm:$0xff]   ;;  %v3372_v12 = vld [vmem:[%s4850_s3 + $0x58] sm:$0xff]  }
 0x1b8   :  { %v1416_v53 = vld [vmem:[#allocation2 + $0x5b] ss:$2 sm:$0x1f]  ;;  %v1447_v43 = vld [vmem:[#allocation2 + $0x4e] ss:$2 sm:$0x1f] }
 0x1b9   :  { %2181 = vrot.lane.b32.xlu1 %v2179_v6, %s3391_s8  ;;  %1328 = vst.msk [vmem:[#allocation3 + $0x10] sm:$0x7c] %vm1327_vm11, %v1325_v29  ;;  %v1345_v5 = vld [vmem:[#allocation2 + $0x37] ss:$2 sm:$0x1f]  ;;  %v1449_v3 = vrot.slane %v1447_v43, 1 }
 0x1ba   :  { %2232 = vrot.lane.b32.xlu0 %v2230_v55, %s3391_s8  ;;  %v1418_v10 = vrot.slane %v1416_v53, 6  ;;  %v1347_v46 = vrot.slane %v1345_v5, 6  ;;  %v1560_v48 = vld [vmem:[#allocation2 + $0x75] ss:$2 sm:$0x1f]  ;;  %v3374_v27 = vld [vmem:[%s4850_s3 + $0x60] sm:$0xff]  }
 0x1bb   :  { %1452 = vst.msk [vmem:[#allocation3 + $0x10] sm:$0x80] %vm1451_vm12, %v1449_v3  ;;  %v1475_v54 = vld [vmem:[#allocation2 + $0x51] ss:$2 sm:$0x1f]  ;;  %v1562_v49 = vrot.slane %v1560_v48, 1 }
 0x1bc   :  { %1454 = vst.msk [vmem:[#allocation3 + $0x20] sm:$0xf] %vm1453_vm3, %v1449_v3  ;;  %v1477_v18 = vrot.slane %v1475_v54, 1  ;;  %v1297_v20 = vld [vmem:[#allocation2 + $0x42] ss:$2 sm:$0x1f]  ;;  %vm4887_vm3 = vmmov %vm4886_vm15 }
 0x1bd   :  { %1395 = vrot.lane.b32.xlu1 %v1394_v32, %s3387_s27  ;;  %v1213_v6 = vld [vmem:[#allocation2 + $0x27] ss:$2 sm:$0x1f]  ;;  %v1299_v22 = vrot.slane %v1297_v20, 3  ;;  %v3373_v37 = vld [vmem:[%s4850_s3 + $0x18] sm:$0xff]   ;;  %v3378_v5 = vld [vmem:[%s4850_s3 + $0x70] sm:$0xff]  }
 0x1be   :  { %2239 = vrot.lane.b32.xlu0 %v2237_v62, %s3392_s9  ;;  %v1215_v55 = vrot.slane %v1213_v6, 3  ;;  %v1424_v32 = vld [vmem:[#allocation2 + $0x5c] ss:$2 sm:$0x1f]  ;;  %vm1881_vm11 = vcmask 124928   ;;  %v3379_v54 = vld [vmem:[%s4850_s3 + $0x30] sm:$0xff]  }
 0x1bf   :  { %v1353_v26 = vld [vmem:[#allocation2 + $0x41] ss:$2 sm:$0x1f]  ;;  %v1426_v62 = vrot.slane %v1424_v32, 6  ;;  %vm2027_vm12 = vcmask 130051   ;;  %vm1461_vm15 = vcmask 261255  }
 0x1c0   :  { %v1355_v39 = vrot.slane %v1353_v26, 6  ;;  %v1485_v50 = vld [vmem:[#allocation2 + $0x5b] ss:$2 sm:$0x1f] }
 0x1c1   :  { %1536 = vrot.lane.b32.xlu1 %v1535_v57, %s3387_s27  ;;  %v1569_v57 = vld [vmem:[#allocation2 + $0x76] ss:$2 sm:$0x1f]  ;;  %v1487_v42 = vrot.slane %v1485_v50, 1 }
 0x1c2   :  { %1264 = vrot.lane.b32.xlu0 %v1263_v33, %s3387_s27  ;;  %v1571_v33 = vrot.slane %v1569_v57, 1  ;;  %v1306_v56 = vld [vmem:[#allocation2 + $0x43] ss:$2 sm:$0x1f]  ;;  %v3380_v26 = vld [vmem:[%s4850_s3 + $0x78] sm:$0xff]  }
 0x1c3   :  { %v1308_v19 = vrot.slane %v1306_v56, 3  ;;  %v1578_v59 = vld [vmem:[#allocation2 + $0x77] ss:$2 sm:$0x1f] }
 0x1c4   :  { %v1315_v36 = vld [vmem:[#allocation2 + $0x44] ss:$2 sm:$0x1f]  ;;  %v1233_v8 = vld [vmem:[#allocation2 + $0x29] ss:$2 sm:$0x1f] }
 0x1c5   :  { %1273 = vrot.lane.b32.xlu1 %v1272_v41, %s3386_s2  ;;  %v1223_v41 = vld [vmem:[#allocation2 + $0x28] ss:$2 sm:$0x1f]  ;;  %v1440_v34 = vld [vmem:[#allocation2 + $0x5e] ss:$2 sm:$0x1f] }
 0x1c6   :  { %1186 = vrot.lane.b32.xlu0 %v1185_v30, %s3387_s27  ;;  %v3366_v30 = vld [vmem:[%s4850_s3 + $0x40] sm:$0xff]   ;;  %v1225_v24 = vrot.slane %v1223_v41, 3  ;;  %v1235_v16 = vrot.slane %v1233_v8, 3  ;;  %v1442_v17 = vrot.slane %v1440_v34, 6  ;;  %v3381_v50 = vld [vmem:[%s4850_s3 + $0x38] sm:$0xff]  }
 0x1c7   :  { %3243 = vmatprep.subr.bf16.mxu1 %v3366_v30  ;;  %v1369_v47 = vld [vmem:[#allocation2 + $0x43] ss:$2 sm:$0x1f]  ;;  %v1243_v53 = vld [vmem:[#allocation2 + $0x2a] ss:$2 sm:$0x1f] }
 0x1c8   :  { %3244 = vmatpush3.bf16.msra.mxu1 %v3367_v11  ;;  %v1371_v29 = vrot.slane %v1369_v47, 6  ;;  %v1954_v20 = vld [vmem:[#allocation2 + $0xdd] ss:$2 sm:$0x1f] }
 0x1c9   :  { %1403 = vrot.lane.b32.xlu1 %v1402_v35, %s3386_s2  ;;  %v1432_v35 = vld [vmem:[#allocation2 + $0x5d] ss:$2 sm:$0x1f]  ;;  %3245 = vmatprep.subr.bf16.mxu1 %v3368_v38  ;;  %v1956_v32 = vrot.slane %v1954_v20, 2 }
 0x1ca   :  { %1332 = vrot.lane.b32.xlu0 %v1331_v44, %s3387_s27  ;;  %v1361_v44 = vld [vmem:[#allocation2 + $0x42] ss:$2 sm:$0x1f]  ;;  %v1681_v57 = vld [vmem:[#allocation2 + $0x83] ss:$2 sm:$0x1f] }
 0x1cb   :  { %v1363_v7 = vrot.slane %v1361_v44, 6  ;;  %1958 = vst.msk [vmem:[#allocation3 + $0x38] sm:$0xc0] %vm1879_vm10, %v1956_v32  ;;  %v1683_v30 = vrot.slane %v1681_v57, 4 }
 0x1cc   :  { %1959 = vst.msk [vmem:[#allocation3 + $0x48] sm:$0x7] %vm1881_vm11, %v1956_v32  ;;  %v1828_v8 = vld [vmem:[#allocation2 + $0xc5] ss:$2 sm:$0x1f] }
 0x1cd   :  { %1545 = vrot.lane.b32.xlu1 %v1544_v25, %s3386_s2  ;;  %v3369_v25 = vld [vmem:[%s4850_s3 + $0x8] sm:$0xff]   ;;  %v2023_v34 = vld [vmem:[#allocation2 + $0xdd] ss:$2 sm:$0x1f] }
 0x1ce   :  { %1458 = vrot.lane.b32.xlu0 %v1457_v61, %s3387_s27  ;;  %v1434_v61 = vrot.slane %v1432_v35, 6  ;;  %3246 = vmatpush3.bf16.msra.mxu1 %v3369_v25  ;;  %v1961_v35 = vld [vmem:[#allocation2 + $0xde] ss:$2 sm:$0x1f] }
 0x1cf   :  { %3247 = vmatprep.subr.bf16.mxu1 %v3370_v40  ;;  %v1875_v25 = vld [vmem:[#allocation2 + $0xc3] ss:$2 sm:$0x1f]  ;;  %v1690_v40 = vld [vmem:[#allocation2 + $0x84] ss:$2 sm:$0x1f] }
 0x1d0   :  { %v1979_v32 = vld [vmem:[#allocation2 + $0xe0] ss:$2 sm:$0x1f] }
 0x1d1   :  { %1282 = vrot.lane.b32.xlu1 %v1281_v2, %s3388_s28  ;;  %v1495_v2 = vld [vmem:[#allocation2 + $0x5c] ss:$2 sm:$0x1f]  ;;  %v1981_v57 = vrot.slane %v1979_v32, 2 }
 0x1d2   :  { %1196 = vrot.lane.b32.xlu0 %v1195_v23, %s3386_s2  ;;  %v1580_v23 = vrot.slane %v1578_v59, 1  ;;  %3248 = vmatpush3.bf16.msra.mxu1 %v3371_v63  ;;  %v1603_v59 = vld [vmem:[#allocation2 + $0x69] ss:$2 sm:$0x1f] }
 0x1d3   :  { %3249 = vmatprep.subr.bf16.mxu1 %v3372_v12  ;;  %v1692_v12 = vrot.slane %v1690_v40, 4  ;;  %v1633_v40 = vld [vmem:[#allocation2 + $0x75] ss:$2 sm:$0x1f] }
 0x1d5   :  { %1411 = vrot.lane.b32.xlu1 %v1410_v60, %s3388_s28  ;;  %v1497_v60 = vrot.slane %v1495_v2, 1  ;;  %v1877_v2 = vrot.slane %v1875_v25, 2  ;;  %v1988_v25 = vld [vmem:[#allocation2 + $0xea] ss:$2 sm:$0x1f] }
 0x1d6   :  { %1340 = vrot.lane.b32.xlu0 %v1339_v51, %s3386_s2  ;;  %v1317_v51 = vrot.slane %v1315_v36, 3  ;;  %3250 = vmatpush3.bf16.msra.mxu1 %v3373_v37  ;;  %v1605_v36 = vrot.slane %v1603_v59, 4  ;;  %v1883_v37 = vld [vmem:[#allocation2 + $0xc4] ss:$2 sm:$0x1f] }
 0x1d7   :  { %3251 = vmatprep.subr.bf16.mxu1 %v3374_v27  ;;  %1880 = vst.msk [vmem:[#allocation3 + $0x30] sm:$0xc0] %vm1879_vm10, %v1877_v2  ;;  %vm1209_vm10 = vcmask 523653  }
 0x1d8   :  { %1882 = vst.msk [vmem:[#allocation3 + $0x40] sm:$0x7] %vm1881_vm11, %v1877_v2  ;;  %v1990_v2 = vrot.slane %v1988_v25, 2  ;;  %vm1211_vm11 = vcmask 517504  }
 0x1d9   :  { %1554 = vrot.lane.b32.xlu1 %v1553_v52, %s3388_s28  ;;  %v3375_v52 = vld [vmem:[%s4850_s3 + $0x20] sm:$0xff]  }
 0x1da   :  { %1468 = vrot.lane.b32.xlu0 %v1467_v9, %s3386_s2  ;;  %v1587_v9 = vld [vmem:[#allocation2 + $0x78] ss:$2 sm:$0x1f]  ;;  %3252 = vmatpush3.bf16.msra.mxu1 %v3375_v52  ;;  %v2025_v52 = vrot.slane %v2023_v34, 5 }
 0x1db   :  { %v1589_v3 = vrot.slane %v1587_v9, 1 }
 0x1dc   :  { %v1138_v0 = vpop.permute.xlu1 %1137  ;;  %v1131_v1 = vpop.permute.xlu0 %1130  ;;  %2028 = vst.msk [vmem:[#allocation3 + $0x40] sm:$0xf8] %vm2027_vm12, %v2025_v52  ;;  %v1997_v52 = vld [vmem:[#allocation2 + $0xeb] ss:$2 sm:$0x1f] }
 0x1dd   :  { %1133 = vst.msk [vmem:[#allocation3 + $0x8] sm:$0x1f] %vm1074_vm14, %v1131_v1  ;;  %1291 = vrot.lane.b32.xlu1 %v1290_v28, %s3389_s29  ;;  %v3376_v1 = vld [vmem:[%s4850_s3 + $0x68] sm:$0xff]  }
 0x1de   :  { %1140 = vst.msk [vmem:[#allocation3 + $0x8] sm:$0x1f] %vm1082_vm9, %v1138_v0  ;;  %1206 = vrot.lane.b32.xlu0 %v1205_v45, %s3388_s28  ;;  %v1505_v0 = vld [vmem:[#allocation2 + $0x5d] ss:$2 sm:$0x1f]  ;;  %v3377_v28 = vld [vmem:[%s4850_s3 + $0x28] sm:$0xff]   ;;  %3253 = vmatprep.subr.bf16.mxu1 %v3376_v1 }
 0x1df   :  { %v1674_v45 = vld [vmem:[#allocation2 + $0x82] ss:$2 sm:$0x1f]  ;;  %v1507_v48 = vrot.slane %v1505_v0, 1  ;;  %3254 = vmatpush3.bf16.msra.mxu1 %v3377_v28 }
 0x1e0   :  { %v1145_v13 = vpop.permute.xlu1 %1144  ;;  %v1676_v43 = vrot.slane %v1674_v45, 4  ;;  %3255 = vmatprep.subr.bf16.mxu1 %v3378_v5  ;;  %v2243_v1 = vld [vmem:[#allocation2 + $0x111] ss:$2 sm:$0x1f]  ;;  %v1885_v45 = vrot.slane %v1883_v37, 2 }
 0x1e1   :  { %1147 = vst.msk [vmem:[#allocation3 + $0x8] sm:$0x1f] %vm1090_vm0, %v1145_v13  ;;  %1419 = vrot.lane.b32.xlu1 %v1418_v10, %s3389_s29  ;;  %v1377_v10 = vld [vmem:[#allocation2 + $0x44] ss:$2 sm:$0x1f] }
 0x1e2   :  { %1348 = vrot.lane.b32.xlu0 %v1347_v46, %s3388_s28  ;;  %1678 = vst.msk [vmem:[#allocation3 + $0x28] sm:$0xf0] %vm1599_vm6, %v1676_v43  ;;  %v1613_v5 = vld [vmem:[#allocation2 + $0x6a] ss:$2 sm:$0x1f] }
 0x1e3   :  { %1679 = vst.msk [vmem:[#allocation3 + $0x38] sm:$0x1] %vm1601_vm7, %v1676_v43  ;;  %3256 = vmatpush3.bf16.msra.mxu1 %v3379_v54  ;;  %v1760_v54 = vld [vmem:[#allocation2 + $0xab] ss:$2 sm:$0x1f] }
 0x1e4   :  { %3257 = vmatprep.subr.bf16.mxu1 %v3380_v26  ;;  %v1762_v20 = vrot.slane %v1760_v54, 7  ;;  %v1852_v37 = vld [vmem:[#allocation2 + $0xd1] ss:$2 sm:$0x1f] }
 0x1e5   :  { %1563 = vrot.lane.b32.xlu1 %v1562_v49, %s3389_s29  ;;  %v1814_v49 = vld [vmem:[#allocation2 + $0xc3] ss:$2 sm:$0x1f]  ;;  %v2006_v54 = vld [vmem:[#allocation2 + $0xec] ss:$2 sm:$0x1f] }
 0x1e6   :  { %1478 = vrot.lane.b32.xlu0 %v1477_v18, %s3388_s28  ;;  %v1816_v18 = vrot.slane %v1814_v49, 7  ;;  %v1836_v49 = vld [vmem:[#allocation2 + $0xc6] ss:$2 sm:$0x1f] }
 0x1e7   :  { %3258 = vmatpush3.bf16.msra.mxu1 %v3381_v50  ;;  %v1623_v50 = vld [vmem:[#allocation2 + $0x6b] ss:$2 sm:$0x1f] }
 0x1e8   :  { %1818 = vst.msk [vmem:[#allocation3 + $0x38] sm:$0x3e] %vm1748_vm8, %v1816_v18 }
 0x1e9   :  { %1300 = vrot.lane.b32.xlu1 %v1299_v22, %s3390_s30  ;;  %v1245_v22 = vrot.slane %v1243_v53, 3 }
 0x1ea   :  { %1216 = vrot.lane.b32.xlu0 %v1215_v55, %s3389_s29  ;;  %v1515_v55 = vld [vmem:[#allocation2 + $0x5e] ss:$2 sm:$0x1f] }
 0x1eb   :  { %v1517_v41 = vrot.slane %v1515_v55, 1  ;;  %v1893_v55 = vld [vmem:[#allocation2 + $0xc5] ss:$2 sm:$0x1f] }
 0x1ed   :  { %1427 = vrot.lane.b32.xlu1 %v1426_v62, %s3390_s30 }
 0x1ee   :  { %1356 = vrot.lane.b32.xlu0 %v1355_v39, %s3389_s29  ;;  %v1379_v39 = vrot.slane %v1377_v10, 6  ;;  %v1615_v10 = vrot.slane %v1613_v5, 4  ;;  %v1860_v5 = vld [vmem:[#allocation2 + $0xd2] ss:$2 sm:$0x1f] }
 0x1ef   :  { %v1072_v31 = vpop.permute.xlu0 %1071 }
 0x1f0   :  { %1075 = vst.msk [vmem:[#allocation3] sm:$0x1f] %vm1074_vm14, %v1072_v31 }
 0x1f1   :  { %1572 = vrot.lane.b32.xlu1 %v1571_v33, %s3390_s30  ;;  %v1595_v33 = vld [vmem:[#allocation2 + $0x68] ss:$2 sm:$0x1f] }
 0x1f2   :  { %1488 = vrot.lane.b32.xlu0 %v1487_v42, %s3389_s29  ;;  %v1597_v42 = vrot.slane %v1595_v33, 4  ;;  %v1708_v33 = vld [vmem:[#allocation2 + $0x8f] ss:$2 sm:$0x1f] }
 0x1f4   :  { %1600 = vst.msk [vmem:[#allocation3 + $0x20] sm:$0xf0] %vm1599_vm6, %v1597_v42  ;;  %vm1343_vm6 = vcmask 391426  }
 0x1f5   :  { %1309 = vrot.lane.b32.xlu1 %v1308_v19, %s3391_s8  ;;  %v1820_v19 = vld [vmem:[#allocation2 + $0xc4] ss:$2 sm:$0x1f]  ;;  %1602 = vst.msk [vmem:[#allocation3 + $0x30] sm:$0x1] %vm1601_vm7, %v1597_v42  ;;  %vm1471_vm7 = vcmask 392455  }
 0x1f6   :  { %1226 = vrot.lane.b32.xlu0 %v1225_v24, %s3390_s30  ;;  %v1744_v24 = vld [vmem:[#allocation2 + $0xa9] ss:$2 sm:$0x1f]  ;;  %v1822_v38 = vrot.slane %v1820_v19, 7 }
 0x1f7   :  { %v1746_v44 = vrot.slane %v1744_v24, 7  ;;  %v1844_v19 = vld [vmem:[#allocation2 + $0xd0] ss:$2 sm:$0x1f] }
 0x1f9   :  { %1435 = vrot.lane.b32.xlu1 %v1434_v61, %s3391_s8  ;;  %1749 = vst.msk [vmem:[#allocation3 + $0x30] sm:$0x3e] %vm1748_vm8, %v1746_v44  ;;  %vm1473_vm8 = vcmask 388352  }
 0x1fa   :  { %1364 = vrot.lane.b32.xlu0 %v1363_v7, %s3390_s30  ;;  %v1963_v7 = vrot.slane %v1961_v35, 2 }
 0x1fd   :  { %1581 = vrot.lane.b32.xlu1 %v1580_v23, %s3391_s8 }
 0x1fe   :  { %1498 = vrot.lane.b32.xlu0 %v1497_v60, %s3390_s30  ;;  %v1751_v60 = vld [vmem:[#allocation2 + $0xaa] ss:$2 sm:$0x1f] }
 0x1ff   :  { %v1152_v58 = vpop.permute.xlu1 %1151 }
 0x200   :  { %1154 = vst.msk [vmem:[#allocation3 + $0x8] sm:$0x1f] %vm1098_vm4, %v1152_v58  ;;  %v1830_v58 = vrot.slane %v1828_v8, 7  ;;  %v1778_v8 = vld [vmem:[#allocation2 + $0xb6] ss:$2 sm:$0x1f] }
 0x201   :  { %1318 = vrot.lane.b32.xlu1 %v1317_v51, %s3392_s9  ;;  %v1080_v14 = vpop.permute.xlu0 %1079  ;;  %v2086_v51 = vld [vmem:[#allocation2 + $0xf7] ss:$2 sm:$0x1f]  ;;  %v1780_v34 = vrot.slane %v1778_v8, 7 }
 0x202   :  { %1236 = vrot.lane.b32.xlu0 %v1235_v16, %s3391_s8  ;;  %1083 = vst.msk [vmem:[#allocation3] sm:$0x1f] %vm1082_vm9, %v1080_v14  ;;  %v1753_v16 = vrot.slane %v1751_v60, 7  ;;  %v2088_v27 = vrot.slane %v2086_v51, 5 }
 0x203   :  { %v1970_v14 = vld [vmem:[#allocation2 + $0xdf] ss:$2 sm:$0x1f]  ;;  %v2313_v8 = vld [vmem:[#allocation2 + $0x12c] ss:$2 sm:$0x1f] }
 0x204   :  { %2090 = vst.msk [vmem:[#allocation3 + $0x48] sm:$0xf8] %vm2027_vm12, %v2088_v27  ;;  %v1972_v43 = vrot.slane %v1970_v14, 2  ;;  %v1913_v27 = vld [vmem:[#allocation2 + $0xd0] ss:$2 sm:$0x1f] }
 0x205   :  { %1443 = vrot.lane.b32.xlu1 %v1442_v17, %s3392_s9  ;;  %v2306_v17 = vld [vmem:[#allocation2 + $0x12b] ss:$2 sm:$0x1f]  ;;  %vm1351_vm12 = vcmask 522626  }
 0x206   :  { %1372 = vrot.lane.b32.xlu0 %v1371_v29, %s3391_s8  ;;  %v2308_v0 = vrot.slane %v2306_v17, 3  ;;  %v2245_v29 = vrot.slane %v2243_v1, 3  ;;  %v1643_v1 = vld [vmem:[#allocation2 + $0x76] ss:$2 sm:$0x1f] }
 0x207   :  { %v1159_v13 = vpop.permute.xlu1 %1158  ;;  %v1726_v14 = vld [vmem:[#allocation2 + $0x91] ss:$2 sm:$0x1f] }
 0x208   :  { %1161 = vst.msk [vmem:[#allocation3 + $0x8] sm:$0x1f] %vm1106_vm13, %v1159_v13  ;;  %v1088_v46 = vpop.permute.xlu0 %1087  ;;  %v1699_v13 = vld [vmem:[#allocation2 + $0x85] ss:$2 sm:$0x1f] }
 0x209   :  { %1091 = vst.msk [vmem:[#allocation3] sm:$0x1f] %vm1090_vm0, %v1088_v46  ;;  %1590 = vrot.lane.b32.xlu1 %v1589_v3, %s3392_s9 }
 0x20a   :  { %1508 = vrot.lane.b32.xlu0 %v1507_v48, %s3391_s8  ;;  %2310 = vst.msk [vmem:[#allocation3 + $0x58] sm:$0xe0] %vm1180_vm1, %v2308_v0  ;;  %2247 = vst.msk [vmem:[#allocation3 + $0x50] sm:$0xe0] %vm1180_vm1, %v2245_v29  ;;  %v1701_v48 = vrot.slane %v1699_v13, 4  ;;  %vm1335_vm1 = vcmask 260226  }
 0x20b   :  { %v1166_v6 = vpop.permute.xlu1 %1165  ;;  %2311 = vst.msk [vmem:[#allocation3 + $0x68] sm:$0x3] %vm4887_vm3, %v2308_v0  ;;  %v1999_v0 = vrot.slane %v1997_v52, 2 }
 0x20c   :  { %1168 = vst.msk [vmem:[#allocation3 + $0x8] sm:$0x1f] %vm1114_vm2, %v1166_v6  ;;  %v1096_v62 = vpop.permute.xlu0 %1095 }
 0x20d   :  { %1099 = vst.msk [vmem:[#allocation3] sm:$0x1f] %vm1098_vm4, %v1096_v62  ;;  %1246 = vrot.lane.b32.xlu1 %v1245_v22, %s3392_s9  ;;  %v1838_v22 = vrot.slane %v1836_v49, 7  ;;  %v1895_v62 = vrot.slane %v1893_v55, 2 }
 0x20e   :  { %1380 = vrot.lane.b32.xlu0 %v1379_v39, %s3392_s9  ;;  %v1735_v55 = vld [vmem:[#allocation2 + $0x92] ss:$2 sm:$0x1f] }
 0x20f   :  { %v1173_v56 = vpop.permute.xlu1 %1172 }
 0x210   :  { %1175 = vst.msk [vmem:[#allocation3 + $0x8] sm:$0x1f] %vm4857_vm5, %v1173_v56  ;;  %v1104_v11 = vpop.permute.xlu0 %1103  ;;  %v1625_v56 = vrot.slane %v1623_v50, 4  ;;  %v1868_v50 = vld [vmem:[#allocation2 + $0xd3] ss:$2 sm:$0x1f] }
 0x211   :  { %1107 = vst.msk [vmem:[#allocation3] sm:$0x1f] %vm1106_vm13, %v1104_v11  ;;  %1518 = vrot.lane.b32.xlu1 %v1517_v41, %s3392_s9  ;;  %v1769_v11 = vld [vmem:[#allocation2 + $0xac] ss:$2 sm:$0x1f] }
 0x212   :  { %1684 = vrot.lane.b32.xlu0 %v1683_v30, %s3387_s27  ;;  %v1710_v30 = vrot.slane %v1708_v33, 4  ;;  %v1771_v35 = vrot.slane %v1769_v11, 7  ;;  %v2015_v11 = vld [vmem:[#allocation2 + $0xed] ss:$2 sm:$0x1f] }
 0x213   :  { %v2198_v31 = vpop.permute.xlu1 %2197 }
 0x214   :  { %2200 = vst.msk [vmem:[#allocation3 + $0x58] sm:$0x1f] %vm1074_vm14, %v2198_v31  ;;  %v1112_v61 = vpop.permute.xlu0 %1111  ;;  %v1846_v31 = vrot.slane %v1844_v19, 7 }
 0x215   :  { %1115 = vst.msk [vmem:[#allocation3] sm:$0x1f] %vm1114_vm2, %v1112_v61  ;;  %1823 = vrot.lane.b32.xlu1 %v1822_v38, %s3387_s27  ;;  %v1903_v38 = vld [vmem:[#allocation2 + $0xc6] ss:$2 sm:$0x1f] }
 0x216   :  { %1964 = vrot.lane.b32.xlu0 %v1963_v7, %s3387_s27  ;;  %v1905_v7 = vrot.slane %v1903_v38, 2  ;;  %v1805_v38 = vld [vmem:[#allocation2 + $0xb9] ss:$2 sm:$0x1f] }
 0x217   :  { %v2152_v23 = vpop.permute.xlu1 %2151 }
 0x218   :  { %2154 = vst.msk [vmem:[#allocation3 + $0x50] sm:$0x1f] %vm1074_vm14, %v2152_v23  ;;  %v1120_v63 = vpop.permute.xlu0 %1119  ;;  %vm4888_vm14 = vmmov %vm4887_vm3  ;;  %v1717_v23 = vld [vmem:[#allocation2 + $0x90] ss:$2 sm:$0x1f]  ;;  %vm1481_vm3 = vcmask 523655  }
 0x219   :  { %1123 = vst.msk [vmem:[#allocation3] sm:$0x1f] %vm4857_vm5, %v1120_v63  ;;  %1606 = vrot.lane.b32.xlu1 %v1605_v36, %s3387_s27  ;;  %v1635_v63 = vrot.slane %v1633_v40, 4  ;;  %v1719_v60 = vrot.slane %v1717_v23, 4 }
 0x21a   :  { %1693 = vrot.lane.b32.xlu0 %v1692_v12, %s3386_s2  ;;  %2248 = vst.msk [vmem:[#allocation3 + $0x60] sm:$0x3] %vm4888_vm14, %v2245_v29  ;;  %vm1483_vm14 = vcmask 519552   ;;  %v2092_v40 = vld [vmem:[#allocation2 + $0xf8] ss:$2 sm:$0x1f] }
 0x21b   :  { %v2158_v47 = vpop.permute.xlu1 %2157 }
 0x21c   :  { %2160 = vst.msk [vmem:[#allocation3 + $0x50] sm:$0x1f] %vm1082_vm9, %v2158_v47  ;;  %v2205_v9 = vpop.permute.xlu0 %2204 }
 0x21d   :  { %2207 = vst.msk [vmem:[#allocation3 + $0x58] sm:$0x1f] %vm1082_vm9, %v2205_v9  ;;  %1754 = vrot.lane.b32.xlu1 %v1753_v16, %s3387_s27  ;;  %vm1463_vm9 = vcmask 257152   ;;  %v1854_v16 = vrot.slane %v1852_v37, 7  ;;  %v1915_v9 = vrot.slane %v1913_v27, 2 }
 0x21e   :  { %1831 = vrot.lane.b32.xlu0 %v1830_v58, %s3386_s2  ;;  %v2100_v27 = vld [vmem:[#allocation2 + $0xf9] ss:$2 sm:$0x1f] }
 0x21f   :  { %v2164_v28 = vpop.permute.xlu1 %2163 }
 0x220   :  { %2166 = vst.msk [vmem:[#allocation3 + $0x50] sm:$0x1f] %vm1090_vm0, %v2164_v28  ;;  %v2212_v53 = vpop.permute.xlu0 %2211  ;;  %v1645_v28 = vrot.slane %v1643_v1, 4  ;;  %v2322_v1 = vld [vmem:[#allocation2 + $0x12d] ss:$2 sm:$0x1f] }
 0x221   :  { %2214 = vst.msk [vmem:[#allocation3 + $0x58] sm:$0x1f] %vm1090_vm0, %v2212_v53  ;;  %1886 = vrot.lane.b32.xlu1 %v1885_v45, %s3387_s27  ;;  %vm1189_vm0 = vcmask 261253   ;;  %v1728_v53 = vrot.slane %v1726_v14, 4 }
 0x222   :  { %1973 = vrot.lane.b32.xlu0 %v1972_v43, %s3386_s2  ;;  %v1787_v43 = vld [vmem:[#allocation2 + $0xb7] ss:$2 sm:$0x1f] }
 0x223   :  { %v2170_v3 = vpop.permute.xlu1 %2169 }
 0x224   :  { %2172 = vst.msk [vmem:[#allocation3 + $0x50] sm:$0x1f] %vm1098_vm4, %v2170_v3  ;;  %v2219_v46 = vpop.permute.xlu0 %2218  ;;  %v1789_v3 = vrot.slane %v1787_v43, 7  ;;  %v2108_v43 = vld [vmem:[#allocation2 + $0xfa] ss:$2 sm:$0x1f] }
 0x225   :  { %2221 = vst.msk [vmem:[#allocation3 + $0x58] sm:$0x1f] %vm1098_vm4, %v2219_v46  ;;  %1616 = vrot.lane.b32.xlu1 %v1615_v10, %s3386_s2  ;;  %vm1191_vm4 = vcmask 255104   ;;  %v1862_v46 = vrot.slane %v1860_v5, 7 }
 0x226   :  { %1702 = vrot.lane.b32.xlu0 %v1701_v48, %s3388_s28  ;;  %v1923_v48 = vld [vmem:[#allocation2 + $0xd1] ss:$2 sm:$0x1f] }
 0x227   :  { %v2176_v18 = vpop.permute.xlu1 %2175 }
 0x228   :  { %2178 = vst.msk [vmem:[#allocation3 + $0x50] sm:$0x1f] %vm1106_vm13, %v2176_v18  ;;  %v2226_v6 = vpop.permute.xlu0 %2225  ;;  %v1925_v18 = vrot.slane %v1923_v48, 2  ;;  %v2331_v48 = vld [vmem:[#allocation2 + $0x12e] ss:$2 sm:$0x1f] }
 0x229   :  { %2228 = vst.msk [vmem:[#allocation3 + $0x58] sm:$0x1f] %vm1106_vm13, %v2226_v6  ;;  %1763 = vrot.lane.b32.xlu1 %v1762_v20, %s3386_s2  ;;  %vm1199_vm13 = vcmask 392453   ;;  %v2008_v6 = vrot.slane %v2006_v54, 2 }
 0x22a   :  { %1839 = vrot.lane.b32.xlu0 %v1838_v22, %s3388_s28  ;;  %v1653_v22 = vld [vmem:[#allocation2 + $0x77] ss:$2 sm:$0x1f] }
 0x22b   :  { %v2182_v26 = vpop.permute.xlu1 %2181 }
 0x22c   :  { %2184 = vst.msk [vmem:[#allocation3 + $0x50] sm:$0x1f] %vm1114_vm2, %v2182_v26  ;;  %v2233_v39 = vpop.permute.xlu0 %2232  ;;  %v1655_v26 = vrot.slane %v1653_v22, 4  ;;  %v2116_v22 = vld [vmem:[#allocation2 + $0x104] ss:$2 sm:$0x1f] }
 0x22d   :  { %2235 = vst.msk [vmem:[#allocation3 + $0x58] sm:$0x1f] %vm1114_vm2, %v2233_v39  ;;  %1896 = vrot.lane.b32.xlu1 %v1895_v62, %s3386_s2  ;;  %vm1201_vm2 = vcmask 386304   ;;  %v1737_v39 = vrot.slane %v1735_v55, 4 }
 0x22e   :  { %1982 = vrot.lane.b32.xlu0 %v1981_v57, %s3388_s28  ;;  %v1796_v57 = vld [vmem:[#allocation2 + $0xb8] ss:$2 sm:$0x1f] }
 0x22f   :  { %v1396_v42 = vpop.permute.xlu1 %1395 }
 0x230   :  { %1398 = vst.msk [vmem:[#allocation3 + $0x18] sm:$0x7c] %vm1335_vm1, %v1396_v42  ;;  %v2240_v41 = vpop.permute.xlu0 %2239  ;;  %v1798_v42 = vrot.slane %v1796_v57, 7  ;;  %v2340_v57 = vld [vmem:[#allocation2 + $0x138] ss:$2 sm:$0x1f] }
 0x231   :  { %2242 = vst.msk [vmem:[#allocation3 + $0x58] sm:$0x1f] %vm4857_vm5, %v2240_v41  ;;  %1626 = vrot.lane.b32.xlu1 %v1625_v56, %s3388_s28  ;;  %v1870_v41 = vrot.slane %v1868_v50, 7  ;;  %vm1503_vm5 = vcmask 781952  }
 0x232   :  { %1711 = vrot.lane.b32.xlu0 %v1710_v30, %s3389_s29  ;;  %v1933_v30 = vld [vmem:[#allocation2 + $0xd2] ss:$2 sm:$0x1f] }
 0x233   :  { %v1537_v24 = vpop.permute.xlu1 %1536 }
 0x234   :  { %1539 = vst.msk [vmem:[#allocation3 + $0x18] sm:$0x80] %vm1461_vm15, %v1537_v24  ;;  %v1265_v44 = vpop.permute.xlu0 %1264 }
 0x235   :  { %1540 = vst.msk [vmem:[#allocation3 + $0x28] sm:$0xf] %vm1463_vm9, %v1537_v24  ;;  %1772 = vrot.lane.b32.xlu1 %v1771_v35, %s3388_s28  ;;  %v1935_v24 = vrot.slane %v1933_v30, 2  ;;  %v2124_v30 = vld [vmem:[#allocation2 + $0x105] ss:$2 sm:$0x1f] }
 0x236   :  { %1267 = vst.msk [vmem:[#allocation3 + $0x8] sm:$0xe0] %vm1189_vm0, %v1265_v44  ;;  %1847 = vrot.lane.b32.xlu0 %v1846_v31, %s3389_s29  ;;  %v1663_v31 = vld [vmem:[#allocation2 + $0x78] ss:$2 sm:$0x1f] }
 0x237   :  { %1268 = vst.msk [vmem:[#allocation3 + $0x18] sm:$0x3] %vm1191_vm4, %v1265_v44  ;;  %v1274_v61 = vpop.permute.xlu1 %1273  ;;  %v2017_v44 = vrot.slane %v2015_v11, 2 }
 0x238   :  { %1276 = vst.msk [vmem:[#allocation3 + $0x8] sm:$0xe0] %vm1199_vm13, %v1274_v61  ;;  %v1187_v59 = vpop.permute.xlu0 %1186 }
 0x239   :  { %1277 = vst.msk [vmem:[#allocation3 + $0x18] sm:$0x3] %vm1201_vm2, %v1274_v61  ;;  %1906 = vrot.lane.b32.xlu1 %v1905_v7, %s3388_s28  ;;  %v1665_v61 = vrot.slane %v1663_v31, 4  ;;  %v2126_v31 = vrot.slane %v2124_v30, 5 }
 0x23a   :  { %1190 = vst.msk [vmem:[#allocation3] sm:$0xe0] %vm1189_vm0, %v1187_v59  ;;  %1991 = vrot.lane.b32.xlu0 %v1990_v2, %s3389_s29  ;;  %v1943_v2 = vld [vmem:[#allocation2 + $0xd3] ss:$2 sm:$0x1f] }
 0x23b   :  { %1192 = vst.msk [vmem:[#allocation3 + $0x10] sm:$0x3] %vm1191_vm4, %v1187_v59  ;;  %v1404_v36 = vpop.permute.xlu1 %1403  ;;  %v1807_v59 = vrot.slane %v1805_v38, 7 }
 0x23c   :  { %1406 = vst.msk [vmem:[#allocation3 + $0x18] sm:$0x7c] %vm1343_vm6, %v1404_v36  ;;  %v1333_v12 = vpop.permute.xlu0 %1332  ;;  %v1945_v36 = vrot.slane %v1943_v2, 2 }
 0x23d   :  { %1336 = vst.msk [vmem:[#allocation3 + $0x10] sm:$0x7c] %vm1335_vm1, %v1333_v12  ;;  %1636 = vrot.lane.b32.xlu1 %v1635_v63, %s3389_s29  ;;  %vm4865_vm1 = vcmask 654853   ;;  %v2094_v12 = vrot.slane %v2092_v40, 5 }
 0x23e   :  { %1720 = vrot.lane.b32.xlu0 %v1719_v60, %s3390_s30  ;;  %v2029_v60 = vld [vmem:[#allocation2 + $0xde] ss:$2 sm:$0x1f] }
 0x23f   :  { %v1546_v51 = vpop.permute.xlu1 %1545 }
 0x240   :  { %1548 = vst.msk [vmem:[#allocation3 + $0x18] sm:$0x80] %vm1471_vm7, %v1546_v51  ;;  %v1459_v47 = vpop.permute.xlu0 %1458 }
 0x241   :  { %1549 = vst.msk [vmem:[#allocation3 + $0x28] sm:$0xf] %vm1473_vm8, %v1546_v51  ;;  %1781 = vrot.lane.b32.xlu1 %v1780_v34, %s3389_s29  ;;  %v2031_v51 = vrot.slane %v2029_v60, 5 }
 0x242   :  { %1462 = vst.msk [vmem:[#allocation3 + $0x10] sm:$0x80] %vm1461_vm15, %v1459_v47  ;;  %1855 = vrot.lane.b32.xlu0 %v1854_v16, %s3390_s30  ;;  %vm4858_vm15 = vcmask 648704   ;;  %v2249_v16 = vld [vmem:[#allocation2 + $0x112] ss:$2 sm:$0x1f] }
 0x243   :  { %1464 = vst.msk [vmem:[#allocation3 + $0x20] sm:$0xf] %vm1463_vm9, %v1459_v47  ;;  %v1283_v17 = vpop.permute.xlu1 %1282  ;;  %vm1359_vm9 = vcmask 653826   ;;  %v2315_v47 = vrot.slane %v2313_v8, 3 }
 0x244   :  { %1285 = vst.msk [vmem:[#allocation3 + $0x8] sm:$0xe0] %vm1209_vm10, %v1283_v17  ;;  %v1197_v58 = vpop.permute.xlu0 %1196 }
 0x245   :  { %1286 = vst.msk [vmem:[#allocation3 + $0x18] sm:$0x3] %vm1211_vm11, %v1283_v17  ;;  %1916 = vrot.lane.b32.xlu1 %v1915_v9, %s3389_s29  ;;  %v2251_v17 = vrot.slane %v2249_v16, 3  ;;  %v2358_v16 = vld [vmem:[#allocation2 + $0x13a] ss:$2 sm:$0x1f] }
 0x246   :  { %1200 = vst.msk [vmem:[#allocation3] sm:$0xe0] %vm1199_vm13, %v1197_v58  ;;  %2000 = vrot.lane.b32.xlu0 %v1999_v0, %s3390_s30  ;;  %v2037_v0 = vld [vmem:[#allocation2 + $0xdf] ss:$2 sm:$0x1f] }
 0x247   :  { %1202 = vst.msk [vmem:[#allocation3 + $0x10] sm:$0x3] %vm1201_vm2, %v1197_v58  ;;  %v1412_v29 = vpop.permute.xlu1 %1411  ;;  %v2102_v58 = vrot.slane %v2100_v27, 5 }
 0x248   :  { %1414 = vst.msk [vmem:[#allocation3 + $0x18] sm:$0x7c] %vm1351_vm12, %v1412_v29  ;;  %v1341_v45 = vpop.permute.xlu0 %1340  ;;  %v2039_v29 = vrot.slane %v2037_v0, 5  ;;  %v2140_v0 = vld [vmem:[#allocation2 + $0x107] ss:$2 sm:$0x1f] }
 0x249   :  { %1344 = vst.msk [vmem:[#allocation3 + $0x10] sm:$0x7c] %vm1343_vm6, %v1341_v45  ;;  %1646 = vrot.lane.b32.xlu1 %v1645_v28, %s3390_s30  ;;  %vm1491_vm6 = vcmask 654855   ;;  %v2324_v45 = vrot.slane %v2322_v1, 3 }
 0x24a   :  { %1729 = vrot.lane.b32.xlu0 %v1728_v53, %s3391_s8  ;;  %v2257_v53 = vld [vmem:[#allocation2 + $0x113] ss:$2 sm:$0x1f] }
 0x24b   :  { %v1555_v13 = vpop.permute.xlu1 %1554 }
 0x24c   :  { %1557 = vst.msk [vmem:[#allocation3 + $0x18] sm:$0x80] %vm1481_vm3, %v1555_v13  ;;  %v1469_v10 = vpop.permute.xlu0 %1468 }
 0x24d   :  { %1558 = vst.msk [vmem:[#allocation3 + $0x28] sm:$0xf] %vm1483_vm14, %v1555_v13  ;;  %1790 = vrot.lane.b32.xlu1 %v1789_v3, %s3390_s30  ;;  %v2259_v13 = vrot.slane %v2257_v53, 3  ;;  %v2367_v53 = vld [vmem:[#allocation2 + $0x13b] ss:$2 sm:$0x1f] }
 0x24e   :  { %1472 = vst.msk [vmem:[#allocation3 + $0x10] sm:$0x80] %vm1471_vm7, %v1469_v10  ;;  %1863 = vrot.lane.b32.xlu0 %v1862_v46, %s3391_s8  ;;  %vm1493_vm7 = vcmask 650752   ;;  %v2045_v46 = vld [vmem:[#allocation2 + $0xe0] ss:$2 sm:$0x1f] }
 0x24f   :  { %1474 = vst.msk [vmem:[#allocation3 + $0x20] sm:$0xf] %vm1473_vm8, %v1469_v10  ;;  %v1292_v49 = vpop.permute.xlu1 %1291  ;;  %vm4859_vm8 = vcmask 786053   ;;  %v2110_v10 = vrot.slane %v2108_v43, 5 }
 0x250   :  { %1294 = vst.msk [vmem:[#allocation3 + $0x8] sm:$0xe0] %vm4865_vm1, %v1292_v49  ;;  %v1207_v20 = vpop.permute.xlu0 %1206 }
 0x251   :  { %1295 = vst.msk [vmem:[#allocation3 + $0x18] sm:$0x3] %vm4858_vm15, %v1292_v49  ;;  %1926 = vrot.lane.b32.xlu1 %v1925_v18, %s3390_s30  ;;  %v2047_v49 = vrot.slane %v2045_v46, 5 }
 0x252   :  { %1210 = vst.msk [vmem:[#allocation3] sm:$0xe0] %vm1209_vm10, %v1207_v20  ;;  %2009 = vrot.lane.b32.xlu0 %v2008_v6, %s3391_s8  ;;  %v2265_v6 = vld [vmem:[#allocation2 + $0x114] ss:$2 sm:$0x1f] }
 0x253   :  { %1212 = vst.msk [vmem:[#allocation3 + $0x10] sm:$0x3] %vm1211_vm11, %v1207_v20  ;;  %v1420_v32 = vpop.permute.xlu1 %1419  ;;  %v2333_v20 = vrot.slane %v2331_v48, 3 }
 0x254   :  { %1422 = vst.msk [vmem:[#allocation3 + $0x18] sm:$0x7c] %vm1359_vm9, %v1420_v32  ;;  %v1349_v62 = vpop.permute.xlu0 %1348  ;;  %v2267_v32 = vrot.slane %v2265_v6, 3 }
 0x255   :  { %1352 = vst.msk [vmem:[#allocation3 + $0x10] sm:$0x7c] %vm1351_vm12, %v1349_v62  ;;  %1656 = vrot.lane.b32.xlu1 %v1655_v26, %s3391_s8  ;;  %vm4860_vm12 = vcmask 779904   ;;  %v2118_v62 = vrot.slane %v2116_v22, 5 }
 0x256   :  { %1738 = vrot.lane.b32.xlu0 %v1737_v39, %s3392_s9  ;;  %v2053_v39 = vld [vmem:[#allocation2 + $0xea] ss:$2 sm:$0x1f] }
 0x257   :  { %v1564_v33 = vpop.permute.xlu1 %1563 }
 0x258   :  { %1566 = vst.msk [vmem:[#allocation3 + $0x18] sm:$0x80] %vm1491_vm6, %v1564_v33  ;;  %v1479_v56 = vpop.permute.xlu0 %1478 }
 0x259   :  { %1567 = vst.msk [vmem:[#allocation3 + $0x28] sm:$0xf] %vm1493_vm7, %v1564_v33  ;;  %1799 = vrot.lane.b32.xlu1 %v1798_v42, %s3391_s8  ;;  %v2055_v33 = vrot.slane %v2053_v39, 5 }
 0x25a   :  { %1482 = vst.msk [vmem:[#allocation3 + $0x10] sm:$0x80] %vm1481_vm3, %v1479_v56  ;;  %1871 = vrot.lane.b32.xlu0 %v1870_v41, %s3392_s9  ;;  %vm1367_vm3 = vcmask 785026   ;;  %v2273_v41 = vld [vmem:[#allocation2 + $0x11e] ss:$2 sm:$0x1f] }
 0x25b   :  { %1484 = vst.msk [vmem:[#allocation3 + $0x20] sm:$0xf] %vm1483_vm14, %v1479_v56  ;;  %v1301_v19 = vpop.permute.xlu1 %1300  ;;  %vm1501_vm14 = vcmask 786055   ;;  %v2342_v56 = vrot.slane %v2340_v57, 3 }
 0x25c   :  { %1303 = vst.msk [vmem:[#allocation3 + $0x8] sm:$0xe0] %vm4859_vm8, %v1301_v19  ;;  %v1217_v35 = vpop.permute.xlu0 %1216 }
 0x25d   :  { %1304 = vst.msk [vmem:[#allocation3 + $0x18] sm:$0x3] %vm4860_vm12, %v1301_v19  ;;  %1936 = vrot.lane.b32.xlu1 %v1935_v24, %s3391_s8  ;;  %v2275_v19 = vrot.slane %v2273_v41, 3 }
 0x25e   :  { %1220 = vst.msk [vmem:[#allocation3] sm:$0xe0] %vm4865_vm1, %v1217_v35  ;;  %2018 = vrot.lane.b32.xlu0 %v2017_v44, %s3392_s9  ;;  %vm1921_vm1 = vcmask 649728  }
 0x25f   :  { %1222 = vst.msk [vmem:[#allocation3 + $0x10] sm:$0x3] %vm4858_vm15, %v1217_v35  ;;  %v1428_v25 = vpop.permute.xlu1 %1427  ;;  %vm4864_vm15 = vcmask 911104  }
 0x260   :  { %1430 = vst.msk [vmem:[#allocation3 + $0x18] sm:$0x7c] %vm1367_vm3, %v1428_v25  ;;  %v1357_v7 = vpop.permute.xlu0 %1356  ;;  %v2061_v25 = vld [vmem:[#allocation2 + $0xeb] ss:$2 sm:$0x1f] }
 0x261   :  { %1360 = vst.msk [vmem:[#allocation3 + $0x10] sm:$0x7c] %vm1359_vm9, %v1357_v7  ;;  %1666 = vrot.lane.b32.xlu1 %v1665_v61, %s3392_s9  ;;  %vm4861_vm9 = vcmask 917253   ;;  %v2349_v61 = vld [vmem:[#allocation2 + $0x139] ss:$2 sm:$0x1f] }
 0x262   :  { %1808 = vrot.lane.b32.xlu0 %v1807_v59, %s3392_s9  ;;  %v2063_v59 = vrot.slane %v2061_v25, 5  ;;  %v2351_v40 = vrot.slane %v2349_v61, 3 }
 0x263   :  { %v1573_v23 = vpop.permute.xlu1 %1572 }
 0x264   :  { %1575 = vst.msk [vmem:[#allocation3 + $0x18] sm:$0x80] %vm1501_vm14, %v1573_v23  ;;  %v1489_v63 = vpop.permute.xlu0 %1488 }
 0x265   :  { %1576 = vst.msk [vmem:[#allocation3 + $0x28] sm:$0xf] %vm1503_vm5, %v1573_v23  ;;  %1946 = vrot.lane.b32.xlu1 %v1945_v36, %s3392_s9  ;;  %v2281_v23 = vld [vmem:[#allocation2 + $0x11f] ss:$2 sm:$0x1f] }
 0x266   :  { %1492 = vst.msk [vmem:[#allocation3 + $0x10] sm:$0x80] %vm1491_vm6, %v1489_v63  ;;  %2095 = vrot.lane.b32.xlu0 %v2094_v12, %s3387_s27  ;;  %vm1375_vm6 = vcmask 916226   ;;  %v2132_v36 = vld [vmem:[#allocation2 + $0x106] ss:$2 sm:$0x1f] }
 0x267   :  { %1494 = vst.msk [vmem:[#allocation3 + $0x20] sm:$0xf] %vm1493_vm7, %v1489_v63  ;;  %v1310_v37 = vpop.permute.xlu1 %1309  ;;  %vm1511_vm7 = vcmask 917255   ;;  %v2283_v12 = vrot.slane %v2281_v23, 3 }
 0x268   :  { %1312 = vst.msk [vmem:[#allocation3 + $0x8] sm:$0xe0] %vm4861_vm9, %v1310_v37  ;;  %v1227_v34 = vpop.permute.xlu0 %1226 }
 0x269   :  { %1313 = vst.msk [vmem:[#allocation3 + $0x18] sm:$0x3] %vm4864_vm15, %v1310_v37  ;;  %2032 = vrot.lane.b32.xlu1 %v2031_v51, %s3387_s27  ;;  %v2134_v51 = vrot.slane %v2132_v36, 5 }
 0x26a   :  { %1230 = vst.msk [vmem:[#allocation3] sm:$0xe0] %vm4859_vm8, %v1227_v34  ;;  %2316 = vrot.lane.b32.xlu0 %v2315_v47, %s3387_s27  ;;  %vm1513_vm8 = vcmask 913152   ;;  %v2069_v47 = vld [vmem:[#allocation2 + $0xec] ss:$2 sm:$0x1f] }
 0x26b   :  { %1232 = vst.msk [vmem:[#allocation3 + $0x10] sm:$0x3] %vm4860_vm12, %v1227_v34  ;;  %v1436_v52 = vpop.permute.xlu1 %1435  ;;  %vm4862_vm12 = vcmask 1042304  }
 0x26c   :  { %1438 = vst.msk [vmem:[#allocation3 + $0x18] sm:$0x7c] %vm1375_vm6, %v1436_v52  ;;  %v1365_v9 = vpop.permute.xlu0 %1364  ;;  %v2071_v52 = vrot.slane %v2069_v47, 5 }
 0x26d   :  { %1368 = vst.msk [vmem:[#allocation3 + $0x10] sm:$0x7c] %vm1367_vm3, %v1365_v9  ;;  %2252 = vrot.lane.b32.xlu1 %v2251_v17, %s3387_s27  ;;  %vm4863_vm3 = vcmask 1048453   ;;  %v2360_v9 = vrot.slane %v2358_v16, 3 }
 0x26e   :  { %2103 = vrot.lane.b32.xlu0 %v2102_v58, %s3386_s2  ;;  %v2289_v58 = vld [vmem:[#allocation2 + $0x120] ss:$2 sm:$0x1f] }
 0x26f   :  { %v1582_v14 = vpop.permute.xlu1 %1581 }
 0x270   :  { %1584 = vst.msk [vmem:[#allocation3 + $0x18] sm:$0x80] %vm1511_vm7, %v1582_v14  ;;  %v1499_v28 = vpop.permute.xlu0 %1498 }
 0x271   :  { %1585 = vst.msk [vmem:[#allocation3 + $0x28] sm:$0xf] %vm1513_vm8, %v1582_v14  ;;  %2040 = vrot.lane.b32.xlu1 %v2039_v29, %s3386_s2  ;;  %v2291_v14 = vrot.slane %v2289_v58, 3 }
 0x272   :  { %1502 = vst.msk [vmem:[#allocation3 + $0x10] sm:$0x80] %vm1501_vm14, %v1499_v28  ;;  %2325 = vrot.lane.b32.xlu0 %v2324_v45, %s3386_s2  ;;  %vm1521_vm14 = vcmask 1048455   ;;  %v2077_v45 = vld [vmem:[#allocation2 + $0xed] ss:$2 sm:$0x1f] }
 0x273   :  { %1504 = vst.msk [vmem:[#allocation3 + $0x20] sm:$0xf] %vm1503_vm5, %v1499_v28  ;;  %v1319_v5 = vpop.permute.xlu1 %1318  ;;  %vm1383_vm5 = vcmask 1047426   ;;  %v2142_v28 = vrot.slane %v2140_v0, 5 }
 0x274   :  { %1321 = vst.msk [vmem:[#allocation3 + $0x8] sm:$0xe0] %vm4863_vm3, %v1319_v5  ;;  %v1237_v3 = vpop.permute.xlu0 %1236 }
 0x275   :  { %1322 = vst.msk [vmem:[#allocation3 + $0x18] sm:$0x3] %vm4862_vm12, %v1319_v5  ;;  %2260 = vrot.lane.b32.xlu1 %v2259_v13, %s3386_s2  ;;  %v2079_v5 = vrot.slane %v2077_v45, 5 }
 0x276   :  { %1240 = vst.msk [vmem:[#allocation3] sm:$0xe0] %vm4861_vm9, %v1237_v3  ;;  %2111 = vrot.lane.b32.xlu0 %v2110_v10, %s3388_s28  ;;  %vm1523_vm9 = vcmask 1044352   ;;  %v2297_v10 = vld [vmem:[#allocation2 + $0x121] ss:$2 sm:$0x1f] }
 0x277   :  { %1242 = vst.msk [vmem:[#allocation3 + $0x10] sm:$0x3] %vm4864_vm15, %v1237_v3  ;;  %v1444_v54 = vpop.permute.xlu1 %1443  ;;  %vm1631_vm15 = vcmask 516480   ;;  %v2369_v3 = vrot.slane %v2367_v53, 3  ;;  %v2299_v48 = vrot.slane %v2297_v10, 3 }
 0x278   :  { %1446 = vst.msk [vmem:[#allocation3 + $0x18] sm:$0x7c] %vm1383_vm5, %v1444_v54  ;;  %v1373_v18 = vpop.permute.xlu0 %1372 }
 0x279   :  { %1376 = vst.msk [vmem:[#allocation3 + $0x10] sm:$0x7c] %vm1375_vm6, %v1373_v18  ;;  %2048 = vrot.lane.b32.xlu1 %v2047_v49, %s3388_s28  ;;  %vm1611_vm6 = vcmask 254080   ;;  %v2185_v49 = vld [vmem:[#allocation2 + $0x107] ss:$2 sm:$0x1f] }
 0x27a   :  { %2334 = vrot.lane.b32.xlu0 %v2333_v20, %s3388_s28 }
 0x27b   :  { %v1591_v55 = vpop.permute.xlu1 %1590  ;;  %v2376_v24 = vld [vmem:[#allocation3 + $0x8] sm:$0xff] }
 0x27c   :  { %1593 = vst.msk [vmem:[#allocation3 + $0x18] sm:$0x80] %vm1521_vm14, %v1591_v55  ;;  %v1509_v26 = vpop.permute.xlu0 %1508 }
 0x27d   :  { %1594 = vst.msk [vmem:[#allocation3 + $0x28] sm:$0xf] %vm1523_vm9, %v1591_v55  ;;  %2268 = vrot.lane.b32.xlu1 %v2267_v32, %s3388_s28 }
 0x27e   :  { %1512 = vst.msk [vmem:[#allocation3 + $0x10] sm:$0x80] %vm1511_vm7, %v1509_v26  ;;  %2119 = vrot.lane.b32.xlu0 %v2118_v62, %s3389_s29  ;;  %vm1757_vm7 = vcmask 259201  }
 0x27f   :  { %1514 = vst.msk [vmem:[#allocation3 + $0x20] sm:$0xf] %vm1513_vm8, %v1509_v26  ;;  %v1247_v50 = vpop.permute.xlu1 %1246  ;;  %vm1609_vm8 = vcmask 261252  }
 0x280   :  { %1250 = vst.msk [vmem:[#allocation3] sm:$0xe0] %vm4863_vm3, %v1247_v50  ;;  %v1381_v42 = vpop.permute.xlu0 %1380  ;;  %vm1766_vm3 = vcmask 390401  }
 0x281   :  { %1252 = vst.msk [vmem:[#allocation3 + $0x10] sm:$0x3] %vm4862_vm12, %v1247_v50  ;;  %2056 = vrot.lane.b32.xlu1 %v2055_v33, %s3389_s29  ;;  %vm1891_vm12 = vcmask 256128  }
 0x282   :  { %1384 = vst.msk [vmem:[#allocation3 + $0x10] sm:$0x7c] %vm1383_vm5, %v1381_v42  ;;  %2343 = vrot.lane.b32.xlu0 %v2342_v56, %s3389_s29  ;;  %vm1889_vm5 = vcmask 261254  }
 0x283   :  { %v1519_v11 = vpop.permute.xlu1 %1518  ;;  %v2378_v35 = vld [vmem:[#allocation3 + $0x18] sm:$0xff] }
 0x284   :  { %1522 = vst.msk [vmem:[#allocation3 + $0x10] sm:$0x80] %vm1521_vm14, %v1519_v11  ;;  %v1685_v44 = vpop.permute.xlu0 %1684  ;;  %v2390_v38 = vpack.c.bf16 %v2378_v35, %v2376_v24  ;;  %vm1621_vm14 = vcmask 385280  }
 0x285   :  { %1524 = vst.msk [vmem:[#allocation3 + $0x20] sm:$0xf] %vm1523_vm9, %v1519_v11  ;;  %2276 = vrot.lane.b32.xlu1 %v2275_v19, %s3389_s29  ;;  %vm1619_vm9 = vcmask 392452  }
 0x286   :  { %1687 = vst.msk [vmem:[#allocation3 + $0x28] sm:$0xf0] %vm1609_vm8, %v1685_v44  ;;  %2127 = vrot.lane.b32.xlu0 %v2126_v31, %s3390_s30  ;;  %2557 = vmatprep.mubr.bf16.mxu1 %v2390_v38 }
 0x287   :  { %1688 = vst.msk [vmem:[#allocation3 + $0x38] sm:$0x1] %vm1611_vm6, %v1685_v44  ;;  %v1824_v7 = vpop.permute.xlu1 %1823  ;;  %v2375_v60 = vld [vmem:[#allocation3] sm:$0xff] }
 0x288   :  { %1826 = vst.msk [vmem:[#allocation3 + $0x38] sm:$0x3e] %vm1757_vm7, %v1824_v7  ;;  %v1965_v2 = vpop.permute.xlu0 %1964 }
 0x289   :  { %1967 = vst.msk [vmem:[#allocation3 + $0x38] sm:$0xc0] %vm1889_vm5, %v1965_v2  ;;  %2064 = vrot.lane.b32.xlu1 %v2063_v59, %s3390_s30 }
 0x28a   :  { %1968 = vst.msk [vmem:[#allocation3 + $0x48] sm:$0x7] %vm1891_vm12, %v1965_v2  ;;  %2352 = vrot.lane.b32.xlu0 %v2351_v40, %s3390_s30 }
 0x28b   :  { %v1607_v63 = vpop.permute.xlu1 %1606  ;;  %v2377_v8 = vld [vmem:[#allocation3 + $0x10] sm:$0xff] }
 0x28c   :  { %1610 = vst.msk [vmem:[#allocation3 + $0x20] sm:$0xf0] %vm1609_vm8, %v1607_v63  ;;  %v1694_v37 = vpop.permute.xlu0 %1693  ;;  %v2389_v34 = vpack.c.bf16 %v2377_v8, %v2375_v60  ;;  %vm1899_vm8 = vcmask 392454  }
 0x28d   :  { %1612 = vst.msk [vmem:[#allocation3 + $0x30] sm:$0x1] %vm1611_vm6, %v1607_v63  ;;  %2284 = vrot.lane.b32.xlu1 %v2283_v12, %s3390_s30  ;;  %vm1901_vm6 = vcmask 387328  }
 0x28e   :  { %1696 = vst.msk [vmem:[#allocation3 + $0x28] sm:$0xf0] %vm1619_vm9, %v1694_v37  ;;  %2135 = vrot.lane.b32.xlu0 %v2134_v51, %s3391_s8  ;;  %2558 = vmatmul.mubr.bf16.vlgmr.msra.gmra.mrb[0].mxu1 %v2389_v34 }
 0x28f   :  { %1697 = vst.msk [vmem:[#allocation3 + $0x38] sm:$0x1] %vm1621_vm14, %v1694_v37  ;;  %v1755_v27 = vpop.permute.xlu1 %1754 }
 0x290   :  { %1758 = vst.msk [vmem:[#allocation3 + $0x30] sm:$0x3e] %vm1757_vm7, %v1755_v27  ;;  %v1832_v17 = vpop.permute.xlu0 %1831  ;;  %vm1629_vm7 = vcmask 523652  }
 0x291   :  { %1834 = vst.msk [vmem:[#allocation3 + $0x38] sm:$0x3e] %vm1766_vm3, %v1832_v17  ;;  %2072 = vrot.lane.b32.xlu1 %v2071_v52, %s3391_s8 }
 0x292   :  { %2361 = vrot.lane.b32.xlu0 %v2360_v9, %s3391_s8 }
 0x293   :  { %v1887_v1 = vpop.permute.xlu1 %1886 }
 0x294   :  { %1890 = vst.msk [vmem:[#allocation3 + $0x30] sm:$0xc0] %vm1889_vm5, %v1887_v1  ;;  %v1974_v29 = vpop.permute.xlu0 %1973  ;;  %vm1909_vm5 = vcmask 523654  }
 0x295   :  { %1892 = vst.msk [vmem:[#allocation3 + $0x40] sm:$0x7] %vm1891_vm12, %v1887_v1  ;;  %2292 = vrot.lane.b32.xlu1 %v2291_v14, %s3391_s8  ;;  %vm1775_vm12 = vcmask 521601  }
 0x296   :  { %1976 = vst.msk [vmem:[#allocation3 + $0x38] sm:$0xc0] %vm1899_vm8, %v1974_v29  ;;  %2143 = vrot.lane.b32.xlu0 %v2142_v28, %s3392_s9 }
 0x297   :  { %1977 = vst.msk [vmem:[#allocation3 + $0x48] sm:$0x7] %vm1901_vm6, %v1974_v29  ;;  %v1617_v43 = vpop.permute.xlu1 %1616 }
 0x298   :  { %1620 = vst.msk [vmem:[#allocation3 + $0x20] sm:$0xf0] %vm1619_vm9, %v1617_v43  ;;  %v1703_v13 = vpop.permute.xlu0 %1702  ;;  %vm1911_vm9 = vcmask 518528  }
 0x299   :  { %1622 = vst.msk [vmem:[#allocation3 + $0x30] sm:$0x1] %vm1621_vm14, %v1617_v43  ;;  %2080 = vrot.lane.b32.xlu1 %v2079_v5, %s3392_s9  ;;  %vm1641_vm14 = vcmask 647680  }
 0x29a   :  { %1705 = vst.msk [vmem:[#allocation3 + $0x28] sm:$0xf0] %vm1629_vm7, %v1703_v13  ;;  %2370 = vrot.lane.b32.xlu0 %v2369_v3, %s3392_s9 }
 0x29b   :  { %1706 = vst.msk [vmem:[#allocation3 + $0x38] sm:$0x1] %vm1631_vm15, %v1703_v13  ;;  %v1764_v46 = vpop.permute.xlu1 %1763 }
 0x29c   :  { %1767 = vst.msk [vmem:[#allocation3 + $0x30] sm:$0x3e] %vm1766_vm3, %v1764_v46  ;;  %v1840_v54 = vpop.permute.xlu0 %1839  ;;  %vm1639_vm3 = vcmask 654852  }
 0x29d   :  { %1842 = vst.msk [vmem:[#allocation3 + $0x38] sm:$0x3e] %vm1775_vm12, %v1840_v54  ;;  %2300 = vrot.lane.b32.xlu1 %v2299_v48, %s3392_s9 }
 0x29e   :  { %2187 = vrot.lane.b32.xlu0 %v2185_v49, %s3392_s9 }
 0x29f   :  { %v1897_v18 = vpop.permute.xlu1 %1896 }
 0x2a0   :  { %1900 = vst.msk [vmem:[#allocation3 + $0x30] sm:$0xc0] %vm1899_vm8, %v1897_v18  ;;  %v1983_v20 = vpop.permute.xlu0 %1982  ;;  %vm1784_vm8 = vcmask 652801  }
 0x2a1   :  { %1902 = vst.msk [vmem:[#allocation3 + $0x40] sm:$0x7] %vm1901_vm6, %v1897_v18  ;;  %vm1919_vm6 = vcmask 654854  }
 0x2a2   :  { %1985 = vst.msk [vmem:[#allocation3 + $0x38] sm:$0xc0] %vm1909_vm5, %v1983_v20 }
 0x2a3   :  { %1986 = vst.msk [vmem:[#allocation3 + $0x48] sm:$0x7] %vm1911_vm9, %v1983_v20  ;;  %v1627_v6 = vpop.permute.xlu1 %1626 }
 0x2a4   :  { %1630 = vst.msk [vmem:[#allocation3 + $0x20] sm:$0xf0] %vm1629_vm7, %v1627_v6  ;;  %v1712_v22 = vpop.permute.xlu0 %1711  ;;  %vm1651_vm7 = vcmask 778880  }
 0x2a5   :  { %1632 = vst.msk [vmem:[#allocation3 + $0x30] sm:$0x1] %vm1631_vm15, %v1627_v6  ;;  %vm1649_vm15 = vcmask 786052  }
 0x2a6   :  { %1714 = vst.msk [vmem:[#allocation3 + $0x28] sm:$0xf0] %vm1639_vm3, %v1712_v22 }
 0x2a7   :  { %1715 = vst.msk [vmem:[#allocation3 + $0x38] sm:$0x1] %vm1641_vm14, %v1712_v22  ;;  %v1773_v55 = vpop.permute.xlu1 %1772 }
 0x2a8   :  { %1776 = vst.msk [vmem:[#allocation3 + $0x30] sm:$0x3e] %vm1775_vm12, %v1773_v55  ;;  %v1848_v32 = vpop.permute.xlu0 %1847  ;;  %vm1793_vm12 = vcmask 784001  }
 0x2a9   :  { %1850 = vst.msk [vmem:[#allocation3 + $0x38] sm:$0x3e] %vm1784_vm8, %v1848_v32 }
 0x2ab   :  { %v1907_v26 = vpop.permute.xlu1 %1906 }
 0x2ac   :  { %1910 = vst.msk [vmem:[#allocation3 + $0x30] sm:$0xc0] %vm1909_vm5, %v1907_v26  ;;  %v1992_v62 = vpop.permute.xlu0 %1991  ;;  %vm1929_vm5 = vcmask 786054  }
 0x2ad   :  { %1912 = vst.msk [vmem:[#allocation3 + $0x40] sm:$0x7] %vm1911_vm9, %v1907_v26  ;;  %vm1931_vm9 = vcmask 780928  }
 0x2ae   :  { %1994 = vst.msk [vmem:[#allocation3 + $0x38] sm:$0xc0] %vm1919_vm6, %v1992_v62 }
 0x2af   :  { %1995 = vst.msk [vmem:[#allocation3 + $0x48] sm:$0x7] %vm1921_vm1, %v1992_v62  ;;  %v1637_v39 = vpop.permute.xlu1 %1636 }
 0x2b0   :  { %1640 = vst.msk [vmem:[#allocation3 + $0x20] sm:$0xf0] %vm1639_vm3, %v1637_v39  ;;  %v1721_v57 = vpop.permute.xlu0 %1720  ;;  %vm1659_vm3 = vcmask 917252  }
 0x2b1   :  { %1642 = vst.msk [vmem:[#allocation3 + $0x30] sm:$0x1] %vm1641_vm14, %v1637_v39  ;;  %vm1661_vm14 = vcmask 910080  }
 0x2b2   :  { %1723 = vst.msk [vmem:[#allocation3 + $0x28] sm:$0xf0] %vm1649_vm15, %v1721_v57 }
 0x2b3   :  { %1724 = vst.msk [vmem:[#allocation3 + $0x38] sm:$0x1] %vm1651_vm7, %v1721_v57  ;;  %v1782_v50 = vpop.permute.xlu1 %1781 }
 0x2b4   :  { %1785 = vst.msk [vmem:[#allocation3 + $0x30] sm:$0x3e] %vm1784_vm8, %v1782_v50  ;;  %v1856_v33 = vpop.permute.xlu0 %1855  ;;  %vm1802_vm8 = vcmask 915201  }
 0x2b5   :  { %1858 = vst.msk [vmem:[#allocation3 + $0x38] sm:$0x3e] %vm1793_vm12, %v1856_v33 }
 0x2b7   :  { %v1917_v42 = vpop.permute.xlu1 %1916 }
 0x2b8   :  { %1920 = vst.msk [vmem:[#allocation3 + $0x30] sm:$0xc0] %vm1919_vm6, %v1917_v42  ;;  %v2001_v56 = vpop.permute.xlu0 %2000  ;;  %vm1941_vm6 = vcmask 912128  }
 0x2b9   :  { %1922 = vst.msk [vmem:[#allocation3 + $0x40] sm:$0x7] %vm1921_vm1, %v1917_v42  ;;  %vm1939_vm1 = vcmask 917254  }
 0x2ba   :  { %2003 = vst.msk [vmem:[#allocation3 + $0x38] sm:$0xc0] %vm1929_vm5, %v2001_v56 }
 0x2bb   :  { %2004 = vst.msk [vmem:[#allocation3 + $0x48] sm:$0x7] %vm1931_vm9, %v2001_v56  ;;  %v1647_v41 = vpop.permute.xlu1 %1646 }
 0x2bc   :  { %1650 = vst.msk [vmem:[#allocation3 + $0x20] sm:$0xf0] %vm1649_vm15, %v1647_v41  ;;  %v1730_v30 = vpop.permute.xlu0 %1729  ;;  %vm1669_vm15 = vcmask 1048452  }
 0x2bd   :  { %1652 = vst.msk [vmem:[#allocation3 + $0x30] sm:$0x1] %vm1651_vm7, %v1647_v41  ;;  %vm1671_vm7 = vcmask 1041280  }
 0x2be   :  { %1732 = vst.msk [vmem:[#allocation3 + $0x28] sm:$0xf0] %vm1659_vm3, %v1730_v30 }
 0x2bf   :  { %1733 = vst.msk [vmem:[#allocation3 + $0x38] sm:$0x1] %vm1661_vm14, %v1730_v30  ;;  %v1791_v11 = vpop.permute.xlu1 %1790 }
 0x2c0   :  { %1794 = vst.msk [vmem:[#allocation3 + $0x30] sm:$0x3e] %vm1793_vm12, %v1791_v11  ;;  %v1864_v19 = vpop.permute.xlu0 %1863  ;;  %vm1811_vm12 = vcmask 1046401  }
 0x2c1   :  { %1866 = vst.msk [vmem:[#allocation3 + $0x38] sm:$0x3e] %vm1802_vm8, %v1864_v19 }
 0x2c3   :  { %v1927_v24 = vpop.permute.xlu1 %1926 }
 0x2c4   :  { %1930 = vst.msk [vmem:[#allocation3 + $0x30] sm:$0xc0] %vm1929_vm5, %v1927_v24  ;;  %v2010_v35 = vpop.permute.xlu0 %2009  ;;  %vm1949_vm5 = vcmask 1048454  }
 0x2c5   :  { %1932 = vst.msk [vmem:[#allocation3 + $0x40] sm:$0x7] %vm1931_vm9, %v1927_v24  ;;  %vm1951_vm9 = vcmask 1043328  }
 0x2c6   :  { %2012 = vst.msk [vmem:[#allocation3 + $0x38] sm:$0xc0] %vm1939_vm1, %v2010_v35 }
 0x2c7   :  { %2013 = vst.msk [vmem:[#allocation3 + $0x48] sm:$0x7] %vm1941_vm6, %v2010_v35  ;;  %v1657_v44 = vpop.permute.xlu1 %1656 }
 0x2c8   :  { %1660 = vst.msk [vmem:[#allocation3 + $0x20] sm:$0xf0] %vm1659_vm3, %v1657_v44  ;;  %v1739_v31 = vpop.permute.xlu0 %1738  ;;  %vm2035_vm3 = vcmask 261251  }
 0x2c9   :  { %1662 = vst.msk [vmem:[#allocation3 + $0x30] sm:$0x1] %vm1661_vm14, %v1657_v44  ;;  %vm2043_vm14 = vcmask 392451  }
 0x2ca   :  { %1741 = vst.msk [vmem:[#allocation3 + $0x28] sm:$0xf0] %vm1669_vm15, %v1739_v31 }
 0x2cb   :  { %1742 = vst.msk [vmem:[#allocation3 + $0x38] sm:$0x1] %vm1671_vm7, %v1739_v31  ;;  %v1800_v38 = vpop.permute.xlu1 %1799 }
 0x2cc   :  { %1803 = vst.msk [vmem:[#allocation3 + $0x30] sm:$0x3e] %vm1802_vm8, %v1800_v38  ;;  %v1872_v25 = vpop.permute.xlu0 %1871  ;;  %vm2051_vm8 = vcmask 523651  }
 0x2cd   :  { %1874 = vst.msk [vmem:[#allocation3 + $0x38] sm:$0x3e] %vm1811_vm12, %v1872_v25 }
 0x2cf   :  { %v1937_v61 = vpop.permute.xlu1 %1936 }
 0x2d0   :  { %1940 = vst.msk [vmem:[#allocation3 + $0x30] sm:$0xc0] %vm1939_vm1, %v1937_v61  ;;  %v2019_v7 = vpop.permute.xlu0 %2018 }
 0x2d1   :  { %1942 = vst.msk [vmem:[#allocation3 + $0x40] sm:$0x7] %vm1941_vm6, %v1937_v61  ;;  %v2380_v36 = vld [vmem:[#allocation3 + $0x28] sm:$0xff] }
 0x2d2   :  { %2021 = vst.msk [vmem:[#allocation3 + $0x38] sm:$0xc0] %vm1949_vm5, %v2019_v7 }
 0x2d3   :  { %2022 = vst.msk [vmem:[#allocation3 + $0x48] sm:$0x7] %vm1951_vm9, %v2019_v7  ;;  %v1667_v59 = vpop.permute.xlu1 %1666 }
 0x2d4   :  { %1670 = vst.msk [vmem:[#allocation3 + $0x20] sm:$0xf0] %vm1669_vm15, %v1667_v59  ;;  %v1809_v2 = vpop.permute.xlu0 %1808  ;;  %vm2075_vm15 = vcmask 917251  }
 0x2d5   :  { %1672 = vst.msk [vmem:[#allocation3 + $0x30] sm:$0x1] %vm1671_vm7, %v1667_v59 }
 0x2d6   :  { %1812 = vst.msk [vmem:[#allocation3 + $0x30] sm:$0x3e] %vm1811_vm12, %v1809_v2 }
 0x2d7   :  { %v1947_v40 = vpop.permute.xlu1 %1946 }
 0x2d8   :  { %1950 = vst.msk [vmem:[#allocation3 + $0x30] sm:$0xc0] %vm1949_vm5, %v1947_v40  ;;  %v2096_v23 = vpop.permute.xlu0 %2095  ;;  %vm4897_vm5 = vcmask 917253  }
 0x2d9   :  { %1952 = vst.msk [vmem:[#allocation3 + $0x40] sm:$0x7] %vm1951_vm9, %v1947_v40  ;;  %v2382_v63 = vld [vmem:[#allocation3 + $0x38] sm:$0xff]  ;;  %vm4898_vm9 = vcmask 911104  }
 0x2da   :  { %2098 = vst.msk [vmem:[#allocation3 + $0x48] sm:$0xf8] %vm2035_vm3, %v2096_v23  ;;  %v2392_v12 = vpack.c.bf16 %v2382_v63, %v2380_v36 }
 0x2db   :  { %v2033_v60 = vpop.permute.xlu1 %2032  ;;  %v2379_v51 = vld [vmem:[#allocation3 + $0x20] sm:$0xff] }
 0x2dc   :  { %2565 = vmatprep.mubr.bf16.mxu1 %v2392_v12  ;;  %2036 = vst.msk [vmem:[#allocation3 + $0x40] sm:$0xf8] %vm2035_vm3, %v2033_v60  ;;  %v2317_v8 = vpop.permute.xlu0 %2316  ;;  %vm2083_vm3 = vcmask 1048451  }
 0x2dd   :  { %2319 = vst.msk [vmem:[#allocation3 + $0x58] sm:$0xe0] %vm1189_vm0, %v2317_v8 }
 0x2de   :  { %2320 = vst.msk [vmem:[#allocation3 + $0x68] sm:$0x3] %vm1191_vm4, %v2317_v8 }
 0x2df   :  { %v2253_v37 = vpop.permute.xlu1 %2252  ;;  %v2381_v34 = vld [vmem:[#allocation3 + $0x30] sm:$0xff] }
 0x2e0   :  { %2255 = vst.msk [vmem:[#allocation3 + $0x50] sm:$0xe0] %vm1189_vm0, %v2253_v37  ;;  %v2104_v47 = vpop.permute.xlu0 %2103  ;;  %v2391_v16 = vpack.c.bf16 %v2381_v34, %v2379_v51  ;;  %vm2059_vm0 = vcmask 654851  }
 0x2e1   :  { %2256 = vst.msk [vmem:[#allocation3 + $0x60] sm:$0x3] %vm1191_vm4, %v2253_v37  ;;  %vm4889_vm4 = vcmask 654853  }
 0x2e2   :  { %2106 = vst.msk [vmem:[#allocation3 + $0x48] sm:$0xf8] %vm2043_vm14, %v2104_v47  ;;  %2566 = vmatmul.mubr.bf16.gmra.mrb[4].mxu1 %v2391_v16  ;;  %vm4891_vm1 = vmmov %vm4889_vm4 }
 0x2e3   :  { %v2041_v27 = vpop.permute.xlu1 %2040 }
 0x2e4   :  { %2044 = vst.msk [vmem:[#allocation3 + $0x40] sm:$0xf8] %vm2043_vm14, %v2041_v27  ;;  %v2326_v52 = vpop.permute.xlu0 %2325  ;;  %vm4899_vm14 = vmmov %vm4897_vm5 }
 0x2e5   :  { %2328 = vst.msk [vmem:[#allocation3 + $0x58] sm:$0xe0] %vm1199_vm13, %v2326_v52 }
 0x2e6   :  { %2329 = vst.msk [vmem:[#allocation3 + $0x68] sm:$0x3] %vm1201_vm2, %v2326_v52 }
 0x2e7   :  { %v2261_v17 = vpop.permute.xlu1 %2260 }
 0x2e8   :  { %2263 = vst.msk [vmem:[#allocation3 + $0x50] sm:$0xe0] %vm1199_vm13, %v2261_v17  ;;  %v2112_v9 = vpop.permute.xlu0 %2111  ;;  %vm4890_vm13 = vcmask 648704  }
 0x2e9   :  { %2264 = vst.msk [vmem:[#allocation3 + $0x60] sm:$0x3] %vm1201_vm2, %v2261_v17  ;;  %vm2067_vm2 = vcmask 786051   ;;  %vm4892_vm6 = vmmov %vm4890_vm13 }
 0x2ea   :  { %2114 = vst.msk [vmem:[#allocation3 + $0x48] sm:$0xf8] %vm2051_vm8, %v2112_v9 }
 0x2eb   :  { %v2049_v58 = vpop.permute.xlu1 %2048 }
 0x2ec   :  { %2052 = vst.msk [vmem:[#allocation3 + $0x40] sm:$0xf8] %vm2051_vm8, %v2049_v58  ;;  %v2335_v0 = vpop.permute.xlu0 %2334  ;;  %vm4900_vm8 = vmmov %vm4898_vm9 }
 0x2ed   :  { %2337 = vst.msk [vmem:[#allocation3 + $0x58] sm:$0xe0] %vm1209_vm10, %v2335_v0 }
 0x2ee   :  { %2338 = vst.msk [vmem:[#allocation3 + $0x68] sm:$0x3] %vm1211_vm11, %v2335_v0 }
 0x2ef   :  { %v2269_v1 = vpop.permute.xlu1 %2268 }
 0x2f0   :  { %2271 = vst.msk [vmem:[#allocation3 + $0x50] sm:$0xe0] %vm1209_vm10, %v2269_v1  ;;  %v2120_v14 = vpop.permute.xlu0 %2119  ;;  %vm4893_vm10 = vcmask 786053  }
 0x2f1   :  { %2272 = vst.msk [vmem:[#allocation3 + $0x60] sm:$0x3] %vm1211_vm11, %v2269_v1  ;;  %vm4894_vm11 = vcmask 779904   ;;  %vm4895_vm7 = vmmov %vm4893_vm10 }
 0x2f2   :  { %2122 = vst.msk [vmem:[#allocation3 + $0x48] sm:$0xf8] %vm2059_vm0, %v2120_v14  ;;  %vm4896_vm12 = vmmov %vm4894_vm11 }
 0x2f3   :  { %v2057_v29 = vpop.permute.xlu1 %2056 }
 0x2f4   :  { %2060 = vst.msk [vmem:[#allocation3 + $0x40] sm:$0xf8] %vm2059_vm0, %v2057_v29  ;;  %v2344_v28 = vpop.permute.xlu0 %2343  ;;  %vm4901_vm0 = vcmask 1048453  }
 0x2f5   :  { %2346 = vst.msk [vmem:[#allocation3 + $0x58] sm:$0xe0] %vm4889_vm4, %v2344_v28  ;;  %vm4902_vm4 = vcmask 1042304  }
 0x2f6   :  { %2347 = vst.msk [vmem:[#allocation3 + $0x68] sm:$0x3] %vm4890_vm13, %v2344_v28  ;;  %vm4903_vm13 = vmmov %vm4901_vm0 }
 0x2f7   :  { %v2277_v45 = vpop.permute.xlu1 %2276 }
 0x2f8   :  { %2279 = vst.msk [vmem:[#allocation3 + $0x50] sm:$0xe0] %vm4891_vm1, %v2277_v45  ;;  %v2128_v53 = vpop.permute.xlu0 %2127  ;;  %vm4905_vm1 = vcmask 1045376  }
 0x2f9   :  { %2280 = vst.msk [vmem:[#allocation3 + $0x60] sm:$0x3] %vm4892_vm6, %v2277_v45  ;;  %vm2590_vm6 = vcmask 261120  }
 0x2fa   :  { %2130 = vst.msk [vmem:[#allocation3 + $0x48] sm:$0xf8] %vm2067_vm2, %v2128_v53 }
 0x2fb   :  { %v2065_v43 = vpop.permute.xlu1 %2064 }
 0x2fc   :  { %2068 = vst.msk [vmem:[#allocation3 + $0x40] sm:$0xf8] %vm2067_vm2, %v2065_v43  ;;  %v2353_v5 = vpop.permute.xlu0 %2352  ;;  %vm4904_vm2 = vmmov %vm4902_vm4 }
 0x2fd   :  { %2355 = vst.msk [vmem:[#allocation3 + $0x58] sm:$0xe0] %vm4893_vm10, %v2353_v5  ;;  %vm2602_vm10 = vcmask 254976  }
 0x2fe   :  { %2356 = vst.msk [vmem:[#allocation3 + $0x68] sm:$0x3] %vm4894_vm11, %v2353_v5 }
 0x2ff   :  { %v2285_v13 = vpop.permute.xlu1 %2284 }
 0x300   :  { %2287 = vst.msk [vmem:[#allocation3 + $0x50] sm:$0xe0] %vm4895_vm7, %v2285_v13  ;;  %v2136_v3 = vpop.permute.xlu0 %2135 }
 0x301   :  { %2288 = vst.msk [vmem:[#allocation3 + $0x60] sm:$0x3] %vm4896_vm12, %v2285_v13 }
 0x302   :  { %2138 = vst.msk [vmem:[#allocation3 + $0x48] sm:$0xf8] %vm2075_vm15, %v2136_v3 }
 0x303   :  { %v2073_v10 = vpop.permute.xlu1 %2072 }
 0x304   :  { %2076 = vst.msk [vmem:[#allocation3 + $0x40] sm:$0xf8] %vm2075_vm15, %v2073_v10  ;;  %v2362_v46 = vpop.permute.xlu0 %2361 }
 0x305   :  { %2364 = vst.msk [vmem:[#allocation3 + $0x58] sm:$0xe0] %vm4897_vm5, %v2362_v46 }
 0x306   :  { %2365 = vst.msk [vmem:[#allocation3 + $0x68] sm:$0x3] %vm4898_vm9, %v2362_v46 }
 0x307   :  { %v2293_v48 = vpop.permute.xlu1 %2292 }
 0x308   :  { %2295 = vst.msk [vmem:[#allocation3 + $0x50] sm:$0xe0] %vm4899_vm14, %v2293_v48  ;;  %v2144_v54 = vpop.permute.xlu0 %2143  ;;  %vm2723_vm14 = vcmask 516352  }
 0x309   :  { %2296 = vst.msk [vmem:[#allocation3 + $0x60] sm:$0x3] %vm4900_vm8, %v2293_v48  ;;  %vm2738_vm8 = vcmask 778752  }
 0x30a   :  { %2146 = vst.msk [vmem:[#allocation3 + $0x48] sm:$0xf8] %vm2083_vm3, %v2144_v54 }
 0x30b   :  { %v2081_v49 = vpop.permute.xlu1 %2080 }
 0x30c   :  { %2084 = vst.msk [vmem:[#allocation3 + $0x40] sm:$0xf8] %vm2083_vm3, %v2081_v49  ;;  %v2371_v18 = vpop.permute.xlu0 %2370  ;;  %vm2708_vm3 = vcmask 253952  }
 0x30d   :  { %2373 = vst.msk [vmem:[#allocation3 + $0x58] sm:$0xe0] %vm4901_vm0, %v2371_v18  ;;  %vm2753_vm0 = vcmask 1041152  }
 0x30e   :  { %2374 = vst.msk [vmem:[#allocation3 + $0x68] sm:$0x3] %vm4902_vm4, %v2371_v18  ;;  %vm3130_vm4 = vcmask 1041408  }
 0x30f   :  { %v2301_v20 = vpop.permute.xlu1 %2300 }
 0x310   :  { %2303 = vst.msk [vmem:[#allocation3 + $0x50] sm:$0xe0] %vm4903_vm13, %v2301_v20  ;;  %v2188_v6 = vpop.permute.xlu0 %2187  ;;  %vm3148_vm13 = vcmask 1024  }
 0x311   :  { %2304 = vst.msk [vmem:[#allocation3 + $0x60] sm:$0x3] %vm4904_vm2, %v2301_v20  ;;  %v2384_v22 = vld [vmem:[#allocation3 + $0x48] sm:$0xff] }
 0x312   :  { %2190 = vst.msk [vmem:[#allocation3 + $0x50] sm:$0x1f] %vm4905_vm1, %v2188_v6 }
 0x313   :  { %v2383_v62 = vld [vmem:[#allocation3 + $0x40] sm:$0xff] }
 0x314   :  { %v2386_v55 = vld [vmem:[#allocation3 + $0x58] sm:$0xff] }
 0x315   :  { %v2394_v32 = vpack.c.bf16 %v2386_v55, %v2384_v22  ;;  %v2388_v26 = vld [vmem:[#allocation3 + $0x68] sm:$0x3] }
 0x316   :  { %v2396_v50 = vpack.c.bf16 %v2388_v26, %v2388_v26 }
 0x317   :  { %2573 = vmatprep.mubr.bf16.mxu1 %v2394_v32 }
 0x318   :  { %v2387_v33 = vld [vmem:[#allocation3 + $0x60] sm:$0x3] }
 0x319   :  { %v2385_v39 = vld [vmem:[#allocation3 + $0x50] sm:$0xff]  ;;  %v2395_v42 = vpack.c.bf16 %v2387_v33, %v2387_v33 }
 0x31a   :  { %v2393_v57 = vpack.c.bf16 %v2385_v39, %v2383_v62 }
 0x31c   :  { %2574 = vmatmul.mubr.bf16.gmra.mrb[8].mxu1 %v2393_v57 }
 0x31d   :  { %2581 = vmatprep.mubr.bf16.mxu1 %v2396_v50 }
 0x324   :  { %2582 = vmatmul.mubr.bf16.gmra.mrb[12].mxu1 %v2395_v42 }
 0x361   :  { %v3259_v56 = vpop.f32.mrb[0].mxu1 }
 0x362   :  { %v3260_v41 = vpop.f32.mrb[1].mxu1 }
 0x363   :  { %v4700_v30 = vadd.f32 %v3260_v41, %v3259_v56  ;;  %v3262_v11 = vpop.f32.mrb[2].mxu1 }
 0x364   :  { %v3263_v19 = vpop.f32.mrb[3].mxu1 }
 0x365   :  { %v2612_v24 = vmul.f32 %v4700_v30, %v4700_v30  ;;  %v4704_v35 = vadd.f32 %v3263_v19, %v3262_v11  ;;  %v2591_v44 = vsel %vm2590_vm6, %v4700_v30, 0.0 }
 0x367   :  { %v2592_v31 = vsel %vm2590_vm6, %v4704_v35, 0.0  ;;  %v2613_v38 = vmul.f32 %v4704_v35, %v4704_v35  ;;  %v2619_v61 = vsel %vm2590_vm6, %v2612_v24, 0.0 }
 0x368   :  { %v2593_v25 = vadd.f32 %v2592_v31, %v2591_v44 }
 0x369   :  { %v2620_v7 = vsel %vm2590_vm6, %v2613_v38, 0.0 }
 0x36a   :  { %v2621_v59 = vadd.f32 %v2620_v7, %v2619_v61 }
 0x3b5   :  { %v3265_v2 = vpop.f32.mrb[4].mxu1 }
 0x3b6   :  { %v3266_v40 = vpop.f32.mrb[5].mxu1 }
 0x3b7   :  { %v4714_v23 = vadd.f32 %v3266_v40, %v3265_v2  ;;  %v3268_v36 = vpop.f32.mrb[6].mxu1 }
 0x3b8   :  { %v3269_v63 = vpop.f32.mrb[7].mxu1 }
 0x3b9   :  { %v2594_v12 = vsel %vm2590_vm6, %v4714_v23, 0.0  ;;  %v2614_v60 = vmul.f32 %v4714_v23, %v4714_v23  ;;  %v4720_v8 = vadd.f32 %v3269_v63, %v3268_v36 }
 0x3ba   :  { %v2595_v37 = vadd.f32 %v2594_v12, %v2593_v25 }
 0x3bb   :  { %v2622_v51 = vsel %vm2590_vm6, %v2614_v60, 0.0  ;;  %v2596_v34 = vsel %vm2590_vm6, %v4720_v8, 0.0  ;;  %v2615_v47 = vmul.f32 %v4720_v8, %v4720_v8 }
 0x3bc   :  { %v2623_v16 = vadd.f32 %v2622_v51, %v2621_v59  ;;  %v2597_v27 = vadd.f32 %v2596_v34, %v2595_v37  ;;  %v2589_v37 = vld [vmem:[%s4851_s4] sm:$0x3] }
 0x3bd   :  { %v2624_v52 = vsel %vm2590_vm6, %v2615_v47, 0.0  ;;  %v2660_v51 = vrot.slane %v2589_v37, %v3822_v15 }
 0x3be   :  { %v2625_v17 = vadd.f32 %v2624_v52, %v2623_v16  ;;  %v3393_v52 = vmov 1983009808  }
 0x3ef   :  { %v3271_v9 = vpop.f32.mrb[8].mxu1 }
 0x3f0   :  { %v3272_v58 = vpop.f32.mrb[9].mxu1 }
 0x3f1   :  { %v3273_v0 = vadd.f32 %v3272_v58, %v3271_v9  ;;  %v3274_v1 = vpop.f32.mrb[10].mxu1 }
 0x3f2   :  { %v3275_v14 = vpop.f32.mrb[11].mxu1 }
 0x3f3   :  { %v2598_v29 = vsel %vm2590_vm6, %v3273_v0, 0.0  ;;  %v2616_v28 = vmul.f32 %v3273_v0, %v3273_v0  ;;  %v3276_v45 = vadd.f32 %v3275_v14, %v3274_v1 }
 0x3f4   :  { %v2599_v53 = vadd.f32 %v2598_v29, %v2597_v27 }
 0x3f5   :  { %v2626_v43 = vsel %vm2590_vm6, %v2616_v28, 0.0  ;;  %v2600_v5 = vsel %vm2590_vm6, %v3276_v45, 0.0  ;;  %v2617_v13 = vmul.f32 %v3276_v45, %v3276_v45 }
 0x3f6   :  { %v2627_v3 = vadd.f32 %v2626_v43, %v2625_v17  ;;  %v2601_v10 = vadd.f32 %v2600_v5, %v2599_v53  ;;  %v2714_v17 = vunpack.c.l.s4 %v3393_v52 }
 0x3f7   :  { %v2628_v46 = vsel %vm2590_vm6, %v2617_v13, 0.0  ;;  %v3277_v48 = vpop.f32.mrb[12].mxu1 }
 0x3f8   :  { %v2629_v54 = vadd.f32 %v2628_v46, %v2627_v3  ;;  %v3278_v49 = vpop.f32.mrb[13].mxu1  ;;  %v2715_v5 = vunpack.c.0.s8 %v2714_v17 }
 0x3f9   :  { %v3279_v18 = vadd.f32 %v3278_v49, %v3277_v48  ;;  %v3280_v20 = vpop.f32.mrb[14].mxu1 }
 0x3fa   :  { %v3281_v6 = vpop.f32.mrb[15].mxu1 }
 0x3fb   :  { %v2603_v22 = vsel %vm2602_vm10, %v3279_v18, 0.0  ;;  %v2618_v55 = vmul.f32 %v3279_v18, %v3279_v18 }
 0x3fc   :  { %v2604_v32 = vadd.f32 %v2603_v22, %v2601_v10 }
 0x3fd   :  { %v2630_v26 = vsel %vm2602_vm10, %v2618_v55, 0.0 }
 0x3fe   :  { %v2605_v62 = vrot.slane %v2604_v32, 4  ;;  %v2631_v39 = vadd.f32 %v2630_v26, %v2629_v54 }
 0x400   :  { %v2606_v57 = vadd.f32 %v2605_v62, %v2604_v32  ;;  %v2632_v50 = vrot.slane %v2631_v39, 4  ;;  %v4747_v62 = vsub.s32 %v2715_v5, %v3817_v4 }
 0x402   :  { %v2607_v33 = vrot.slane %v2606_v57, 2  ;;  %v2633_v42 = vadd.f32 %v2632_v50, %v2631_v39 }
 0x404   :  { %v2608_v56 = vadd.f32 %v2607_v33, %v2606_v57  ;;  %v2634_v41 = vrot.slane %v2633_v42, 2 }
 0x406   :  { %v2609_v11 = vrot.slane %v2608_v56, 1  ;;  %v2635_v19 = vadd.f32 %v2634_v41, %v2633_v42 }
 0x408   :  { %v2610_v24 = vadd.f32 %v2609_v11, %v2608_v56  ;;  %v2636_v44 = vrot.slane %v2635_v19, 1 }
 0x40a   :  { %v2611_v31 = vmul.f32 0.02, %v2610_v24  ;;  %v2637_v38 = vadd.f32 %v2636_v44, %v2635_v19 }
 0x40c   :  { %v2638_v25 = vmul.f32 0.02, %v2637_v38  ;;  %v2639_v61 = vmul.f32 %v2611_v31, %v2611_v31  ;;  %v2641_v7 = vsub.f32 %v4700_v30, %v2611_v31  ;;  %v2642_v59 = vsub.f32 %v4704_v35, %v2611_v31 }
 0x40d   :  { %v2643_v2 = vsub.f32 %v4714_v23, %v2611_v31  ;;  %v2644_v40 = vsub.f32 %v4720_v8, %v2611_v31  ;;  %v2645_v36 = vsub.f32 %v3273_v0, %v2611_v31  ;;  %v2646_v63 = vsub.f32 %v3276_v45, %v2611_v31 }
 0x40e   :  { %v2640_v12 = vsub.f32 %v2638_v25, %v2639_v61  ;;  %v2671_v30 = vrot.slane %v2589_v37, %v3910_v21 }
 0x410   :  { %v2648_v60 = vadd.f32 1e-05, %v2640_v12 }
 0x412   :  { %3384 = vrsqrt.f32 %v2648_v60 }
 0x41c   :  { %v3385_v34 = vpop.eup %3384 }
 0x41d   :  { %v2650_v47 = vmul.f32 %v3385_v34, %v2641_v7  ;;  %v2651_v35 = vmul.f32 %v3385_v34, %v2642_v59  ;;  %v2652_v16 = vmul.f32 %v3385_v34, %v2643_v2  ;;  %v2653_v23 = vmul.f32 %v3385_v34, %v2644_v40 }
 0x41e   :  { %v2654_v27 = vmul.f32 %v3385_v34, %v2645_v36  ;;  %v2655_v8 = vmul.f32 %v3385_v34, %v2646_v63 }
 0x41f   :  { %v2661_v9 = vmul.f32 %v2660_v51, %v2650_v47  ;;  %v2663_v58 = vmul.f32 %v2660_v51, %v2652_v16  ;;  %v2662_v0 = vmul.f32 %v2660_v51, %v2651_v35  ;;  %v2664_v1 = vmul.f32 %v2660_v51, %v2653_v23 }
 0x420   :  { %v2666_v14 = vmul.f32 %v2660_v51, %v2655_v8  ;;  %v2665_v29 = vmul.f32 %v2660_v51, %v2654_v27 }
 0x421   :  { %v2672_v28 = vadd.f32 %v2671_v30, %v2661_v9  ;;  %v2674_v45 = vadd.f32 %v2671_v30, %v2663_v58  ;;  %v2673_v53 = vadd.f32 %v2671_v30, %v2662_v0  ;;  %v2675_v43 = vadd.f32 %v2671_v30, %v2664_v1 }
 0x422   :  { %v2677_v13 = vadd.f32 %v2671_v30, %v2666_v14  ;;  %v2676_v3 = vadd.f32 %v2671_v30, %v2665_v29 }
 0x423   :  { %vm2679_vm11 = vcmp.gt.f32.partialorder %v2672_v28, 0.0  ;;  %v2686_v10 = vmul.f32 0.2, %v2672_v28  ;;  %vm2681_vm15 = vcmp.gt.f32.partialorder %v2674_v45, 0.0  ;;  %v2688_v46 = vmul.f32 0.2, %v2674_v45 }
 0x424   :  { %vm2680_vm7 = vcmp.gt.f32.partialorder %v2673_v53, 0.0  ;;  %v2687_v48 = vmul.f32 0.2, %v2673_v53  ;;  %vm2682_vm12 = vcmp.gt.f32.partialorder %v2675_v43, 0.0  ;;  %v2689_v18 = vmul.f32 0.2, %v2675_v43 }
 0x425   :  { %v2693_v54 = vsel %vm2679_vm11, %v2672_v28, %v2686_v10  ;;  %v2695_v49 = vsel %vm2681_vm15, %v2674_v45, %v2688_v46  ;;  %vm2684_vm5 = vcmp.gt.f32.partialorder %v2677_v13, 0.0  ;;  %v2691_v6 = vmul.f32 0.2, %v2677_v13 }
 0x426   :  { %2700 = vst.msk [vmem:[#allocation4] sm:$0xff] %vm2590_vm6, %v2693_v54  ;;  %2702 = vst.msk [vmem:[#allocation4 + $0x10] sm:$0xff] %vm2590_vm6, %v2695_v49  ;;  %v2694_v20 = vsel %vm2680_vm7, %v2673_v53, %v2687_v48  ;;  %v2696_v22 = vsel %vm2682_vm12, %v2675_v43, %v2689_v18  ;;  %vm2683_vm9 = vcmp.gt.f32.partialorder %v2676_v3, 0.0  ;;  %v2690_v55 = vmul.f32 0.2, %v2676_v3 }
 0x427   :  { %2701 = vst.msk [vmem:[#allocation4 + $0x8] sm:$0xff] %vm2590_vm6, %v2694_v20  ;;  %2703 = vst.msk [vmem:[#allocation4 + $0x18] sm:$0xff] %vm2590_vm6, %v2696_v22  ;;  %v2698_v32 = vsel %vm2684_vm5, %v2677_v13, %v2691_v6  ;;  %v12_v22 = vstv %s4852_s6 }
 0x428   :  { %2705 = vst.msk [vmem:[#allocation4 + $0x28] sm:$0xff] %vm2590_vm6, %v2698_v32  ;;  %v2697_v26 = vsel %vm2683_vm9, %v2676_v3, %v2690_v55  ;;  %13 = vst [vmem:[#allocation6] sm:$0x1] %v12_v22 }
 0x429   :  { %2704 = vst.msk [vmem:[#allocation4 + $0x20] sm:$0xff] %vm2590_vm6, %v2697_v26 }
 0x42d   :  { %v2759_v39 = vld [vmem:[#allocation4 + $0x6] ss:$2 sm:$0x1]  ;;  %v2711_v57 = vld [vmem:[#allocation4 + $0x1] ss:$2 sm:$0x1] }
 0x42e   :  { %v2767_v50 = vrot.slane %v2759_v39, %v4747_v62  ;;  %v2719_v33 = vrot.slane %v2711_v57, %v4747_v62  ;;  %v2849_v42 = vld [vmem:[#allocation4 + $0x10] ss:$2 sm:$0x1]  ;;  %v2804_v56 = vld [vmem:[#allocation4 + $0xb] ss:$2 sm:$0x1] }
 0x42f   :  { %v2857_v41 = vrot.slane %v2849_v42, %v4747_v62  ;;  %v2812_v11 = vrot.slane %v2804_v56, %v4747_v62  ;;  %v2939_v19 = vld [vmem:[#allocation4 + $0x1f] ss:$2 sm:$0x1]  ;;  %v2894_v24 = vld [vmem:[#allocation4 + $0x1a] ss:$2 sm:$0x1] }
 0x430   :  { %2768 = vrot.lane.b32.xlu1 %v2767_v50, %s3386_s2  ;;  %2720 = vrot.lane.b32.xlu0 %v2719_v33, %s3386_s2  ;;  %v2947_v44 = vrot.slane %v2939_v19, %v4747_v62  ;;  %v2902_v31 = vrot.slane %v2894_v24, %v4747_v62  ;;  %v3029_v38 = vld [vmem:[#allocation4 + $0x29] ss:$2 sm:$0x1]  ;;  %v2984_v25 = vld [vmem:[#allocation4 + $0x24] ss:$2 sm:$0x1] }
 0x431   :  { %v2773_v61 = vld [vmem:[#allocation4 + $0x7] ss:$2 sm:$0x1]  ;;  %v2726_v7 = vld [vmem:[#allocation4 + $0x2] ss:$2 sm:$0x1]  ;;  %v3037_v40 = vrot.slane %v3029_v38, %v4747_v62  ;;  %v2992_v36 = vrot.slane %v2984_v25, %v4747_v62 }
 0x432   :  { %v2756_v59 = vld [vmem:[#allocation4 + $0x5] ss:$2 sm:$0x1]  ;;  %v2707_v2 = vld [vmem:[#allocation4] ss:$2 sm:$0x1]  ;;  %v2781_v30 = vrot.slane %v2773_v61, %v4747_v62  ;;  %v2734_v47 = vrot.slane %v2726_v7, %v4747_v62 }
 0x433   :  { %2757 = vst.msk [vmem:[#allocation5 + $0x2] sm:$0x1] %vm2708_vm3, %v2756_v59  ;;  %2709 = vst.msk [vmem:[#allocation5] sm:$0x1] %vm2708_vm3, %v2707_v2  ;;  %v3083_v7 = vsub.s32 2, %v3817_v4  ;;  %v3087_v59 = vsub.s32 3, %v3817_v4 }
 0x434   :  { %2858 = vrot.lane.b32.xlu1 %v2857_v41, %s3386_s2  ;;  %2813 = vrot.lane.b32.xlu0 %v2812_v11, %s3386_s2  ;;  %v2846_v63 = vld [vmem:[#allocation4 + $0xf] ss:$2 sm:$0x1]  ;;  %v2801_v12 = vld [vmem:[#allocation4 + $0xa] ss:$2 sm:$0x1] }
 0x435   :  { %2847 = vst.msk [vmem:[#allocation5 + $0x6] sm:$0x1] %vm2708_vm3, %v2846_v63  ;;  %2802 = vst.msk [vmem:[#allocation5 + $0x4] sm:$0x1] %vm2708_vm3, %v2801_v12  ;;  %v3071_v2 = vld [vmem:[%s4853_s5] sm:$0xf] }
 0x436   :  { %v2936_v60 = vld [vmem:[#allocation4 + $0x1e] ss:$2 sm:$0x1]  ;;  %v2891_v37 = vld [vmem:[#allocation4 + $0x19] ss:$2 sm:$0x1]  ;;  %v3076_v63 = vrot.slane %v3071_v2, %v3822_v15  ;;  %v3080_v12 = vrot.slane %v3071_v2, %v3910_v21 }
 0x437   :  { %2937 = vst.msk [vmem:[#allocation5 + $0x3] sm:$0x1] %vm2708_vm3, %v2936_v60  ;;  %2892 = vst.msk [vmem:[#allocation5 + $0x1] sm:$0x1] %vm2708_vm3, %v2891_v37  ;;  %v3084_v60 = vrot.slane %v3071_v2, %v3083_v7  ;;  %v3088_v37 = vrot.slane %v3071_v2, %v3087_v59 }
 0x438   :  { %2948 = vrot.lane.b32.xlu1 %v2947_v44, %s3386_s2  ;;  %2903 = vrot.lane.b32.xlu0 %v2902_v31, %s3386_s2  ;;  %v3026_v51 = vld [vmem:[#allocation4 + $0x28] ss:$2 sm:$0x1]  ;;  %v2981_v34 = vld [vmem:[#allocation4 + $0x23] ss:$2 sm:$0x1]  ;;  %v3089_v4 = vcombine.low %v3076_v63, %v3080_v12 }
 0x439   :  { %3027 = vst.msk [vmem:[#allocation5 + $0x7] sm:$0x1] %vm2708_vm3, %v3026_v51  ;;  %2982 = vst.msk [vmem:[#allocation5 + $0x5] sm:$0x1] %vm2708_vm3, %v2981_v34 }
 0x43a   :  { %v2863_v35 = vld [vmem:[#allocation4 + $0x11] ss:$2 sm:$0x1]  ;;  %v2818_v16 = vld [vmem:[#allocation4 + $0xc] ss:$2 sm:$0x1]  ;;  %v3097_v15 = vrot.slane %v3089_v4, %v4747_v62 }
 0x43b   :  { %v2871_v23 = vrot.slane %v2863_v35, %v4747_v62  ;;  %v2826_v27 = vrot.slane %v2818_v16, %v4747_v62  ;;  %v2953_v8 = vld [vmem:[#allocation4 + $0x20] ss:$2 sm:$0x1]  ;;  %v2908_v52 = vld [vmem:[#allocation4 + $0x1b] ss:$2 sm:$0x1] }
 0x43c   :  { %3038 = vrot.lane.b32.xlu1 %v3037_v40, %s3386_s2  ;;  %2993 = vrot.lane.b32.xlu0 %v2992_v36, %s3386_s2  ;;  %v2961_v17 = vrot.slane %v2953_v8, %v4747_v62  ;;  %v2916_v9 = vrot.slane %v2908_v52, %v4747_v62  ;;  %v3043_v58 = vld [vmem:[#allocation4 + $0x2a] ss:$2 sm:$0x1]  ;;  %v2998_v0 = vld [vmem:[#allocation4 + $0x25] ss:$2 sm:$0x1] }
 0x43d   :  { %v3051_v1 = vrot.slane %v3043_v58, %v4747_v62  ;;  %v3006_v14 = vrot.slane %v2998_v0, %v4747_v62  ;;  %v2787_v29 = vld [vmem:[#allocation4 + $0x8] ss:$2 sm:$0x1]  ;;  %v2741_v28 = vld [vmem:[#allocation4 + $0x3] ss:$2 sm:$0x1] }
 0x43e   :  { %v2795_v45 = vrot.slane %v2787_v29, %v4747_v62  ;;  %v2749_v53 = vrot.slane %v2741_v28, %v4747_v62  ;;  %v2877_v43 = vld [vmem:[#allocation4 + $0x12] ss:$2 sm:$0x1]  ;;  %v2832_v5 = vld [vmem:[#allocation4 + $0xd] ss:$2 sm:$0x1] }
 0x43f   :  { %v2885_v13 = vrot.slane %v2877_v43, %v4747_v62  ;;  %v2840_v3 = vrot.slane %v2832_v5, %v4747_v62  ;;  %v2967_v10 = vld [vmem:[#allocation4 + $0x21] ss:$2 sm:$0x1]  ;;  %v2922_v46 = vld [vmem:[#allocation4 + $0x1c] ss:$2 sm:$0x1] }
 0x440   :  { %2782 = vrot.lane.b32.xlu1 %v2781_v30, %s3389_s29  ;;  %2735 = vrot.lane.b32.xlu0 %v2734_v47, %s3389_s29  ;;  %v2975_v48 = vrot.slane %v2967_v10, %v4747_v62  ;;  %v2930_v54 = vrot.slane %v2922_v46, %v4747_v62  ;;  %v3057_v49 = vld [vmem:[#allocation4 + $0x2b] ss:$2 sm:$0x1]  ;;  %v3012_v18 = vld [vmem:[#allocation4 + $0x26] ss:$2 sm:$0x1]  ;;  %v3090_v30 = vcombine.low %v3084_v60, %v3088_v37 }
 0x441   :  { %v3065_v20 = vrot.slane %v3057_v49, %v4747_v62  ;;  %v3020_v6 = vrot.slane %v3012_v18, %v4747_v62  ;;  %v3217_v43 = vld [vmem:[#allocation6] ss:$0 sm:$0xff] }
 0x442   :  { %v3104_v21 = vrot.slane %v3090_v30, %v4747_v62 }
 0x444   :  { %2872 = vrot.lane.b32.xlu1 %v2871_v23, %s3389_s29  ;;  %2827 = vrot.lane.b32.xlu0 %v2826_v27, %s3389_s29  ;;  %v3105_v16 = vcombine.low %v3097_v15, %v3104_v21 }
 0x448   :  { %2962 = vrot.lane.b32.xlu1 %v2961_v17, %s3389_s29  ;;  %2917 = vrot.lane.b32.xlu0 %v2916_v9, %s3389_s29 }
 0x44c   :  { %3052 = vrot.lane.b32.xlu1 %v3051_v1, %s3389_s29  ;;  %3007 = vrot.lane.b32.xlu0 %v3006_v14, %s3389_s29 }
 0x450   :  { %2796 = vrot.lane.b32.xlu1 %v2795_v45, %s3391_s8  ;;  %2750 = vrot.lane.b32.xlu0 %v2749_v53, %s3391_s8 }
 0x454   :  { %2886 = vrot.lane.b32.xlu1 %v2885_v13, %s3391_s8  ;;  %2841 = vrot.lane.b32.xlu0 %v2840_v3, %s3391_s8 }
 0x458   :  { %2976 = vrot.lane.b32.xlu1 %v2975_v48, %s3391_s8  ;;  %2931 = vrot.lane.b32.xlu0 %v2930_v54, %s3391_s8 }
 0x45c   :  { %3066 = vrot.lane.b32.xlu1 %v3065_v20, %s3391_s8  ;;  %3021 = vrot.lane.b32.xlu0 %v3020_v6, %s3391_s8 }
 0x4a2   :  { %v2769_v55 = vpop.permute.xlu1 %2768  ;;  %v2721_v32 = vpop.permute.xlu0 %2720 }
 0x4a3   :  { %2771 = vst.msk [vmem:[#allocation5 + $0x2] sm:$0x1] %vm2723_vm14, %v2769_v55  ;;  %2724 = vst.msk [vmem:[#allocation5] sm:$0x1] %vm2723_vm14, %v2721_v32 }
 0x4a6   :  { %v2859_v26 = vpop.permute.xlu1 %2858  ;;  %v2814_v39 = vpop.permute.xlu0 %2813 }
 0x4a7   :  { %2861 = vst.msk [vmem:[#allocation5 + $0x6] sm:$0x1] %vm2723_vm14, %v2859_v26  ;;  %2816 = vst.msk [vmem:[#allocation5 + $0x4] sm:$0x1] %vm2723_vm14, %v2814_v39 }
 0x4aa   :  { %v2949_v57 = vpop.permute.xlu1 %2948  ;;  %v2904_v50 = vpop.permute.xlu0 %2903 }
 0x4ab   :  { %2951 = vst.msk [vmem:[#allocation5 + $0x3] sm:$0x1] %vm2723_vm14, %v2949_v57  ;;  %2906 = vst.msk [vmem:[#allocation5 + $0x1] sm:$0x1] %vm2723_vm14, %v2904_v50 }
 0x4ae   :  { %v3039_v33 = vpop.permute.xlu1 %3038  ;;  %v2994_v42 = vpop.permute.xlu0 %2993 }
 0x4af   :  { %3041 = vst.msk [vmem:[#allocation5 + $0x7] sm:$0x1] %vm2723_vm14, %v3039_v33  ;;  %2996 = vst.msk [vmem:[#allocation5 + $0x5] sm:$0x1] %vm2723_vm14, %v2994_v42 }
 0x4b2   :  { %v2783_v56 = vpop.permute.xlu1 %2782  ;;  %v2736_v41 = vpop.permute.xlu0 %2735 }
 0x4b3   :  { %2785 = vst.msk [vmem:[#allocation5 + $0x2] sm:$0x1] %vm2738_vm8, %v2783_v56  ;;  %2739 = vst.msk [vmem:[#allocation5] sm:$0x1] %vm2738_vm8, %v2736_v41 }
 0x4b6   :  { %v2873_v11 = vpop.permute.xlu1 %2872  ;;  %v2828_v19 = vpop.permute.xlu0 %2827 }
 0x4b7   :  { %2875 = vst.msk [vmem:[#allocation5 + $0x6] sm:$0x1] %vm2738_vm8, %v2873_v11  ;;  %2830 = vst.msk [vmem:[#allocation5 + $0x4] sm:$0x1] %vm2738_vm8, %v2828_v19 }
 0x4ba   :  { %v2963_v24 = vpop.permute.xlu1 %2962  ;;  %v2918_v44 = vpop.permute.xlu0 %2917 }
 0x4bb   :  { %2965 = vst.msk [vmem:[#allocation5 + $0x3] sm:$0x1] %vm2738_vm8, %v2963_v24  ;;  %2920 = vst.msk [vmem:[#allocation5 + $0x1] sm:$0x1] %vm2738_vm8, %v2918_v44 }
 0x4be   :  { %v3053_v31 = vpop.permute.xlu1 %3052  ;;  %v3008_v38 = vpop.permute.xlu0 %3007 }
 0x4bf   :  { %3055 = vst.msk [vmem:[#allocation5 + $0x7] sm:$0x1] %vm2738_vm8, %v3053_v31  ;;  %3010 = vst.msk [vmem:[#allocation5 + $0x5] sm:$0x1] %vm2738_vm8, %v3008_v38 }
 0x4c2   :  { %v2797_v25 = vpop.permute.xlu1 %2796  ;;  %v2751_v61 = vpop.permute.xlu0 %2750 }
 0x4c3   :  { %2799 = vst.msk [vmem:[#allocation5 + $0x2] sm:$0x1] %vm2753_vm0, %v2797_v25  ;;  %2754 = vst.msk [vmem:[#allocation5] sm:$0x1] %vm2753_vm0, %v2751_v61 }
 0x4c6   :  { %v2887_v40 = vpop.permute.xlu1 %2886  ;;  %v2842_v36 = vpop.permute.xlu0 %2841 }
 0x4c7   :  { %2889 = vst.msk [vmem:[#allocation5 + $0x6] sm:$0x1] %vm2753_vm0, %v2887_v40  ;;  %2844 = vst.msk [vmem:[#allocation5 + $0x4] sm:$0x1] %vm2753_vm0, %v2842_v36 }
 0x4ca   :  { %v2977_v51 = vpop.permute.xlu1 %2976  ;;  %v2932_v34 = vpop.permute.xlu0 %2931 }
 0x4cb   :  { %2979 = vst.msk [vmem:[#allocation5 + $0x3] sm:$0x1] %vm2753_vm0, %v2977_v51  ;;  %2934 = vst.msk [vmem:[#allocation5 + $0x1] sm:$0x1] %vm2753_vm0, %v2932_v34 }
 0x4ce   :  { %v3067_v47 = vpop.permute.xlu1 %3066  ;;  %v3022_v35 = vpop.permute.xlu0 %3021 }
 0x4cf   :  { %3069 = vst.msk [vmem:[#allocation5 + $0x7] sm:$0x1] %vm2753_vm0, %v3067_v47  ;;  %3024 = vst.msk [vmem:[#allocation5 + $0x5] sm:$0x1] %vm2753_vm0, %v3022_v35 }
 0x4d6   :  { %v3070_v23 = vld [vmem:[#allocation5] sm:$0xff] }
 0x4d7   :  { %v3107_v27 = vmul.f32 %v3105_v16, %v3070_v23 }
 0x4d9   :  { %v3109_v8 = vcombine.high %v3107_v27, %v3107_v27  ;;  %v3116_v52 = vrot.slane %v3107_v27, %v4747_v62 }
 0x4db   :  { %v3123_v17 = vrot.slane %v3109_v8, %v4747_v62  ;;  %v3124_v9 = vcombine.high %v3116_v52, %v3116_v52  ;;  %v3131_v0 = vsel %vm3130_vm4, %v3116_v52, 0.0 }
 0x4dd   :  { %v3125_v58 = vcombine.high %v3123_v17, %v3123_v17  ;;  %v3132_v1 = vsel %vm3130_vm4, %v3124_v9, 0.0  ;;  %v3134_v29 = vsel %vm3130_vm4, %v3123_v17, 0.0 }
 0x4de   :  { %v3133_v14 = vadd.f32 %v3132_v1, %v3131_v0 }
 0x4df   :  { %v3136_v45 = vsel %vm3130_vm4, %v3125_v58, 0.0 }
 0x4e0   :  { %v3135_v28 = vadd.f32 %v3134_v29, %v3133_v14 }
 0x4e2   :  { %v3137_v53 = vadd.f32 %v3136_v45, %v3135_v28 }
 0x4e4   :  { %3138 = vadd.xlane.f32.xlu0 %v3137_v53 }
 0x571   :  { %v3139_v5 = vpop.xlane.xlu0 %3138 }
 0x572   :  { %v3147_v13 = vadd.f32 %v3217_v43, %v3139_v5 }
 0x574   :  { %3149 = vst.msk [vmem:[%s4854_s7] sm:$0x3] %vm3148_vm13, %v3147_v13 }

</bundles_post_ra>
